<compile_context>
chip_gen: v7x
topology: tpu7x:2x2x1
jax: 0.10.0
libtpu: 0.0.40
codegen_flags: <defaults>
</compile_context>

<pallas_src>
import functools
import math

import jax
import jax.numpy as jnp
from jax import lax
from jax.experimental import pallas as pl
from jax.experimental.pallas import tpu as pltpu

# ----------------------------- static configuration ------------------------------
B = 2
T = 16
N_EMBD = 32                      # n_embd (d_model)
D_STATE = 16                     # Mamba default
D_CONV = 4                       # Mamba default
EXPAND = 2                       # Mamba default
D_INNER = EXPAND * N_EMBD        # 64
D_PACK = 2 * D_INNER             # 128: fwd lanes [0,64), bwd lanes [64,128)
DT_RANK = math.ceil(N_EMBD / 16) # 2
NX = DT_RANK + 2 * D_STATE       # 34 (x_proj output per direction)
N_HIDDEN = 4 * N_EMBD            # 128

# ---- weight-slab row offsets (all bf16 segments start on a multiple of 16) ------
# slab "wmat": bf16, (320, 128) -- matmul weights with 128 output lanes
_WM_INPROJ = 0                   # rows [0, 32)    in_proj^T           (32, 128)
_WM_XPROJ = 32                   # rows [32, 160)  block-diag x_proj^T (128, 128)
_WM_DTPROJ = 160                 # rows [160, 288) block-diag dt_proj^T(128, 128)
_WM_MLP1 = 288                   # rows [288, 320) mlp conv1 w^T       (32, 128)
_WM_ROWS = 320
# slab "wout": bf16, (192, 32) -- matmul weights with 32 output lanes
_WO_OUTPROJ = 0                  # rows [0, 64)    out_proj^T          (64, 32)
_WO_MLP2 = 64                    # rows [64, 192)  mlp conv2 w^T       (128, 32)
_WO_ROWS = 192
# slab "wvec": f32, (32, 128) -- VPU / broadcast parameters
_WV_CONVW = 0                    # rows [0, 4)     depthwise conv taps (4, 128)
_WV_CONVB = 4                    # conv bias
_WV_DTBIAS = 5                   # dt_proj bias
_WV_D = 6                        # D skip vector
_WV_MLPB1 = 7                    # mlp conv1 bias
_WV_A = 8                        # rows [8, 24)    A = -exp(A_log)^T   (16, 128)
_WV_LNM_W = 24                   # ln_mamba weight (first 32 lanes)
_WV_LNM_B = 25                   # ln_mamba bias
_WV_LN1_W = 26                   # ln1 weight
_WV_LN1_B = 27                   # ln1 bias
_WV_MLPB2 = 28                   # mlp conv2 bias (first 32 lanes)
_WV_ROWS = 32


# ----------------------------- in-kernel math helpers -----------------------------
def _sigmoid(x):
    # logistic via the EUP tanh (exact identity): keeps the divide off the VPU.
    return 0.5 * (jnp.tanh(0.5 * x) + 1.0)


def _silu(x):
    return x * _sigmoid(x)


def _softplus(x):
    # matches torch.nn.functional.softplus (threshold=20): exactly x for x > 20,
    # numerically stable log1p-style form otherwise.
    stable = jnp.maximum(x, 0.0) + jnp.log(1.0 + jnp.exp(-jnp.abs(x)))
    return jnp.where(x > 20.0, x, stable)


def _gelu(x):
    # TODO(synk): PyTorch nn.GELU() defaults to the exact erf form; tanh approximation
    # is used because erf has no guaranteed Mosaic lowering (error ~1e-3).
    c = math.sqrt(2.0 / math.pi)
    return 0.5 * x * (1.0 + jnp.tanh(c * (x + 0.044715 * x * x * x)))


def _channel_ln(x, w, b, eps):
    # actionformer LayerNorm over the channel dim; here x is (T, C), channels last.
    mu = jnp.mean(x, axis=-1, keepdims=True)
    xc = x - mu
    var = jnp.mean(xc * xc, axis=-1, keepdims=True)
    return xc * lax.rsqrt(var + eps) * w + b


def _vrow(ref, r, width=None):
    # load one (1, 128) parameter row; optionally lane-slice to `width` channels.
    row = ref[r:r + 1, :]
    return row if width is None else row[:, :width]


# ----------------------------- fused ObjectMambaBlock kernel ----------------------
def _object_mamba_block_kernel(
        lens_ref,                 # SMEM (B,) int32 -- scalar-prefetched valid lengths
        x_ref,                    # VMEM (T, C)  channels-last input block
        wmat_ref,                 # VMEM (320, 128) bf16  matmul-weight slab
        wout_ref,                 # VMEM (192, 32)  bf16  matmul-weight slab (32 lanes)
        wvec_ref,                 # VMEM (32, 128)  f32   vector-parameter slab
        o_ref,                    # VMEM (T, C)  channels-last output block
        *, seq_len, eps):
    tt = seq_len
    bf16 = jnp.bfloat16

    x_tc = x_ref[...].astype(jnp.float32)                      # (T, C) channels-last

    # valid length for this batch (scalar from SMEM) -> mask column + reversal perm.
    vl = lens_ref[pl.program_id(0)]
    t_iota = lax.broadcasted_iota(jnp.int32, (tt, 1), 0)
    mask_col = (t_iota < vl).astype(jnp.float32)               # (T, 1)

    # ---- ln_mamba (channel LayerNorm) ----
    h = _channel_ln(x_tc, _vrow(wvec_ref, _WV_LNM_W, N_EMBD),
                    _vrow(wvec_ref, _WV_LNM_B, N_EMBD), eps)   # (T, C)

    # ---- in_proj: xz = [x | z] for one direction (bf16 MXU, f32 accumulate) ----
    xz = jnp.dot(h.astype(bf16), wmat_ref[_WM_INPROJ:_WM_INPROJ + N_EMBD, :],
                 preferred_element_type=jnp.float32)           # (T, 128)

    # ---- mask-based time reversal as a permutation matmul (self-inverse) ----
    # kept in f32: the perm matmul is an exact gather of already-computed values.
    ti = lax.broadcasted_iota(jnp.int32, (tt, tt), 0)
    ji = lax.broadcasted_iota(jnp.int32, (tt, tt), 1)
    tgt = jnp.where(ti < vl, vl - 1 - ti, ti)
    perm = (ji == tgt).astype(jnp.float32)                     # (T, T)
    xz_rev = jnp.dot(perm, xz, preferred_element_type=jnp.float32)

    # ---- pack directions on the lane axis: fwd lanes [0,64), bwd lanes [64,128) ----
    x_pack = jnp.concatenate([xz[:, :D_INNER], xz_rev[:, :D_INNER]], axis=1)   # (T,128)
    z_pack = jnp.concatenate([xz[:, D_INNER:], xz_rev[:, D_INNER:]], axis=1)   # (T,128)

    # ---- depthwise causal conv (K=4, pad K-1, truncate to T) + SiLU, both dirs ----
    cw = wvec_ref[_WV_CONVW:_WV_CONVW + D_CONV, :]             # (K, 128)
    cb = _vrow(wvec_ref, _WV_CONVB)                            # (1, 128)
    xp = jnp.concatenate(
        [jnp.zeros((D_CONV - 1, D_PACK), jnp.float32), x_pack], axis=0)  # (T+K-1,128)
    acc = jnp.broadcast_to(cb, (tt, D_PACK))
    for k in range(D_CONV):
        acc = acc + cw[k:k + 1, :] * xp[k:k + tt, :]
    u = _silu(acc)                                             # (T, 128)

    # ---- x_proj / dt_proj (block-diag, zero-padded to 128 cols, bf16 MXU) ----
    x_dbl = jnp.dot(u.astype(bf16), wmat_ref[_WM_XPROJ:_WM_XPROJ + D_PACK, :],
                    preferred_element_type=jnp.float32)        # (T, 128); cols>=68 are 0
    delta = _softplus(
        jnp.dot(x_dbl.astype(bf16), wmat_ref[_WM_DTPROJ:_WM_DTPROJ + D_PACK, :],
                preferred_element_type=jnp.float32)
        + _vrow(wvec_ref, _WV_DTBIAS))                         # (T, 128)

    b_fT = x_dbl[:, DT_RANK:DT_RANK + D_STATE].T               # (S, T)
    c_fT = x_dbl[:, DT_RANK + D_STATE:NX].T                    # (S, T)
    b_bT = x_dbl[:, NX + DT_RANK:NX + DT_RANK + D_STATE].T     # (S, T)
    c_bT = x_dbl[:, NX + DT_RANK + D_STATE:2 * NX].T           # (S, T)

    a_mat = wvec_ref[_WV_A:_WV_A + D_STATE, :]                 # (S, 128) = A^T packed
    d_vec = _vrow(wvec_ref, _WV_D)                             # (1, 128)
    fwd_lane = jnp.broadcast_to(
        lax.broadcasted_iota(jnp.int32, (1, D_PACK), 1) < D_INNER,
        (D_STATE, D_PACK))                                     # hoisted lane mask

    # ---- selective scan, statically unrolled over T; per-step rows stay in vregs ----
    du = delta * u                                             # (T, 128)
    state = jnp.zeros((D_STATE, D_PACK), jnp.float32)
    ys = []
    for t in range(tt):
        da = jnp.exp(delta[t:t + 1, :] * a_mat)                             # (S, 128)
        b_col = jnp.where(fwd_lane, b_fT[:, t:t + 1], b_bT[:, t:t + 1])     # (S, 128)
        state = da * state + b_col * du[t:t + 1, :]
        c_col = jnp.where(fwd_lane, c_fT[:, t:t + 1], c_bT[:, t:t + 1])     # (S, 128)
        ys.append(jnp.sum(c_col * state, axis=0, keepdims=True))            # (1, 128)
    y = jnp.concatenate(ys, axis=0)                            # (T, 128), no VMEM trip
    y = (y + u * d_vec) * _silu(z_pack)                        # + D*u, gate by silu(z)

    # ---- un-pack directions, un-reverse bwd, combine, out_proj (bf16 MXU) ----
    y_b = jnp.dot(perm, y[:, D_INNER:], preferred_element_type=jnp.float32)  # (T, 64)
    mamba_core = jnp.dot((y[:, :D_INNER] + y_b).astype(bf16),
                         wout_ref[_WO_OUTPROJ:_WO_OUTPROJ + D_INNER, :],
                         preferred_element_type=jnp.float32)                 # (T, C)

    # ---- residual: mamba_out = x*mask + mamba(ln_mamba(x)) ----
    mamba_out = x_tc * mask_col + mamba_core

    # ---- MLP branch: out = mamba_out + mlp(ln1(mamba_out)) * mask ----
    h1 = _channel_ln(mamba_out, _vrow(wvec_ref, _WV_LN1_W, N_EMBD),
                     _vrow(wvec_ref, _WV_LN1_B, N_EMBD), eps)
    m = _gelu(jnp.dot(h1.astype(bf16), wmat_ref[_WM_MLP1:_WM_MLP1 + N_EMBD, :],
                      preferred_element_type=jnp.float32)
              + _vrow(wvec_ref, _WV_MLPB1))
    m = (jnp.dot(m.astype(bf16), wout_ref[_WO_MLP2:_WO_MLP2 + N_HIDDEN, :],
                 preferred_element_type=jnp.float32)
         + _vrow(wvec_ref, _WV_MLPB2, N_EMBD))
    out = mamba_out + m * mask_col                             # (T, C)

    o_ref[...] = out.astype(o_ref.dtype)                       # lane-dense (T, C) store


# ----------------------------- parameter packing (done once, outside jit) ---------
def pack_params(p):
    m = p["mamba"]
    f, b = m["fwd"], m["bwd"]

    def conv_kd(d):
        return jnp.transpose(d["conv_w"][:, 0, :], (1, 0))     # (K, D_inner)

    def row128(v):
        v = jnp.asarray(v, jnp.float32).reshape(1, -1)
        return jnp.pad(v, ((0, 0), (0, 128 - v.shape[1])))

    # --- slab 1: bf16 matmul weights with 128 output lanes, (320, 128) ---
    inproj = m["in_proj_w"].T                                   # (32, 128)

    xproj = jnp.zeros((D_PACK, 128), jnp.float32)               # block-diag x_proj^T
    xproj = xproj.at[:D_INNER, :NX].set(f["xproj_w"].T)
    xproj = xproj.at[D_INNER:, NX:2 * NX].set(b["xproj_w"].T)

    dtproj = jnp.zeros((128, D_PACK), jnp.float32)              # block-diag dt_proj^T
    dtproj = dtproj.at[:DT_RANK, :D_INNER].set(f["dtproj_w"].T)
    dtproj = dtproj.at[NX:NX + DT_RANK, D_INNER:].set(b["dtproj_w"].T)

    wmat = jnp.concatenate([inproj, xproj, dtproj, p["mlp_w1"].T],
                           axis=0).astype(jnp.bfloat16)         # (320, 128)
    assert wmat.shape == (_WM_ROWS, 128)

    # --- slab 2: bf16 matmul weights with 32 output lanes, (192, 32) ---
    wout = jnp.concatenate([m["out_proj_w"].T, p["mlp_w2"].T],
                           axis=0).astype(jnp.bfloat16)         # (192, 32)
    assert wout.shape == (_WO_ROWS, N_EMBD)

    # --- slab 3: f32 VPU / broadcast parameters, (32, 128) ---
    a_pack = jnp.concatenate(
        [(-jnp.exp(f["A_log"].astype(jnp.float32))).T,
         (-jnp.exp(b["A_log"].astype(jnp.float32))).T], axis=1)  # (S, 128)
    wvec = jnp.concatenate([
        jnp.concatenate([conv_kd(f), conv_kd(b)], axis=1),               # rows 0..3
        row128(jnp.concatenate([f["conv_bias"], b["conv_bias"]])),       # row 4
        row128(jnp.concatenate([f["dtproj_bias"], b["dtproj_bias"]])),   # row 5
        row128(jnp.concatenate([f["D"], b["D"]])),                       # row 6
        row128(p["mlp_b1"]),                                             # row 7
        a_pack,                                                          # rows 8..23
        row128(p["ln_mamba_w"]),                                         # row 24
        row128(p["ln_mamba_b"]),                                         # row 25
        row128(p["ln1_w"]),                                              # row 26
        row128(p["ln1_b"]),                                              # row 27
        row128(p["mlp_b2"]),                                             # row 28
        jnp.zeros((3, 128), jnp.float32),                                # rows 29..31
    ], axis=0).astype(jnp.float32)
    assert wvec.shape == (_WV_ROWS, 128)

    return dict(wmat=wmat, wout=wout, wvec=wvec)


# ----------------------------- public wrappers --------------------------------------
def object_mamba_block_tlast(x_btc, mask_b1t, pk):
    """Kernel-native channels-last entry point.  x: (B, T, C), mask: (B, 1, T) bool."""
    bsz, t, c = x_btc.shape
    lengths = jnp.sum(mask_b1t.astype(jnp.int32), axis=-1).reshape(bsz)   # (B,) int32

    grid_spec = pltpu.PrefetchScalarGridSpec(
        num_scalar_prefetch=1,               # lengths -> SMEM before the grid runs
        grid=(bsz,),
        in_specs=[
            pl.BlockSpec((None, t, c), lambda i, lens: (i, 0, 0)),   # x (per-batch)
            pl.BlockSpec((_WM_ROWS, 128), lambda i, lens: (0, 0)),   # wmat slab
            pl.BlockSpec((_WO_ROWS, N_EMBD), lambda i, lens: (0, 0)),  # wout slab
            pl.BlockSpec((_WV_ROWS, 128), lambda i, lens: (0, 0)),   # wvec slab
        ],
        out_specs=pl.BlockSpec((None, t, c), lambda i, lens: (i, 0, 0)),
    )
    out = pl.pallas_call(
        functools.partial(_object_mamba_block_kernel, seq_len=t, eps=1e-5),
        out_shape=jax.ShapeDtypeStruct((bsz, t, c), x_btc.dtype),
        grid_spec=grid_spec,
        compiler_params=pltpu.CompilerParams(
            dimension_semantics=("parallel",)),                   # v7x: 2 TensorCores
    )(lengths, x_btc, pk["wmat"], pk["wout"], pk["wvec"])
    return out, mask_b1t


def object_mamba_block(x_bct, mask_b1t, pk):
    """Module-convention wrapper.  x: (B, C, T), mask: (B, 1, T) bool -> ((B,C,T), mask).
    The (tiny) transposes are plain XLA ops outside the kernel; callers whose pipeline
    is already channels-last should call object_mamba_block_tlast directly."""
    x_btc = jnp.transpose(x_bct, (0, 2, 1))
    out_btc, _ = object_mamba_block_tlast(x_btc, mask_b1t, pk)
    return jnp.transpose(out_btc, (0, 2, 1)), mask_b1t


# ----------------------------- deterministic parameter init ------------------------
def init_params(key):
    ks = iter(jax.random.split(key, 32))

    def nrm(shape, scale=0.05):
        return scale * jax.random.normal(next(ks), shape, dtype=jnp.float32)

    def mamba_dir():
        a_init = jnp.tile(jnp.arange(1, D_STATE + 1, dtype=jnp.float32)[None, :],
                          (D_INNER, 1))
        return dict(
            conv_w=nrm((D_INNER, 1, D_CONV), 0.3),
            conv_bias=nrm((D_INNER,), 0.1),
            xproj_w=nrm((DT_RANK + 2 * D_STATE, D_INNER)),
            dtproj_w=nrm((D_INNER, DT_RANK), 0.3),
            dtproj_bias=nrm((D_INNER,), 0.1),
            A_log=jnp.log(a_init),
            D=jnp.ones((D_INNER,), jnp.float32),
        )

    mamba = dict(
        in_proj_w=nrm((2 * D_INNER, N_EMBD)),
        out_proj_w=nrm((N_EMBD, D_INNER)),
        fwd=mamba_dir(),
        bwd=mamba_dir(),
    )
    return dict(
        mamba=mamba,
        ln_mamba_w=jnp.ones((N_EMBD,), jnp.float32),
        ln_mamba_b=jnp.zeros((N_EMBD,), jnp.float32),
        ln1_w=jnp.ones((N_EMBD,), jnp.float32),
        ln1_b=jnp.zeros((N_EMBD,), jnp.float32),
        mlp_w1=nrm((N_HIDDEN, N_EMBD)),
        mlp_b1=nrm((N_HIDDEN,), 0.01),
        mlp_w2=nrm((N_EMBD, N_HIDDEN)),
        mlp_b2=nrm((N_EMBD,), 0.01),
    )


# ----------------------------------- main ------------------------------------------
if __name__ == "__main__":
    key = jax.random.PRNGKey(0)
    pkey, xkey = jax.random.split(key)
    params = init_params(pkey)
    packed = pack_params(params)          # one-time weight packing, outside jit

    x = jax.random.normal(xkey, (B, N_EMBD, T), dtype=jnp.float32)   # (B, C, T)
    lengths = jnp.array([T, 11], dtype=jnp.int32)
    mask = (jnp.arange(T)[None, :] < lengths[:, None])[:, None, :]   # (B, 1, T) bool

    out, out_mask = jax.jit(object_mamba_block)(x, mask, packed)
    out = jax.block_until_ready(out)

    assert out.shape == (B, N_EMBD, T)
    assert out_mask.shape == (B, 1, T)
    assert bool(jnp.all(jnp.isfinite(out)))
    print("KERNEL_OK")
</pallas_src>

<mosaic_0001>
module attributes {stable_mosaic.version = 11 : i64} {
  func.func @_object_mamba_block_kernel(%arg0: i32, %arg1: memref<2xi32, #tpu.memory_space<smem>>, %arg2: memref<1x16x32xf32, #tpu.memory_space<vmem>>, %arg3: memref<320x128xbf16, #tpu.memory_space<vmem>>, %arg4: memref<192x32xbf16, #tpu.memory_space<vmem>>, %arg5: memref<32x128xf32, #tpu.memory_space<vmem>>, %arg6: memref<1x16x32xf32, #tpu.memory_space<vmem>>) attributes {dimension_semantics = [#tpu.dimension_semantics<parallel>], iteration_bounds = array<i64: 2>, scalar_prefetch = 1 : i64, scratch_operands = 0 : i64, tpu.core_type = #tpu.core_type<tc>, window_params = [{transform_indices = @transform_0, window_bounds = array<i64: 1, 16, 32>}, {pipeline_mode = #tpu.pipeline_mode<synchronous>, transform_indices = @transform_1, window_bounds = array<i64: 320, 128>}, {pipeline_mode = #tpu.pipeline_mode<synchronous>, transform_indices = @transform_2, window_bounds = array<i64: 192, 32>}, {pipeline_mode = #tpu.pipeline_mode<synchronous>, transform_indices = @transform_3, window_bounds = array<i64: 32, 128>}, {transform_indices = @transform_4, window_bounds = array<i64: 1, 16, 32>}]} {
    %c0 = arith.constant 0 : index
    %c0_0 = arith.constant 0 : index
    %c0_1 = arith.constant 0 : index
    %0 = vector.load %arg2[%c0, %c0_0, %c0_1] : memref<1x16x32xf32, #tpu.memory_space<vmem>>, vector<1x16x32xf32>
    %1 = vector.shape_cast %0 : vector<1x16x32xf32> to vector<16x32xf32>
    %2 = arith.index_cast %arg0 : i32 to index
    %3 = memref.load %arg1[%2] : memref<2xi32, #tpu.memory_space<smem>>
    %4 = tpu.iota {dimensions = array<i32: 0>} : vector<16x1xi32>
    %5 = vector.broadcast %3 : i32 to vector<16x1xi32>
    %6 = arith.cmpi slt, %4, %5 : vector<16x1xi32>
    %7 = arith.extui %6 : vector<16x1xi1> to vector<16x1xi32>
    %8 = arith.sitofp %7 : vector<16x1xi32> to vector<16x1xf32>
    %c24 = arith.constant 24 : index
    %c0_2 = arith.constant 0 : index
    %9 = vector.load %arg5[%c24, %c0_2] : memref<32x128xf32, #tpu.memory_space<vmem>>, vector<1x128xf32>
    %10 = vector.extract_strided_slice %9 {offsets = [0, 0], sizes = [1, 32], strides = [1, 1]} : vector<1x128xf32> to vector<1x32xf32>
    %c25 = arith.constant 25 : index
    %c0_3 = arith.constant 0 : index
    %11 = vector.load %arg5[%c25, %c0_3] : memref<32x128xf32, #tpu.memory_space<vmem>>, vector<1x128xf32>
    %12 = vector.extract_strided_slice %11 {offsets = [0, 0], sizes = [1, 32], strides = [1, 1]} : vector<1x128xf32> to vector<1x32xf32>
    %cst = arith.constant dense<0.000000e+00> : vector<16xf32>
    %13 = vector.multi_reduction <add>, %1, %cst [1] : vector<16x32xf32> to vector<16xf32>
    %14 = vector.shape_cast %13 : vector<16xf32> to vector<16x1xf32>
    %cst_4 = arith.constant 3.200000e+01 : f32
    %15 = vector.broadcast %cst_4 : f32 to vector<16x1xf32>
    %16 = arith.divf %14, %15 : vector<16x1xf32>
    %17 = vector.broadcast %16 : vector<16x1xf32> to vector<16x32xf32>
    %18 = arith.subf %1, %17 : vector<16x32xf32>
    %19 = arith.mulf %18, %18 : vector<16x32xf32>
    %cst_5 = arith.constant dense<0.000000e+00> : vector<16xf32>
    %20 = vector.multi_reduction <add>, %19, %cst_5 [1] : vector<16x32xf32> to vector<16xf32>
    %21 = vector.shape_cast %20 : vector<16xf32> to vector<16x1xf32>
    %cst_6 = arith.constant 3.200000e+01 : f32
    %22 = vector.broadcast %cst_6 : f32 to vector<16x1xf32>
    %23 = arith.divf %21, %22 : vector<16x1xf32>
    %cst_7 = arith.constant 9.99999974E-6 : f32
    %24 = vector.broadcast %cst_7 : f32 to vector<16x1xf32>
    %25 = arith.addf %23, %24 : vector<16x1xf32>
    %26 = math.rsqrt %25 : vector<16x1xf32>
    %27 = vector.broadcast %26 : vector<16x1xf32> to vector<16x32xf32>
    %28 = arith.mulf %18, %27 : vector<16x32xf32>
    %29 = vector.broadcast %10 : vector<1x32xf32> to vector<16x32xf32>
    %30 = arith.mulf %28, %29 : vector<16x32xf32>
    %31 = vector.broadcast %12 : vector<1x32xf32> to vector<16x32xf32>
    %32 = arith.addf %30, %31 : vector<16x32xf32>
    %33 = arith.truncf %32 : vector<16x32xf32> to vector<16x32xbf16>
    %c0_8 = arith.constant 0 : index
    %c0_9 = arith.constant 0 : index
    %34 = vector.load %arg3[%c0_8, %c0_9] : memref<320x128xbf16, #tpu.memory_space<vmem>>, vector<32x128xbf16>
    %cst_10 = arith.constant dense<0.000000e+00> : vector<16x128xf32>
    %35 = tpu.matmul %33, %34, %cst_10 {dimension_numbers = #tpu.dot_dimension_numbers<[1], [0], [0], [1], [0, 0, 1, 1], [], []>} : vector<16x32xbf16>, vector<32x128xbf16>, vector<16x128xf32> -> vector<16x128xf32>
    %36 = tpu.iota {dimensions = array<i32: 0>} : vector<16x16xi32>
    %37 = tpu.iota {dimensions = array<i32: 1>} : vector<16x16xi32>
    %38 = vector.broadcast %3 : i32 to vector<16x16xi32>
    %39 = arith.cmpi slt, %36, %38 : vector<16x16xi32>
    %c1_i32 = arith.constant 1 : i32
    %40 = arith.subi %3, %c1_i32 : i32
    %41 = vector.broadcast %40 : i32 to vector<16x16xi32>
    %42 = arith.subi %41, %36 : vector<16x16xi32>
    %43 = arith.select %39, %42, %36 : vector<16x16xi1>, vector<16x16xi32>
    %44 = arith.cmpi eq, %37, %43 : vector<16x16xi32>
    %45 = arith.extui %44 : vector<16x16xi1> to vector<16x16xi32>
    %46 = arith.sitofp %45 : vector<16x16xi32> to vector<16x16xf32>
    %cst_11 = arith.constant dense<0.000000e+00> : vector<16x128xf32>
    %47 = tpu.matmul %46, %35, %cst_11 {dimension_numbers = #tpu.dot_dimension_numbers<[1], [0], [0], [1], [0, 0, 1, 1], [], []>} : vector<16x16xf32>, vector<16x128xf32>, vector<16x128xf32> -> vector<16x128xf32>
    %48 = vector.extract_strided_slice %35 {offsets = [0, 0], sizes = [16, 64], strides = [1, 1]} : vector<16x128xf32> to vector<16x64xf32>
    %49 = vector.extract_strided_slice %47 {offsets = [0, 0], sizes = [16, 64], strides = [1, 1]} : vector<16x128xf32> to vector<16x64xf32>
    %50 = tpu.concatenate %48, %49 in 1 : vector<16x64xf32>, vector<16x64xf32> -> vector<16x128xf32>
    %51 = vector.extract_strided_slice %35 {offsets = [0, 64], sizes = [16, 64], strides = [1, 1]} : vector<16x128xf32> to vector<16x64xf32>
    %52 = vector.extract_strided_slice %47 {offsets = [0, 64], sizes = [16, 64], strides = [1, 1]} : vector<16x128xf32> to vector<16x64xf32>
    %53 = tpu.concatenate %51, %52 in 1 : vector<16x64xf32>, vector<16x64xf32> -> vector<16x128xf32>
    %c0_12 = arith.constant 0 : index
    %c0_13 = arith.constant 0 : index
    %54 = vector.load %arg5[%c0_12, %c0_13] : memref<32x128xf32, #tpu.memory_space<vmem>>, vector<4x128xf32>
    %c4 = arith.constant 4 : index
    %c0_14 = arith.constant 0 : index
    %55 = vector.load %arg5[%c4, %c0_14] : memref<32x128xf32, #tpu.memory_space<vmem>>, vector<1x128xf32>
    %cst_15 = arith.constant 0.000000e+00 : f32
    %56 = vector.broadcast %cst_15 : f32 to vector<3x128xf32>
    %57 = tpu.concatenate %56, %50 in 0 : vector<3x128xf32>, vector<16x128xf32> -> vector<19x128xf32>
    %58 = vector.shape_cast %55 : vector<1x128xf32> to vector<1x128xf32>
    %59 = vector.broadcast %58 : vector<1x128xf32> to vector<16x128xf32>
    %60 = vector.extract_strided_slice %54 {offsets = [0, 0], sizes = [1, 128], strides = [1, 1]} : vector<4x128xf32> to vector<1x128xf32>
    %61 = vector.extract_strided_slice %57 {offsets = [0, 0], sizes = [16, 128], strides = [1, 1]} : vector<19x128xf32> to vector<16x128xf32>
    %62 = vector.broadcast %60 : vector<1x128xf32> to vector<16x128xf32>
    %63 = arith.mulf %62, %61 : vector<16x128xf32>
    %64 = arith.addf %59, %63 : vector<16x128xf32>
    %65 = vector.extract_strided_slice %54 {offsets = [1, 0], sizes = [1, 128], strides = [1, 1]} : vector<4x128xf32> to vector<1x128xf32>
    %66 = vector.extract_strided_slice %57 {offsets = [1, 0], sizes = [16, 128], strides = [1, 1]} : vector<19x128xf32> to vector<16x128xf32>
    %67 = vector.broadcast %65 : vector<1x128xf32> to vector<16x128xf32>
    %68 = arith.mulf %67, %66 : vector<16x128xf32>
    %69 = arith.addf %64, %68 : vector<16x128xf32>
    %70 = vector.extract_strided_slice %54 {offsets = [2, 0], sizes = [1, 128], strides = [1, 1]} : vector<4x128xf32> to vector<1x128xf32>
    %71 = vector.extract_strided_slice %57 {offsets = [2, 0], sizes = [16, 128], strides = [1, 1]} : vector<19x128xf32> to vector<16x128xf32>
    %72 = vector.broadcast %70 : vector<1x128xf32> to vector<16x128xf32>
    %73 = arith.mulf %72, %71 : vector<16x128xf32>
    %74 = arith.addf %69, %73 : vector<16x128xf32>
    %75 = vector.extract_strided_slice %54 {offsets = [3, 0], sizes = [1, 128], strides = [1, 1]} : vector<4x128xf32> to vector<1x128xf32>
    %76 = vector.extract_strided_slice %57 {offsets = [3, 0], sizes = [16, 128], strides = [1, 1]} : vector<19x128xf32> to vector<16x128xf32>
    %77 = vector.broadcast %75 : vector<1x128xf32> to vector<16x128xf32>
    %78 = arith.mulf %77, %76 : vector<16x128xf32>
    %79 = arith.addf %74, %78 : vector<16x128xf32>
    %cst_16 = arith.constant 5.000000e-01 : f32
    %80 = vector.broadcast %cst_16 : f32 to vector<16x128xf32>
    %81 = arith.mulf %80, %79 : vector<16x128xf32>
    %82 = math.tanh %81 : vector<16x128xf32>
    %cst_17 = arith.constant 1.000000e+00 : f32
    %83 = vector.broadcast %cst_17 : f32 to vector<16x128xf32>
    %84 = arith.addf %82, %83 : vector<16x128xf32>
    %cst_18 = arith.constant 5.000000e-01 : f32
    %85 = vector.broadcast %cst_18 : f32 to vector<16x128xf32>
    %86 = arith.mulf %85, %84 : vector<16x128xf32>
    %87 = arith.mulf %79, %86 : vector<16x128xf32>
    %88 = arith.truncf %87 : vector<16x128xf32> to vector<16x128xbf16>
    %c32 = arith.constant 32 : index
    %c0_19 = arith.constant 0 : index
    %89 = vector.load %arg3[%c32, %c0_19] : memref<320x128xbf16, #tpu.memory_space<vmem>>, vector<128x128xbf16>
    %cst_20 = arith.constant dense<0.000000e+00> : vector<16x128xf32>
    %90 = tpu.matmul %88, %89, %cst_20 {dimension_numbers = #tpu.dot_dimension_numbers<[1], [0], [0], [1], [0, 0, 1, 1], [], []>} : vector<16x128xbf16>, vector<128x128xbf16>, vector<16x128xf32> -> vector<16x128xf32>
    %91 = arith.truncf %90 : vector<16x128xf32> to vector<16x128xbf16>
    %c160 = arith.constant 160 : index
    %c0_21 = arith.constant 0 : index
    %92 = vector.load %arg3[%c160, %c0_21] : memref<320x128xbf16, #tpu.memory_space<vmem>>, vector<128x128xbf16>
    %cst_22 = arith.constant dense<0.000000e+00> : vector<16x128xf32>
    %93 = tpu.matmul %91, %92, %cst_22 {dimension_numbers = #tpu.dot_dimension_numbers<[1], [0], [0], [1], [0, 0, 1, 1], [], []>} : vector<16x128xbf16>, vector<128x128xbf16>, vector<16x128xf32> -> vector<16x128xf32>
    %c5 = arith.constant 5 : index
    %c0_23 = arith.constant 0 : index
    %94 = vector.load %arg5[%c5, %c0_23] : memref<32x128xf32, #tpu.memory_space<vmem>>, vector<1x128xf32>
    %95 = vector.broadcast %94 : vector<1x128xf32> to vector<16x128xf32>
    %96 = arith.addf %93, %95 : vector<16x128xf32>
    %cst_24 = arith.constant 0.000000e+00 : f32
    %97 = vector.broadcast %cst_24 : f32 to vector<16x128xf32>
    %98 = arith.maximumf %96, %97 : vector<16x128xf32>
    %99 = math.absf %96 : vector<16x128xf32>
    %cst_25 = arith.constant 0.000000e+00 : f32
    %100 = vector.broadcast %cst_25 : f32 to vector<16x128xf32>
    %101 = arith.subf %100, %99 : vector<16x128xf32>
    %102 = math.exp %101 : vector<16x128xf32>
    %cst_26 = arith.constant 1.000000e+00 : f32
    %103 = vector.broadcast %cst_26 : f32 to vector<16x128xf32>
    %104 = arith.addf %103, %102 : vector<16x128xf32>
    %105 = math.log %104 : vector<16x128xf32>
    %106 = arith.addf %98, %105 : vector<16x128xf32>
    %cst_27 = arith.constant 2.000000e+01 : f32
    %107 = vector.broadcast %cst_27 : f32 to vector<16x128xf32>
    %108 = arith.cmpf ogt, %96, %107 : vector<16x128xf32>
    %109 = arith.select %108, %96, %106 : vector<16x128xi1>, vector<16x128xf32>
    %110 = vector.extract_strided_slice %90 {offsets = [0, 2], sizes = [16, 16], strides = [1, 1]} : vector<16x128xf32> to vector<16x16xf32>
    %111 = tpu.transpose %110, [1, 0] : vector<16x16xf32> -> vector<16x16xf32>
    %112 = vector.extract_strided_slice %90 {offsets = [0, 18], sizes = [16, 16], strides = [1, 1]} : vector<16x128xf32> to vector<16x16xf32>
    %113 = tpu.transpose %112, [1, 0] : vector<16x16xf32> -> vector<16x16xf32>
    %114 = vector.extract_strided_slice %90 {offsets = [0, 36], sizes = [16, 16], strides = [1, 1]} : vector<16x128xf32> to vector<16x16xf32>
    %115 = tpu.transpose %114, [1, 0] : vector<16x16xf32> -> vector<16x16xf32>
    %116 = vector.extract_strided_slice %90 {offsets = [0, 52], sizes = [16, 16], strides = [1, 1]} : vector<16x128xf32> to vector<16x16xf32>
    %117 = tpu.transpose %116, [1, 0] : vector<16x16xf32> -> vector<16x16xf32>
    %c8 = arith.constant 8 : index
    %c0_28 = arith.constant 0 : index
    %118 = vector.load %arg5[%c8, %c0_28] : memref<32x128xf32, #tpu.memory_space<vmem>>, vector<16x128xf32>
    %c6 = arith.constant 6 : index
    %c0_29 = arith.constant 0 : index
    %119 = vector.load %arg5[%c6, %c0_29] : memref<32x128xf32, #tpu.memory_space<vmem>>, vector<1x128xf32>
    %120 = tpu.iota {dimensions = array<i32: 1>} : vector<1x128xi32>
    %c64_i32 = arith.constant 64 : i32
    %121 = vector.broadcast %c64_i32 : i32 to vector<1x128xi32>
    %122 = arith.cmpi slt, %120, %121 : vector<1x128xi32>
    %123 = vector.shape_cast %122 : vector<1x128xi1> to vector<1x128xi1>
    %124 = vector.broadcast %123 : vector<1x128xi1> to vector<16x128xi1>
    %125 = arith.mulf %109, %87 : vector<16x128xf32>
    %cst_30 = arith.constant 0.000000e+00 : f32
    %126 = vector.broadcast %cst_30 : f32 to vector<16x128xf32>
    %127 = vector.extract_strided_slice %109 {offsets = [0, 0], sizes = [1, 128], strides = [1, 1]} : vector<16x128xf32> to vector<1x128xf32>
    %128 = vector.broadcast %127 : vector<1x128xf32> to vector<16x128xf32>
    %129 = arith.mulf %128, %118 : vector<16x128xf32>
    %130 = math.exp %129 : vector<16x128xf32>
    %131 = vector.extract_strided_slice %111 {offsets = [0, 0], sizes = [16, 1], strides = [1, 1]} : vector<16x16xf32> to vector<16x1xf32>
    %132 = vector.extract_strided_slice %115 {offsets = [0, 0], sizes = [16, 1], strides = [1, 1]} : vector<16x16xf32> to vector<16x1xf32>
    %133 = vector.shape_cast %131 : vector<16x1xf32> to vector<16x1xf32>
    %134 = vector.broadcast %133 : vector<16x1xf32> to vector<16x128xf32>
    %135 = vector.shape_cast %132 : vector<16x1xf32> to vector<16x1xf32>
    %136 = vector.broadcast %135 : vector<16x1xf32> to vector<16x128xf32>
    %137 = arith.select %124, %134, %136 : vector<16x128xi1>, vector<16x128xf32>
    %138 = arith.mulf %130, %126 : vector<16x128xf32>
    %139 = vector.extract_strided_slice %125 {offsets = [0, 0], sizes = [1, 128], strides = [1, 1]} : vector<16x128xf32> to vector<1x128xf32>
    %140 = vector.broadcast %139 : vector<1x128xf32> to vector<16x128xf32>
    %141 = arith.mulf %137, %140 : vector<16x128xf32>
    %142 = arith.addf %138, %141 : vector<16x128xf32>
    %143 = vector.extract_strided_slice %113 {offsets = [0, 0], sizes = [16, 1], strides = [1, 1]} : vector<16x16xf32> to vector<16x1xf32>
    %144 = vector.extract_strided_slice %117 {offsets = [0, 0], sizes = [16, 1], strides = [1, 1]} : vector<16x16xf32> to vector<16x1xf32>
    %145 = vector.shape_cast %143 : vector<16x1xf32> to vector<16x1xf32>
    %146 = vector.broadcast %145 : vector<16x1xf32> to vector<16x128xf32>
    %147 = vector.shape_cast %144 : vector<16x1xf32> to vector<16x1xf32>
    %148 = vector.broadcast %147 : vector<16x1xf32> to vector<16x128xf32>
    %149 = arith.select %124, %146, %148 : vector<16x128xi1>, vector<16x128xf32>
    %150 = arith.mulf %149, %142 : vector<16x128xf32>
    %cst_31 = arith.constant dense<0.000000e+00> : vector<128xf32>
    %151 = vector.multi_reduction <add>, %150, %cst_31 [0] : vector<16x128xf32> to vector<128xf32>
    %152 = vector.shape_cast %151 : vector<128xf32> to vector<1x128xf32>
    %153 = vector.extract_strided_slice %109 {offsets = [1, 0], sizes = [1, 128], strides = [1, 1]} : vector<16x128xf32> to vector<1x128xf32>
    %154 = vector.broadcast %153 : vector<1x128xf32> to vector<16x128xf32>
    %155 = arith.mulf %154, %118 : vector<16x128xf32>
    %156 = math.exp %155 : vector<16x128xf32>
    %157 = vector.extract_strided_slice %111 {offsets = [0, 1], sizes = [16, 1], strides = [1, 1]} : vector<16x16xf32> to vector<16x1xf32>
    %158 = vector.extract_strided_slice %115 {offsets = [0, 1], sizes = [16, 1], strides = [1, 1]} : vector<16x16xf32> to vector<16x1xf32>
    %159 = vector.shape_cast %157 : vector<16x1xf32> to vector<16x1xf32>
    %160 = vector.broadcast %159 : vector<16x1xf32> to vector<16x128xf32>
    %161 = vector.shape_cast %158 : vector<16x1xf32> to vector<16x1xf32>
    %162 = vector.broadcast %161 : vector<16x1xf32> to vector<16x128xf32>
    %163 = arith.select %124, %160, %162 : vector<16x128xi1>, vector<16x128xf32>
    %164 = arith.mulf %156, %142 : vector<16x128xf32>
    %165 = vector.extract_strided_slice %125 {offsets = [1, 0], sizes = [1, 128], strides = [1, 1]} : vector<16x128xf32> to vector<1x128xf32>
    %166 = vector.broadcast %165 : vector<1x128xf32> to vector<16x128xf32>
    %167 = arith.mulf %163, %166 : vector<16x128xf32>
    %168 = arith.addf %164, %167 : vector<16x128xf32>
    %169 = vector.extract_strided_slice %113 {offsets = [0, 1], sizes = [16, 1], strides = [1, 1]} : vector<16x16xf32> to vector<16x1xf32>
    %170 = vector.extract_strided_slice %117 {offsets = [0, 1], sizes = [16, 1], strides = [1, 1]} : vector<16x16xf32> to vector<16x1xf32>
    %171 = vector.shape_cast %169 : vector<16x1xf32> to vector<16x1xf32>
    %172 = vector.broadcast %171 : vector<16x1xf32> to vector<16x128xf32>
    %173 = vector.shape_cast %170 : vector<16x1xf32> to vector<16x1xf32>
    %174 = vector.broadcast %173 : vector<16x1xf32> to vector<16x128xf32>
    %175 = arith.select %124, %172, %174 : vector<16x128xi1>, vector<16x128xf32>
    %176 = arith.mulf %175, %168 : vector<16x128xf32>
    %cst_32 = arith.constant dense<0.000000e+00> : vector<128xf32>
    %177 = vector.multi_reduction <add>, %176, %cst_32 [0] : vector<16x128xf32> to vector<128xf32>
    %178 = vector.shape_cast %177 : vector<128xf32> to vector<1x128xf32>
    %179 = vector.extract_strided_slice %109 {offsets = [2, 0], sizes = [1, 128], strides = [1, 1]} : vector<16x128xf32> to vector<1x128xf32>
    %180 = vector.broadcast %179 : vector<1x128xf32> to vector<16x128xf32>
    %181 = arith.mulf %180, %118 : vector<16x128xf32>
    %182 = math.exp %181 : vector<16x128xf32>
    %183 = vector.extract_strided_slice %111 {offsets = [0, 2], sizes = [16, 1], strides = [1, 1]} : vector<16x16xf32> to vector<16x1xf32>
    %184 = vector.extract_strided_slice %115 {offsets = [0, 2], sizes = [16, 1], strides = [1, 1]} : vector<16x16xf32> to vector<16x1xf32>
    %185 = vector.shape_cast %183 : vector<16x1xf32> to vector<16x1xf32>
    %186 = vector.broadcast %185 : vector<16x1xf32> to vector<16x128xf32>
    %187 = vector.shape_cast %184 : vector<16x1xf32> to vector<16x1xf32>
    %188 = vector.broadcast %187 : vector<16x1xf32> to vector<16x128xf32>
    %189 = arith.select %124, %186, %188 : vector<16x128xi1>, vector<16x128xf32>
    %190 = arith.mulf %182, %168 : vector<16x128xf32>
    %191 = vector.extract_strided_slice %125 {offsets = [2, 0], sizes = [1, 128], strides = [1, 1]} : vector<16x128xf32> to vector<1x128xf32>
    %192 = vector.broadcast %191 : vector<1x128xf32> to vector<16x128xf32>
    %193 = arith.mulf %189, %192 : vector<16x128xf32>
    %194 = arith.addf %190, %193 : vector<16x128xf32>
    %195 = vector.extract_strided_slice %113 {offsets = [0, 2], sizes = [16, 1], strides = [1, 1]} : vector<16x16xf32> to vector<16x1xf32>
    %196 = vector.extract_strided_slice %117 {offsets = [0, 2], sizes = [16, 1], strides = [1, 1]} : vector<16x16xf32> to vector<16x1xf32>
    %197 = vector.shape_cast %195 : vector<16x1xf32> to vector<16x1xf32>
    %198 = vector.broadcast %197 : vector<16x1xf32> to vector<16x128xf32>
    %199 = vector.shape_cast %196 : vector<16x1xf32> to vector<16x1xf32>
    %200 = vector.broadcast %199 : vector<16x1xf32> to vector<16x128xf32>
    %201 = arith.select %124, %198, %200 : vector<16x128xi1>, vector<16x128xf32>
    %202 = arith.mulf %201, %194 : vector<16x128xf32>
    %cst_33 = arith.constant dense<0.000000e+00> : vector<128xf32>
    %203 = vector.multi_reduction <add>, %202, %cst_33 [0] : vector<16x128xf32> to vector<128xf32>
    %204 = vector.shape_cast %203 : vector<128xf32> to vector<1x128xf32>
    %205 = vector.extract_strided_slice %109 {offsets = [3, 0], sizes = [1, 128], strides = [1, 1]} : vector<16x128xf32> to vector<1x128xf32>
    %206 = vector.broadcast %205 : vector<1x128xf32> to vector<16x128xf32>
    %207 = arith.mulf %206, %118 : vector<16x128xf32>
    %208 = math.exp %207 : vector<16x128xf32>
    %209 = vector.extract_strided_slice %111 {offsets = [0, 3], sizes = [16, 1], strides = [1, 1]} : vector<16x16xf32> to vector<16x1xf32>
    %210 = vector.extract_strided_slice %115 {offsets = [0, 3], sizes = [16, 1], strides = [1, 1]} : vector<16x16xf32> to vector<16x1xf32>
    %211 = vector.shape_cast %209 : vector<16x1xf32> to vector<16x1xf32>
    %212 = vector.broadcast %211 : vector<16x1xf32> to vector<16x128xf32>
    %213 = vector.shape_cast %210 : vector<16x1xf32> to vector<16x1xf32>
    %214 = vector.broadcast %213 : vector<16x1xf32> to vector<16x128xf32>
    %215 = arith.select %124, %212, %214 : vector<16x128xi1>, vector<16x128xf32>
    %216 = arith.mulf %208, %194 : vector<16x128xf32>
    %217 = vector.extract_strided_slice %125 {offsets = [3, 0], sizes = [1, 128], strides = [1, 1]} : vector<16x128xf32> to vector<1x128xf32>
    %218 = vector.broadcast %217 : vector<1x128xf32> to vector<16x128xf32>
    %219 = arith.mulf %215, %218 : vector<16x128xf32>
    %220 = arith.addf %216, %219 : vector<16x128xf32>
    %221 = vector.extract_strided_slice %113 {offsets = [0, 3], sizes = [16, 1], strides = [1, 1]} : vector<16x16xf32> to vector<16x1xf32>
    %222 = vector.extract_strided_slice %117 {offsets = [0, 3], sizes = [16, 1], strides = [1, 1]} : vector<16x16xf32> to vector<16x1xf32>
    %223 = vector.shape_cast %221 : vector<16x1xf32> to vector<16x1xf32>
    %224 = vector.broadcast %223 : vector<16x1xf32> to vector<16x128xf32>
    %225 = vector.shape_cast %222 : vector<16x1xf32> to vector<16x1xf32>
    %226 = vector.broadcast %225 : vector<16x1xf32> to vector<16x128xf32>
    %227 = arith.select %124, %224, %226 : vector<16x128xi1>, vector<16x128xf32>
    %228 = arith.mulf %227, %220 : vector<16x128xf32>
    %cst_34 = arith.constant dense<0.000000e+00> : vector<128xf32>
    %229 = vector.multi_reduction <add>, %228, %cst_34 [0] : vector<16x128xf32> to vector<128xf32>
    %230 = vector.shape_cast %229 : vector<128xf32> to vector<1x128xf32>
    %231 = vector.extract_strided_slice %109 {offsets = [4, 0], sizes = [1, 128], strides = [1, 1]} : vector<16x128xf32> to vector<1x128xf32>
    %232 = vector.broadcast %231 : vector<1x128xf32> to vector<16x128xf32>
    %233 = arith.mulf %232, %118 : vector<16x128xf32>
    %234 = math.exp %233 : vector<16x128xf32>
    %235 = vector.extract_strided_slice %111 {offsets = [0, 4], sizes = [16, 1], strides = [1, 1]} : vector<16x16xf32> to vector<16x1xf32>
    %236 = vector.extract_strided_slice %115 {offsets = [0, 4], sizes = [16, 1], strides = [1, 1]} : vector<16x16xf32> to vector<16x1xf32>
    %237 = vector.shape_cast %235 : vector<16x1xf32> to vector<16x1xf32>
    %238 = vector.broadcast %237 : vector<16x1xf32> to vector<16x128xf32>
    %239 = vector.shape_cast %236 : vector<16x1xf32> to vector<16x1xf32>
    %240 = vector.broadcast %239 : vector<16x1xf32> to vector<16x128xf32>
    %241 = arith.select %124, %238, %240 : vector<16x128xi1>, vector<16x128xf32>
    %242 = arith.mulf %234, %220 : vector<16x128xf32>
    %243 = vector.extract_strided_slice %125 {offsets = [4, 0], sizes = [1, 128], strides = [1, 1]} : vector<16x128xf32> to vector<1x128xf32>
    %244 = vector.broadcast %243 : vector<1x128xf32> to vector<16x128xf32>
    %245 = arith.mulf %241, %244 : vector<16x128xf32>
    %246 = arith.addf %242, %245 : vector<16x128xf32>
    %247 = vector.extract_strided_slice %113 {offsets = [0, 4], sizes = [16, 1], strides = [1, 1]} : vector<16x16xf32> to vector<16x1xf32>
    %248 = vector.extract_strided_slice %117 {offsets = [0, 4], sizes = [16, 1], strides = [1, 1]} : vector<16x16xf32> to vector<16x1xf32>
    %249 = vector.shape_cast %247 : vector<16x1xf32> to vector<16x1xf32>
    %250 = vector.broadcast %249 : vector<16x1xf32> to vector<16x128xf32>
    %251 = vector.shape_cast %248 : vector<16x1xf32> to vector<16x1xf32>
    %252 = vector.broadcast %251 : vector<16x1xf32> to vector<16x128xf32>
    %253 = arith.select %124, %250, %252 : vector<16x128xi1>, vector<16x128xf32>
    %254 = arith.mulf %253, %246 : vector<16x128xf32>
    %cst_35 = arith.constant dense<0.000000e+00> : vector<128xf32>
    %255 = vector.multi_reduction <add>, %254, %cst_35 [0] : vector<16x128xf32> to vector<128xf32>
    %256 = vector.shape_cast %255 : vector<128xf32> to vector<1x128xf32>
    %257 = vector.extract_strided_slice %109 {offsets = [5, 0], sizes = [1, 128], strides = [1, 1]} : vector<16x128xf32> to vector<1x128xf32>
    %258 = vector.broadcast %257 : vector<1x128xf32> to vector<16x128xf32>
    %259 = arith.mulf %258, %118 : vector<16x128xf32>
    %260 = math.exp %259 : vector<16x128xf32>
    %261 = vector.extract_strided_slice %111 {offsets = [0, 5], sizes = [16, 1], strides = [1, 1]} : vector<16x16xf32> to vector<16x1xf32>
    %262 = vector.extract_strided_slice %115 {offsets = [0, 5], sizes = [16, 1], strides = [1, 1]} : vector<16x16xf32> to vector<16x1xf32>
    %263 = vector.shape_cast %261 : vector<16x1xf32> to vector<16x1xf32>
    %264 = vector.broadcast %263 : vector<16x1xf32> to vector<16x128xf32>
    %265 = vector.shape_cast %262 : vector<16x1xf32> to vector<16x1xf32>
    %266 = vector.broadcast %265 : vector<16x1xf32> to vector<16x128xf32>
    %267 = arith.select %124, %264, %266 : vector<16x128xi1>, vector<16x128xf32>
    %268 = arith.mulf %260, %246 : vector<16x128xf32>
    %269 = vector.extract_strided_slice %125 {offsets = [5, 0], sizes = [1, 128], strides = [1, 1]} : vector<16x128xf32> to vector<1x128xf32>
    %270 = vector.broadcast %269 : vector<1x128xf32> to vector<16x128xf32>
    %271 = arith.mulf %267, %270 : vector<16x128xf32>
    %272 = arith.addf %268, %271 : vector<16x128xf32>
    %273 = vector.extract_strided_slice %113 {offsets = [0, 5], sizes = [16, 1], strides = [1, 1]} : vector<16x16xf32> to vector<16x1xf32>
    %274 = vector.extract_strided_slice %117 {offsets = [0, 5], sizes = [16, 1], strides = [1, 1]} : vector<16x16xf32> to vector<16x1xf32>
    %275 = vector.shape_cast %273 : vector<16x1xf32> to vector<16x1xf32>
    %276 = vector.broadcast %275 : vector<16x1xf32> to vector<16x128xf32>
    %277 = vector.shape_cast %274 : vector<16x1xf32> to vector<16x1xf32>
    %278 = vector.broadcast %277 : vector<16x1xf32> to vector<16x128xf32>
    %279 = arith.select %124, %276, %278 : vector<16x128xi1>, vector<16x128xf32>
    %280 = arith.mulf %279, %272 : vector<16x128xf32>
    %cst_36 = arith.constant dense<0.000000e+00> : vector<128xf32>
    %281 = vector.multi_reduction <add>, %280, %cst_36 [0] : vector<16x128xf32> to vector<128xf32>
    %282 = vector.shape_cast %281 : vector<128xf32> to vector<1x128xf32>
    %283 = vector.extract_strided_slice %109 {offsets = [6, 0], sizes = [1, 128], strides = [1, 1]} : vector<16x128xf32> to vector<1x128xf32>
    %284 = vector.broadcast %283 : vector<1x128xf32> to vector<16x128xf32>
    %285 = arith.mulf %284, %118 : vector<16x128xf32>
    %286 = math.exp %285 : vector<16x128xf32>
    %287 = vector.extract_strided_slice %111 {offsets = [0, 6], sizes = [16, 1], strides = [1, 1]} : vector<16x16xf32> to vector<16x1xf32>
    %288 = vector.extract_strided_slice %115 {offsets = [0, 6], sizes = [16, 1], strides = [1, 1]} : vector<16x16xf32> to vector<16x1xf32>
    %289 = vector.shape_cast %287 : vector<16x1xf32> to vector<16x1xf32>
    %290 = vector.broadcast %289 : vector<16x1xf32> to vector<16x128xf32>
    %291 = vector.shape_cast %288 : vector<16x1xf32> to vector<16x1xf32>
    %292 = vector.broadcast %291 : vector<16x1xf32> to vector<16x128xf32>
    %293 = arith.select %124, %290, %292 : vector<16x128xi1>, vector<16x128xf32>
    %294 = arith.mulf %286, %272 : vector<16x128xf32>
    %295 = vector.extract_strided_slice %125 {offsets = [6, 0], sizes = [1, 128], strides = [1, 1]} : vector<16x128xf32> to vector<1x128xf32>
    %296 = vector.broadcast %295 : vector<1x128xf32> to vector<16x128xf32>
    %297 = arith.mulf %293, %296 : vector<16x128xf32>
    %298 = arith.addf %294, %297 : vector<16x128xf32>
    %299 = vector.extract_strided_slice %113 {offsets = [0, 6], sizes = [16, 1], strides = [1, 1]} : vector<16x16xf32> to vector<16x1xf32>
    %300 = vector.extract_strided_slice %117 {offsets = [0, 6], sizes = [16, 1], strides = [1, 1]} : vector<16x16xf32> to vector<16x1xf32>
    %301 = vector.shape_cast %299 : vector<16x1xf32> to vector<16x1xf32>
    %302 = vector.broadcast %301 : vector<16x1xf32> to vector<16x128xf32>
    %303 = vector.shape_cast %300 : vector<16x1xf32> to vector<16x1xf32>
    %304 = vector.broadcast %303 : vector<16x1xf32> to vector<16x128xf32>
    %305 = arith.select %124, %302, %304 : vector<16x128xi1>, vector<16x128xf32>
    %306 = arith.mulf %305, %298 : vector<16x128xf32>
    %cst_37 = arith.constant dense<0.000000e+00> : vector<128xf32>
    %307 = vector.multi_reduction <add>, %306, %cst_37 [0] : vector<16x128xf32> to vector<128xf32>
    %308 = vector.shape_cast %307 : vector<128xf32> to vector<1x128xf32>
    %309 = vector.extract_strided_slice %109 {offsets = [7, 0], sizes = [1, 128], strides = [1, 1]} : vector<16x128xf32> to vector<1x128xf32>
    %310 = vector.broadcast %309 : vector<1x128xf32> to vector<16x128xf32>
    %311 = arith.mulf %310, %118 : vector<16x128xf32>
    %312 = math.exp %311 : vector<16x128xf32>
    %313 = vector.extract_strided_slice %111 {offsets = [0, 7], sizes = [16, 1], strides = [1, 1]} : vector<16x16xf32> to vector<16x1xf32>
    %314 = vector.extract_strided_slice %115 {offsets = [0, 7], sizes = [16, 1], strides = [1, 1]} : vector<16x16xf32> to vector<16x1xf32>
    %315 = vector.shape_cast %313 : vector<16x1xf32> to vector<16x1xf32>
    %316 = vector.broadcast %315 : vector<16x1xf32> to vector<16x128xf32>
    %317 = vector.shape_cast %314 : vector<16x1xf32> to vector<16x1xf32>
    %318 = vector.broadcast %317 : vector<16x1xf32> to vector<16x128xf32>
    %319 = arith.select %124, %316, %318 : vector<16x128xi1>, vector<16x128xf32>
    %320 = arith.mulf %312, %298 : vector<16x128xf32>
    %321 = vector.extract_strided_slice %125 {offsets = [7, 0], sizes = [1, 128], strides = [1, 1]} : vector<16x128xf32> to vector<1x128xf32>
    %322 = vector.broadcast %321 : vector<1x128xf32> to vector<16x128xf32>
    %323 = arith.mulf %319, %322 : vector<16x128xf32>
    %324 = arith.addf %320, %323 : vector<16x128xf32>
    %325 = vector.extract_strided_slice %113 {offsets = [0, 7], sizes = [16, 1], strides = [1, 1]} : vector<16x16xf32> to vector<16x1xf32>
    %326 = vector.extract_strided_slice %117 {offsets = [0, 7], sizes = [16, 1], strides = [1, 1]} : vector<16x16xf32> to vector<16x1xf32>
    %327 = vector.shape_cast %325 : vector<16x1xf32> to vector<16x1xf32>
    %328 = vector.broadcast %327 : vector<16x1xf32> to vector<16x128xf32>
    %329 = vector.shape_cast %326 : vector<16x1xf32> to vector<16x1xf32>
    %330 = vector.broadcast %329 : vector<16x1xf32> to vector<16x128xf32>
    %331 = arith.select %124, %328, %330 : vector<16x128xi1>, vector<16x128xf32>
    %332 = arith.mulf %331, %324 : vector<16x128xf32>
    %cst_38 = arith.constant dense<0.000000e+00> : vector<128xf32>
    %333 = vector.multi_reduction <add>, %332, %cst_38 [0] : vector<16x128xf32> to vector<128xf32>
    %334 = vector.shape_cast %333 : vector<128xf32> to vector<1x128xf32>
    %335 = vector.extract_strided_slice %109 {offsets = [8, 0], sizes = [1, 128], strides = [1, 1]} : vector<16x128xf32> to vector<1x128xf32>
    %336 = vector.broadcast %335 : vector<1x128xf32> to vector<16x128xf32>
    %337 = arith.mulf %336, %118 : vector<16x128xf32>
    %338 = math.exp %337 : vector<16x128xf32>
    %339 = vector.extract_strided_slice %111 {offsets = [0, 8], sizes = [16, 1], strides = [1, 1]} : vector<16x16xf32> to vector<16x1xf32>
    %340 = vector.extract_strided_slice %115 {offsets = [0, 8], sizes = [16, 1], strides = [1, 1]} : vector<16x16xf32> to vector<16x1xf32>
    %341 = vector.shape_cast %339 : vector<16x1xf32> to vector<16x1xf32>
    %342 = vector.broadcast %341 : vector<16x1xf32> to vector<16x128xf32>
    %343 = vector.shape_cast %340 : vector<16x1xf32> to vector<16x1xf32>
    %344 = vector.broadcast %343 : vector<16x1xf32> to vector<16x128xf32>
    %345 = arith.select %124, %342, %344 : vector<16x128xi1>, vector<16x128xf32>
    %346 = arith.mulf %338, %324 : vector<16x128xf32>
    %347 = vector.extract_strided_slice %125 {offsets = [8, 0], sizes = [1, 128], strides = [1, 1]} : vector<16x128xf32> to vector<1x128xf32>
    %348 = vector.broadcast %347 : vector<1x128xf32> to vector<16x128xf32>
    %349 = arith.mulf %345, %348 : vector<16x128xf32>
    %350 = arith.addf %346, %349 : vector<16x128xf32>
    %351 = vector.extract_strided_slice %113 {offsets = [0, 8], sizes = [16, 1], strides = [1, 1]} : vector<16x16xf32> to vector<16x1xf32>
    %352 = vector.extract_strided_slice %117 {offsets = [0, 8], sizes = [16, 1], strides = [1, 1]} : vector<16x16xf32> to vector<16x1xf32>
    %353 = vector.shape_cast %351 : vector<16x1xf32> to vector<16x1xf32>
    %354 = vector.broadcast %353 : vector<16x1xf32> to vector<16x128xf32>
    %355 = vector.shape_cast %352 : vector<16x1xf32> to vector<16x1xf32>
    %356 = vector.broadcast %355 : vector<16x1xf32> to vector<16x128xf32>
    %357 = arith.select %124, %354, %356 : vector<16x128xi1>, vector<16x128xf32>
    %358 = arith.mulf %357, %350 : vector<16x128xf32>
    %cst_39 = arith.constant dense<0.000000e+00> : vector<128xf32>
    %359 = vector.multi_reduction <add>, %358, %cst_39 [0] : vector<16x128xf32> to vector<128xf32>
    %360 = vector.shape_cast %359 : vector<128xf32> to vector<1x128xf32>
    %361 = vector.extract_strided_slice %109 {offsets = [9, 0], sizes = [1, 128], strides = [1, 1]} : vector<16x128xf32> to vector<1x128xf32>
    %362 = vector.broadcast %361 : vector<1x128xf32> to vector<16x128xf32>
    %363 = arith.mulf %362, %118 : vector<16x128xf32>
    %364 = math.exp %363 : vector<16x128xf32>
    %365 = vector.extract_strided_slice %111 {offsets = [0, 9], sizes = [16, 1], strides = [1, 1]} : vector<16x16xf32> to vector<16x1xf32>
    %366 = vector.extract_strided_slice %115 {offsets = [0, 9], sizes = [16, 1], strides = [1, 1]} : vector<16x16xf32> to vector<16x1xf32>
    %367 = vector.shape_cast %365 : vector<16x1xf32> to vector<16x1xf32>
    %368 = vector.broadcast %367 : vector<16x1xf32> to vector<16x128xf32>
    %369 = vector.shape_cast %366 : vector<16x1xf32> to vector<16x1xf32>
    %370 = vector.broadcast %369 : vector<16x1xf32> to vector<16x128xf32>
    %371 = arith.select %124, %368, %370 : vector<16x128xi1>, vector<16x128xf32>
    %372 = arith.mulf %364, %350 : vector<16x128xf32>
    %373 = vector.extract_strided_slice %125 {offsets = [9, 0], sizes = [1, 128], strides = [1, 1]} : vector<16x128xf32> to vector<1x128xf32>
    %374 = vector.broadcast %373 : vector<1x128xf32> to vector<16x128xf32>
    %375 = arith.mulf %371, %374 : vector<16x128xf32>
    %376 = arith.addf %372, %375 : vector<16x128xf32>
    %377 = vector.extract_strided_slice %113 {offsets = [0, 9], sizes = [16, 1], strides = [1, 1]} : vector<16x16xf32> to vector<16x1xf32>
    %378 = vector.extract_strided_slice %117 {offsets = [0, 9], sizes = [16, 1], strides = [1, 1]} : vector<16x16xf32> to vector<16x1xf32>
    %379 = vector.shape_cast %377 : vector<16x1xf32> to vector<16x1xf32>
    %380 = vector.broadcast %379 : vector<16x1xf32> to vector<16x128xf32>
    %381 = vector.shape_cast %378 : vector<16x1xf32> to vector<16x1xf32>
    %382 = vector.broadcast %381 : vector<16x1xf32> to vector<16x128xf32>
    %383 = arith.select %124, %380, %382 : vector<16x128xi1>, vector<16x128xf32>
    %384 = arith.mulf %383, %376 : vector<16x128xf32>
    %cst_40 = arith.constant dense<0.000000e+00> : vector<128xf32>
    %385 = vector.multi_reduction <add>, %384, %cst_40 [0] : vector<16x128xf32> to vector<128xf32>
    %386 = vector.shape_cast %385 : vector<128xf32> to vector<1x128xf32>
    %387 = vector.extract_strided_slice %109 {offsets = [10, 0], sizes = [1, 128], strides = [1, 1]} : vector<16x128xf32> to vector<1x128xf32>
    %388 = vector.broadcast %387 : vector<1x128xf32> to vector<16x128xf32>
    %389 = arith.mulf %388, %118 : vector<16x128xf32>
    %390 = math.exp %389 : vector<16x128xf32>
    %391 = vector.extract_strided_slice %111 {offsets = [0, 10], sizes = [16, 1], strides = [1, 1]} : vector<16x16xf32> to vector<16x1xf32>
    %392 = vector.extract_strided_slice %115 {offsets = [0, 10], sizes = [16, 1], strides = [1, 1]} : vector<16x16xf32> to vector<16x1xf32>
    %393 = vector.shape_cast %391 : vector<16x1xf32> to vector<16x1xf32>
    %394 = vector.broadcast %393 : vector<16x1xf32> to vector<16x128xf32>
    %395 = vector.shape_cast %392 : vector<16x1xf32> to vector<16x1xf32>
    %396 = vector.broadcast %395 : vector<16x1xf32> to vector<16x128xf32>
    %397 = arith.select %124, %394, %396 : vector<16x128xi1>, vector<16x128xf32>
    %398 = arith.mulf %390, %376 : vector<16x128xf32>
    %399 = vector.extract_strided_slice %125 {offsets = [10, 0], sizes = [1, 128], strides = [1, 1]} : vector<16x128xf32> to vector<1x128xf32>
    %400 = vector.broadcast %399 : vector<1x128xf32> to vector<16x128xf32>
    %401 = arith.mulf %397, %400 : vector<16x128xf32>
    %402 = arith.addf %398, %401 : vector<16x128xf32>
    %403 = vector.extract_strided_slice %113 {offsets = [0, 10], sizes = [16, 1], strides = [1, 1]} : vector<16x16xf32> to vector<16x1xf32>
    %404 = vector.extract_strided_slice %117 {offsets = [0, 10], sizes = [16, 1], strides = [1, 1]} : vector<16x16xf32> to vector<16x1xf32>
    %405 = vector.shape_cast %403 : vector<16x1xf32> to vector<16x1xf32>
    %406 = vector.broadcast %405 : vector<16x1xf32> to vector<16x128xf32>
    %407 = vector.shape_cast %404 : vector<16x1xf32> to vector<16x1xf32>
    %408 = vector.broadcast %407 : vector<16x1xf32> to vector<16x128xf32>
    %409 = arith.select %124, %406, %408 : vector<16x128xi1>, vector<16x128xf32>
    %410 = arith.mulf %409, %402 : vector<16x128xf32>
    %cst_41 = arith.constant dense<0.000000e+00> : vector<128xf32>
    %411 = vector.multi_reduction <add>, %410, %cst_41 [0] : vector<16x128xf32> to vector<128xf32>
    %412 = vector.shape_cast %411 : vector<128xf32> to vector<1x128xf32>
    %413 = vector.extract_strided_slice %109 {offsets = [11, 0], sizes = [1, 128], strides = [1, 1]} : vector<16x128xf32> to vector<1x128xf32>
    %414 = vector.broadcast %413 : vector<1x128xf32> to vector<16x128xf32>
    %415 = arith.mulf %414, %118 : vector<16x128xf32>
    %416 = math.exp %415 : vector<16x128xf32>
    %417 = vector.extract_strided_slice %111 {offsets = [0, 11], sizes = [16, 1], strides = [1, 1]} : vector<16x16xf32> to vector<16x1xf32>
    %418 = vector.extract_strided_slice %115 {offsets = [0, 11], sizes = [16, 1], strides = [1, 1]} : vector<16x16xf32> to vector<16x1xf32>
    %419 = vector.shape_cast %417 : vector<16x1xf32> to vector<16x1xf32>
    %420 = vector.broadcast %419 : vector<16x1xf32> to vector<16x128xf32>
    %421 = vector.shape_cast %418 : vector<16x1xf32> to vector<16x1xf32>
    %422 = vector.broadcast %421 : vector<16x1xf32> to vector<16x128xf32>
    %423 = arith.select %124, %420, %422 : vector<16x128xi1>, vector<16x128xf32>
    %424 = arith.mulf %416, %402 : vector<16x128xf32>
    %425 = vector.extract_strided_slice %125 {offsets = [11, 0], sizes = [1, 128], strides = [1, 1]} : vector<16x128xf32> to vector<1x128xf32>
    %426 = vector.broadcast %425 : vector<1x128xf32> to vector<16x128xf32>
    %427 = arith.mulf %423, %426 : vector<16x128xf32>
    %428 = arith.addf %424, %427 : vector<16x128xf32>
    %429 = vector.extract_strided_slice %113 {offsets = [0, 11], sizes = [16, 1], strides = [1, 1]} : vector<16x16xf32> to vector<16x1xf32>
    %430 = vector.extract_strided_slice %117 {offsets = [0, 11], sizes = [16, 1], strides = [1, 1]} : vector<16x16xf32> to vector<16x1xf32>
    %431 = vector.shape_cast %429 : vector<16x1xf32> to vector<16x1xf32>
    %432 = vector.broadcast %431 : vector<16x1xf32> to vector<16x128xf32>
    %433 = vector.shape_cast %430 : vector<16x1xf32> to vector<16x1xf32>
    %434 = vector.broadcast %433 : vector<16x1xf32> to vector<16x128xf32>
    %435 = arith.select %124, %432, %434 : vector<16x128xi1>, vector<16x128xf32>
    %436 = arith.mulf %435, %428 : vector<16x128xf32>
    %cst_42 = arith.constant dense<0.000000e+00> : vector<128xf32>
    %437 = vector.multi_reduction <add>, %436, %cst_42 [0] : vector<16x128xf32> to vector<128xf32>
    %438 = vector.shape_cast %437 : vector<128xf32> to vector<1x128xf32>
    %439 = vector.extract_strided_slice %109 {offsets = [12, 0], sizes = [1, 128], strides = [1, 1]} : vector<16x128xf32> to vector<1x128xf32>
    %440 = vector.broadcast %439 : vector<1x128xf32> to vector<16x128xf32>
    %441 = arith.mulf %440, %118 : vector<16x128xf32>
    %442 = math.exp %441 : vector<16x128xf32>
    %443 = vector.extract_strided_slice %111 {offsets = [0, 12], sizes = [16, 1], strides = [1, 1]} : vector<16x16xf32> to vector<16x1xf32>
    %444 = vector.extract_strided_slice %115 {offsets = [0, 12], sizes = [16, 1], strides = [1, 1]} : vector<16x16xf32> to vector<16x1xf32>
    %445 = vector.shape_cast %443 : vector<16x1xf32> to vector<16x1xf32>
    %446 = vector.broadcast %445 : vector<16x1xf32> to vector<16x128xf32>
    %447 = vector.shape_cast %444 : vector<16x1xf32> to vector<16x1xf32>
    %448 = vector.broadcast %447 : vector<16x1xf32> to vector<16x128xf32>
    %449 = arith.select %124, %446, %448 : vector<16x128xi1>, vector<16x128xf32>
    %450 = arith.mulf %442, %428 : vector<16x128xf32>
    %451 = vector.extract_strided_slice %125 {offsets = [12, 0], sizes = [1, 128], strides = [1, 1]} : vector<16x128xf32> to vector<1x128xf32>
    %452 = vector.broadcast %451 : vector<1x128xf32> to vector<16x128xf32>
    %453 = arith.mulf %449, %452 : vector<16x128xf32>
    %454 = arith.addf %450, %453 : vector<16x128xf32>
    %455 = vector.extract_strided_slice %113 {offsets = [0, 12], sizes = [16, 1], strides = [1, 1]} : vector<16x16xf32> to vector<16x1xf32>
    %456 = vector.extract_strided_slice %117 {offsets = [0, 12], sizes = [16, 1], strides = [1, 1]} : vector<16x16xf32> to vector<16x1xf32>
    %457 = vector.shape_cast %455 : vector<16x1xf32> to vector<16x1xf32>
    %458 = vector.broadcast %457 : vector<16x1xf32> to vector<16x128xf32>
    %459 = vector.shape_cast %456 : vector<16x1xf32> to vector<16x1xf32>
    %460 = vector.broadcast %459 : vector<16x1xf32> to vector<16x128xf32>
    %461 = arith.select %124, %458, %460 : vector<16x128xi1>, vector<16x128xf32>
    %462 = arith.mulf %461, %454 : vector<16x128xf32>
    %cst_43 = arith.constant dense<0.000000e+00> : vector<128xf32>
    %463 = vector.multi_reduction <add>, %462, %cst_43 [0] : vector<16x128xf32> to vector<128xf32>
    %464 = vector.shape_cast %463 : vector<128xf32> to vector<1x128xf32>
    %465 = vector.extract_strided_slice %109 {offsets = [13, 0], sizes = [1, 128], strides = [1, 1]} : vector<16x128xf32> to vector<1x128xf32>
    %466 = vector.broadcast %465 : vector<1x128xf32> to vector<16x128xf32>
    %467 = arith.mulf %466, %118 : vector<16x128xf32>
    %468 = math.exp %467 : vector<16x128xf32>
    %469 = vector.extract_strided_slice %111 {offsets = [0, 13], sizes = [16, 1], strides = [1, 1]} : vector<16x16xf32> to vector<16x1xf32>
    %470 = vector.extract_strided_slice %115 {offsets = [0, 13], sizes = [16, 1], strides = [1, 1]} : vector<16x16xf32> to vector<16x1xf32>
    %471 = vector.shape_cast %469 : vector<16x1xf32> to vector<16x1xf32>
    %472 = vector.broadcast %471 : vector<16x1xf32> to vector<16x128xf32>
    %473 = vector.shape_cast %470 : vector<16x1xf32> to vector<16x1xf32>
    %474 = vector.broadcast %473 : vector<16x1xf32> to vector<16x128xf32>
    %475 = arith.select %124, %472, %474 : vector<16x128xi1>, vector<16x128xf32>
    %476 = arith.mulf %468, %454 : vector<16x128xf32>
    %477 = vector.extract_strided_slice %125 {offsets = [13, 0], sizes = [1, 128], strides = [1, 1]} : vector<16x128xf32> to vector<1x128xf32>
    %478 = vector.broadcast %477 : vector<1x128xf32> to vector<16x128xf32>
    %479 = arith.mulf %475, %478 : vector<16x128xf32>
    %480 = arith.addf %476, %479 : vector<16x128xf32>
    %481 = vector.extract_strided_slice %113 {offsets = [0, 13], sizes = [16, 1], strides = [1, 1]} : vector<16x16xf32> to vector<16x1xf32>
    %482 = vector.extract_strided_slice %117 {offsets = [0, 13], sizes = [16, 1], strides = [1, 1]} : vector<16x16xf32> to vector<16x1xf32>
    %483 = vector.shape_cast %481 : vector<16x1xf32> to vector<16x1xf32>
    %484 = vector.broadcast %483 : vector<16x1xf32> to vector<16x128xf32>
    %485 = vector.shape_cast %482 : vector<16x1xf32> to vector<16x1xf32>
    %486 = vector.broadcast %485 : vector<16x1xf32> to vector<16x128xf32>
    %487 = arith.select %124, %484, %486 : vector<16x128xi1>, vector<16x128xf32>
    %488 = arith.mulf %487, %480 : vector<16x128xf32>
    %cst_44 = arith.constant dense<0.000000e+00> : vector<128xf32>
    %489 = vector.multi_reduction <add>, %488, %cst_44 [0] : vector<16x128xf32> to vector<128xf32>
    %490 = vector.shape_cast %489 : vector<128xf32> to vector<1x128xf32>
    %491 = vector.extract_strided_slice %109 {offsets = [14, 0], sizes = [1, 128], strides = [1, 1]} : vector<16x128xf32> to vector<1x128xf32>
    %492 = vector.broadcast %491 : vector<1x128xf32> to vector<16x128xf32>
    %493 = arith.mulf %492, %118 : vector<16x128xf32>
    %494 = math.exp %493 : vector<16x128xf32>
    %495 = vector.extract_strided_slice %111 {offsets = [0, 14], sizes = [16, 1], strides = [1, 1]} : vector<16x16xf32> to vector<16x1xf32>
    %496 = vector.extract_strided_slice %115 {offsets = [0, 14], sizes = [16, 1], strides = [1, 1]} : vector<16x16xf32> to vector<16x1xf32>
    %497 = vector.shape_cast %495 : vector<16x1xf32> to vector<16x1xf32>
    %498 = vector.broadcast %497 : vector<16x1xf32> to vector<16x128xf32>
    %499 = vector.shape_cast %496 : vector<16x1xf32> to vector<16x1xf32>
    %500 = vector.broadcast %499 : vector<16x1xf32> to vector<16x128xf32>
    %501 = arith.select %124, %498, %500 : vector<16x128xi1>, vector<16x128xf32>
    %502 = arith.mulf %494, %480 : vector<16x128xf32>
    %503 = vector.extract_strided_slice %125 {offsets = [14, 0], sizes = [1, 128], strides = [1, 1]} : vector<16x128xf32> to vector<1x128xf32>
    %504 = vector.broadcast %503 : vector<1x128xf32> to vector<16x128xf32>
    %505 = arith.mulf %501, %504 : vector<16x128xf32>
    %506 = arith.addf %502, %505 : vector<16x128xf32>
    %507 = vector.extract_strided_slice %113 {offsets = [0, 14], sizes = [16, 1], strides = [1, 1]} : vector<16x16xf32> to vector<16x1xf32>
    %508 = vector.extract_strided_slice %117 {offsets = [0, 14], sizes = [16, 1], strides = [1, 1]} : vector<16x16xf32> to vector<16x1xf32>
    %509 = vector.shape_cast %507 : vector<16x1xf32> to vector<16x1xf32>
    %510 = vector.broadcast %509 : vector<16x1xf32> to vector<16x128xf32>
    %511 = vector.shape_cast %508 : vector<16x1xf32> to vector<16x1xf32>
    %512 = vector.broadcast %511 : vector<16x1xf32> to vector<16x128xf32>
    %513 = arith.select %124, %510, %512 : vector<16x128xi1>, vector<16x128xf32>
    %514 = arith.mulf %513, %506 : vector<16x128xf32>
    %cst_45 = arith.constant dense<0.000000e+00> : vector<128xf32>
    %515 = vector.multi_reduction <add>, %514, %cst_45 [0] : vector<16x128xf32> to vector<128xf32>
    %516 = vector.shape_cast %515 : vector<128xf32> to vector<1x128xf32>
    %517 = vector.extract_strided_slice %109 {offsets = [15, 0], sizes = [1, 128], strides = [1, 1]} : vector<16x128xf32> to vector<1x128xf32>
    %518 = vector.broadcast %517 : vector<1x128xf32> to vector<16x128xf32>
    %519 = arith.mulf %518, %118 : vector<16x128xf32>
    %520 = math.exp %519 : vector<16x128xf32>
    %521 = vector.extract_strided_slice %111 {offsets = [0, 15], sizes = [16, 1], strides = [1, 1]} : vector<16x16xf32> to vector<16x1xf32>
    %522 = vector.extract_strided_slice %115 {offsets = [0, 15], sizes = [16, 1], strides = [1, 1]} : vector<16x16xf32> to vector<16x1xf32>
    %523 = vector.shape_cast %521 : vector<16x1xf32> to vector<16x1xf32>
    %524 = vector.broadcast %523 : vector<16x1xf32> to vector<16x128xf32>
    %525 = vector.shape_cast %522 : vector<16x1xf32> to vector<16x1xf32>
    %526 = vector.broadcast %525 : vector<16x1xf32> to vector<16x128xf32>
    %527 = arith.select %124, %524, %526 : vector<16x128xi1>, vector<16x128xf32>
    %528 = arith.mulf %520, %506 : vector<16x128xf32>
    %529 = vector.extract_strided_slice %125 {offsets = [15, 0], sizes = [1, 128], strides = [1, 1]} : vector<16x128xf32> to vector<1x128xf32>
    %530 = vector.broadcast %529 : vector<1x128xf32> to vector<16x128xf32>
    %531 = arith.mulf %527, %530 : vector<16x128xf32>
    %532 = arith.addf %528, %531 : vector<16x128xf32>
    %533 = vector.extract_strided_slice %113 {offsets = [0, 15], sizes = [16, 1], strides = [1, 1]} : vector<16x16xf32> to vector<16x1xf32>
    %534 = vector.extract_strided_slice %117 {offsets = [0, 15], sizes = [16, 1], strides = [1, 1]} : vector<16x16xf32> to vector<16x1xf32>
    %535 = vector.shape_cast %533 : vector<16x1xf32> to vector<16x1xf32>
    %536 = vector.broadcast %535 : vector<16x1xf32> to vector<16x128xf32>
    %537 = vector.shape_cast %534 : vector<16x1xf32> to vector<16x1xf32>
    %538 = vector.broadcast %537 : vector<16x1xf32> to vector<16x128xf32>
    %539 = arith.select %124, %536, %538 : vector<16x128xi1>, vector<16x128xf32>
    %540 = arith.mulf %539, %532 : vector<16x128xf32>
    %cst_46 = arith.constant dense<0.000000e+00> : vector<128xf32>
    %541 = vector.multi_reduction <add>, %540, %cst_46 [0] : vector<16x128xf32> to vector<128xf32>
    %542 = vector.shape_cast %541 : vector<128xf32> to vector<1x128xf32>
    %543 = tpu.concatenate %152, %178, %204, %230, %256, %282, %308, %334, %360, %386, %412, %438, %464, %490, %516, %542 in 0 : vector<1x128xf32>, vector<1x128xf32>, vector<1x128xf32>, vector<1x128xf32>, vector<1x128xf32>, vector<1x128xf32>, vector<1x128xf32>, vector<1x128xf32>, vector<1x128xf32>, vector<1x128xf32>, vector<1x128xf32>, vector<1x128xf32>, vector<1x128xf32>, vector<1x128xf32>, vector<1x128xf32>, vector<1x128xf32> -> vector<16x128xf32>
    %544 = vector.broadcast %119 : vector<1x128xf32> to vector<16x128xf32>
    %545 = arith.mulf %87, %544 : vector<16x128xf32>
    %546 = arith.addf %543, %545 : vector<16x128xf32>
    %cst_47 = arith.constant 5.000000e-01 : f32
    %547 = vector.broadcast %cst_47 : f32 to vector<16x128xf32>
    %548 = arith.mulf %547, %53 : vector<16x128xf32>
    %549 = math.tanh %548 : vector<16x128xf32>
    %cst_48 = arith.constant 1.000000e+00 : f32
    %550 = vector.broadcast %cst_48 : f32 to vector<16x128xf32>
    %551 = arith.addf %549, %550 : vector<16x128xf32>
    %cst_49 = arith.constant 5.000000e-01 : f32
    %552 = vector.broadcast %cst_49 : f32 to vector<16x128xf32>
    %553 = arith.mulf %552, %551 : vector<16x128xf32>
    %554 = arith.mulf %53, %553 : vector<16x128xf32>
    %555 = arith.mulf %546, %554 : vector<16x128xf32>
    %556 = vector.extract_strided_slice %555 {offsets = [0, 64], sizes = [16, 64], strides = [1, 1]} : vector<16x128xf32> to vector<16x64xf32>
    %cst_50 = arith.constant dense<0.000000e+00> : vector<16x64xf32>
    %557 = tpu.matmul %46, %556, %cst_50 {dimension_numbers = #tpu.dot_dimension_numbers<[1], [0], [0], [1], [0, 0, 1, 1], [], []>} : vector<16x16xf32>, vector<16x64xf32>, vector<16x64xf32> -> vector<16x64xf32>
    %558 = vector.extract_strided_slice %555 {offsets = [0, 0], sizes = [16, 64], strides = [1, 1]} : vector<16x128xf32> to vector<16x64xf32>
    %559 = arith.addf %558, %557 : vector<16x64xf32>
    %560 = arith.truncf %559 : vector<16x64xf32> to vector<16x64xbf16>
    %c0_51 = arith.constant 0 : index
    %c0_52 = arith.constant 0 : index
    %561 = vector.load %arg4[%c0_51, %c0_52] : memref<192x32xbf16, #tpu.memory_space<vmem>>, vector<64x32xbf16>
    %cst_53 = arith.constant dense<0.000000e+00> : vector<16x32xf32>
    %562 = tpu.matmul %560, %561, %cst_53 {dimension_numbers = #tpu.dot_dimension_numbers<[1], [0], [0], [1], [0, 0, 1, 1], [], []>} : vector<16x64xbf16>, vector<64x32xbf16>, vector<16x32xf32> -> vector<16x32xf32>
    %563 = vector.broadcast %8 : vector<16x1xf32> to vector<16x32xf32>
    %564 = arith.mulf %1, %563 : vector<16x32xf32>
    %565 = arith.addf %564, %562 : vector<16x32xf32>
    %c26 = arith.constant 26 : index
    %c0_54 = arith.constant 0 : index
    %566 = vector.load %arg5[%c26, %c0_54] : memref<32x128xf32, #tpu.memory_space<vmem>>, vector<1x128xf32>
    %567 = vector.extract_strided_slice %566 {offsets = [0, 0], sizes = [1, 32], strides = [1, 1]} : vector<1x128xf32> to vector<1x32xf32>
    %c27 = arith.constant 27 : index
    %c0_55 = arith.constant 0 : index
    %568 = vector.load %arg5[%c27, %c0_55] : memref<32x128xf32, #tpu.memory_space<vmem>>, vector<1x128xf32>
    %569 = vector.extract_strided_slice %568 {offsets = [0, 0], sizes = [1, 32], strides = [1, 1]} : vector<1x128xf32> to vector<1x32xf32>
    %cst_56 = arith.constant dense<0.000000e+00> : vector<16xf32>
    %570 = vector.multi_reduction <add>, %565, %cst_56 [1] : vector<16x32xf32> to vector<16xf32>
    %571 = vector.shape_cast %570 : vector<16xf32> to vector<16x1xf32>
    %cst_57 = arith.constant 3.200000e+01 : f32
    %572 = vector.broadcast %cst_57 : f32 to vector<16x1xf32>
    %573 = arith.divf %571, %572 : vector<16x1xf32>
    %574 = vector.broadcast %573 : vector<16x1xf32> to vector<16x32xf32>
    %575 = arith.subf %565, %574 : vector<16x32xf32>
    %576 = arith.mulf %575, %575 : vector<16x32xf32>
    %cst_58 = arith.constant dense<0.000000e+00> : vector<16xf32>
    %577 = vector.multi_reduction <add>, %576, %cst_58 [1] : vector<16x32xf32> to vector<16xf32>
    %578 = vector.shape_cast %577 : vector<16xf32> to vector<16x1xf32>
    %cst_59 = arith.constant 3.200000e+01 : f32
    %579 = vector.broadcast %cst_59 : f32 to vector<16x1xf32>
    %580 = arith.divf %578, %579 : vector<16x1xf32>
    %cst_60 = arith.constant 9.99999974E-6 : f32
    %581 = vector.broadcast %cst_60 : f32 to vector<16x1xf32>
    %582 = arith.addf %580, %581 : vector<16x1xf32>
    %583 = math.rsqrt %582 : vector<16x1xf32>
    %584 = vector.broadcast %583 : vector<16x1xf32> to vector<16x32xf32>
    %585 = arith.mulf %575, %584 : vector<16x32xf32>
    %586 = vector.broadcast %567 : vector<1x32xf32> to vector<16x32xf32>
    %587 = arith.mulf %585, %586 : vector<16x32xf32>
    %588 = vector.broadcast %569 : vector<1x32xf32> to vector<16x32xf32>
    %589 = arith.addf %587, %588 : vector<16x32xf32>
    %590 = arith.truncf %589 : vector<16x32xf32> to vector<16x32xbf16>
    %c288 = arith.constant 288 : index
    %c0_61 = arith.constant 0 : index
    %591 = vector.load %arg3[%c288, %c0_61] : memref<320x128xbf16, #tpu.memory_space<vmem>>, vector<32x128xbf16>
    %cst_62 = arith.constant dense<0.000000e+00> : vector<16x128xf32>
    %592 = tpu.matmul %590, %591, %cst_62 {dimension_numbers = #tpu.dot_dimension_numbers<[1], [0], [0], [1], [0, 0, 1, 1], [], []>} : vector<16x32xbf16>, vector<32x128xbf16>, vector<16x128xf32> -> vector<16x128xf32>
    %c7 = arith.constant 7 : index
    %c0_63 = arith.constant 0 : index
    %593 = vector.load %arg5[%c7, %c0_63] : memref<32x128xf32, #tpu.memory_space<vmem>>, vector<1x128xf32>
    %594 = vector.broadcast %593 : vector<1x128xf32> to vector<16x128xf32>
    %595 = arith.addf %592, %594 : vector<16x128xf32>
    %cst_64 = arith.constant 5.000000e-01 : f32
    %596 = vector.broadcast %cst_64 : f32 to vector<16x128xf32>
    %597 = arith.mulf %596, %595 : vector<16x128xf32>
    %cst_65 = arith.constant 4.471500e-02 : f32
    %598 = vector.broadcast %cst_65 : f32 to vector<16x128xf32>
    %599 = arith.mulf %598, %595 : vector<16x128xf32>
    %600 = arith.mulf %599, %595 : vector<16x128xf32>
    %601 = arith.mulf %600, %595 : vector<16x128xf32>
    %602 = arith.addf %595, %601 : vector<16x128xf32>
    %cst_66 = arith.constant 0.797884583 : f32
    %603 = vector.broadcast %cst_66 : f32 to vector<16x128xf32>
    %604 = arith.mulf %603, %602 : vector<16x128xf32>
    %605 = math.tanh %604 : vector<16x128xf32>
    %cst_67 = arith.constant 1.000000e+00 : f32
    %606 = vector.broadcast %cst_67 : f32 to vector<16x128xf32>
    %607 = arith.addf %606, %605 : vector<16x128xf32>
    %608 = arith.mulf %597, %607 : vector<16x128xf32>
    %609 = arith.truncf %608 : vector<16x128xf32> to vector<16x128xbf16>
    %c64 = arith.constant 64 : index
    %c0_68 = arith.constant 0 : index
    %610 = vector.load %arg4[%c64, %c0_68] : memref<192x32xbf16, #tpu.memory_space<vmem>>, vector<128x32xbf16>
    %cst_69 = arith.constant dense<0.000000e+00> : vector<16x32xf32>
    %611 = tpu.matmul %609, %610, %cst_69 {dimension_numbers = #tpu.dot_dimension_numbers<[1], [0], [0], [1], [0, 0, 1, 1], [], []>} : vector<16x128xbf16>, vector<128x32xbf16>, vector<16x32xf32> -> vector<16x32xf32>
    %c28 = arith.constant 28 : index
    %c0_70 = arith.constant 0 : index
    %612 = vector.load %arg5[%c28, %c0_70] : memref<32x128xf32, #tpu.memory_space<vmem>>, vector<1x128xf32>
    %613 = vector.extract_strided_slice %612 {offsets = [0, 0], sizes = [1, 32], strides = [1, 1]} : vector<1x128xf32> to vector<1x32xf32>
    %614 = vector.broadcast %613 : vector<1x32xf32> to vector<16x32xf32>
    %615 = arith.addf %611, %614 : vector<16x32xf32>
    %616 = vector.broadcast %8 : vector<16x1xf32> to vector<16x32xf32>
    %617 = arith.mulf %615, %616 : vector<16x32xf32>
    %618 = arith.addf %565, %617 : vector<16x32xf32>
    %c0_71 = arith.constant 0 : index
    %c0_72 = arith.constant 0 : index
    %c0_73 = arith.constant 0 : index
    %619 = vector.load %arg6[%c0_71, %c0_72, %c0_73] : memref<1x16x32xf32, #tpu.memory_space<vmem>>, vector<1x16x32xf32>
    %620 = vector.shape_cast %619 : vector<1x16x32xf32> to vector<16x32xf32>
    %621 = vector.shape_cast %618 : vector<16x32xf32> to vector<1x16x32xf32>
    tpu.vector_store %arg6[%c0_71, %c0_72, %c0_73], %621 {strides = array<i32>} : memref<1x16x32xf32, #tpu.memory_space<vmem>>, vector<1x16x32xf32>,
    return
  }
  func.func @transform_0(%arg0: i32, %arg1: memref<2xi32, #tpu.memory_space<smem>>) -> (i32, i32, i32) {
    %c0_i32 = arith.constant 0 : i32
    %c0_i32_0 = arith.constant 0 : i32
    %c0_i32_1 = arith.constant 0 : i32
    return %arg0, %c0_i32, %c0_i32_0 : i32, i32, i32
  }
  func.func @transform_1(%arg0: i32, %arg1: memref<2xi32, #tpu.memory_space<smem>>) -> (i32, i32) {
    %c0_i32 = arith.constant 0 : i32
    %c0_i32_0 = arith.constant 0 : i32
    %c0_i32_1 = arith.constant 0 : i32
    return %c0_i32, %c0_i32_0 : i32, i32
  }
  func.func @transform_2(%arg0: i32, %arg1: memref<2xi32, #tpu.memory_space<smem>>) -> (i32, i32) {
    %c0_i32 = arith.constant 0 : i32
    %c0_i32_0 = arith.constant 0 : i32
    %c0_i32_1 = arith.constant 0 : i32
    return %c0_i32, %c0_i32_0 : i32, i32
  }
  func.func @transform_3(%arg0: i32, %arg1: memref<2xi32, #tpu.memory_space<smem>>) -> (i32, i32) {
    %c0_i32 = arith.constant 0 : i32
    %c0_i32_0 = arith.constant 0 : i32
    %c0_i32_1 = arith.constant 0 : i32
    return %c0_i32, %c0_i32_0 : i32, i32
  }
  func.func @transform_4(%arg0: i32, %arg1: memref<2xi32, #tpu.memory_space<smem>>) -> (i32, i32, i32) {
    %c0_i32 = arith.constant 0 : i32
    %c0_i32_0 = arith.constant 0 : i32
    %c0_i32_1 = arith.constant 0 : i32
    return %arg0, %c0_i32, %c0_i32_0 : i32, i32, i32
  }
}

</mosaic_0001>

<bundles_post_ra>
// kernel: object_mamba_block.1
= control target key start
LH: loop header
LB: loop body
LE: loop exit
PB: predicated region body
PF: predicated region fallthrough
CT: control target
= control target key end

     0   :  { %s4516_s0 = inlined_call_operand.vmem [shape: s32[2], index: 0, kind: input, shape index: {}]   ;;  %s4517_s1 = inlined_call_operand.vmem [shape: f32[2,16,32], index: 1, kind: input, shape index: {}]   ;;  %s4518_s2 = inlined_call_operand.hbm [shape: bf16[320,128], index: 2, kind: input, shape index: {}]   ;;  %s4519_s3 = inlined_call_operand.vmem [shape: bf16[192,32], index: 3, kind: input, shape index: {}]   ;;  %s4520_s4 = inlined_call_operand.vmem [shape: f32[32,128], index: 4, kind: input, shape index: {}]   ;;  %s4521_s5 = inlined_call_operand.hbm [shape: f32[2,16,32], index: 5, kind: output, shape index: {}]  }
   0x1   :  { %s10_s20 = sshll.u32 %s4516_s0, 4  ;;  %s11_s20 = int_to_ptr.vmem [resolvable:$true] %s10_s20 }
   0x2   :  { %s3069_s21 = scalar_lea.vmem %s11_s20, 16  ;;  %p3074_p1 = scmp.lt.s32.totalorder %s11_s20, %s11_s20 }
   0x3   :  { %p3070_p0 = scmp.ne.s32.totalorder %s11_s20, %s3069_s21  ;;  %p3075_p2 = scmp.lt.s32.totalorder %s3069_s21, %s3069_s21 }
   0x5   :  { %p3076_p3 = por %p3075_p2, %p3074_p1 }
   0x7   :  { %p3077_p4 = pnand %p3076_p3, %p3070_p0 }
   0x9   :  { %3080 = shalt.err (!%p3077_p4)  }
   0xa   :  { %s3179_s22 = smov [#allocation3]  }
   0xb   :  { %13 = dma.vmem_to_smem %s11_s20, 16, %s3179_s22, [#allocation2] }
   0xc   :  { %3153 = dma.done.wait [#allocation2], 16 }
   0xd   :  { %3154 = vsyncadd [#allocation2], 4294967280 }
   0xe   :  { %15 = sfence }
   0xf   :  { %16 = vsyncpa [#allocation5], 0 }
  0x10   :  { %17 = vsyncpa [#allocation6], 0 }
  0x11   :  { %19 = vsyncpa [#allocation6 + $0x1], 0  ;;  %s3242_s23 = smov 0   ;;  %s3244_s24 = smov 0  }
  0x12   :  { %s3246_s0 = smov 0   ;;  %s3248_s25 = smov 0  }
  0x13 LB: > { %s3263_s26 = sadd.s32 4294967295, %s3177_s25   ;;  %s2527_s27 = sadd.s32 4294967294, %s3177_s25   ;;  %s3177_s25 = sphi %s3248_s25, %s4692_s25   ;;  %s3173_s0 = sphi %s3246_s0, %s4691_s0   ;;  %s3169_s24 = sphi %s3244_s24, %s4690_s24   ;;  %s3165_s23 = sphi %s3242_s23, %s4689_s23  }
  0x14   : > { %s3267_s28 = sadd.s32 1, %s3177_s25   ;;  %s121_s29 = sadd.s32 1, %s3173_s0 }
  0x15   : > { %s118_s30 = ssub.s32 %s3177_s25, %s3267_s28  ;;  %p131_p5 = scmp.ne.s32.totalorder %s3173_s0, %s3169_s24 }
  0x16   : > { %p119_p6 = scmp.eq.s32.totalorder %s118_s30, 0  ;;  %p132_p7 = scmp.eq.s32.totalorder %s3263_s26, 1 }
  0x17   : > { %p137_p8 = scmp.ne.s32.totalorder %s3169_s24, %s3165_s23  ;;  %p138_p9 = scmp.eq.s32.totalorder %s2527_s27, 1 }
  0x18   : > { %s3278_s6 = scalar_select %p119_p6, %s3173_s0, %s121_s29  }
  0x19   : > { %p3280_p10 = por %p132_p7, %p131_p5  ;;  %p3284_p11 = por %p138_p9, %p137_p8 }
  0x1a   : > { %p2528_p12 = scmp.ge.s32.totalorder %s3177_s25, 1  ;;  %p145_p13 = scmp.lt.s32.totalorder %s3177_s25, 3 }
  0x1b   : > { %s4591_s7 = scalar_select %p3280_p10, 1, 0 }
  0x1c   : > { %s4592_s8 = scalar_select %p3284_p11, 1, 0 }
  0x1d   : > { %p4522_p0 = scmp.eq.s32.totalorder %s3263_s26, 0  ;;  %p3291_p1 = pnand %p2528_p12, %p145_p13 }
  0x1e   : > { %s3180_s10 = smov [#allocation4]   ;;  %s3081_s15 = scalar_lea.hbm %s4518_s2, 2560 }
  0x1f   : > { %s4593_s9 = scalar_select %p3291_p1, 1, 0 }
  0x20   : > { %s157_s11 = sshll.u32 %s3180_s10, 4  ;;  %p2758_p2 = pneg %p3291_p1  ;;  %s158_s11 = int_to_ptr.vmem [resolvable:$true] %s157_s11 }
  0x21   : > { %p3082_p4 = scmp.ne.s32.totalorder %s4518_s2, %s3081_s15  ;;  %p3088_p8 = scmp.lt.u32.totalorder %s3081_s15, %s4518_s2 }
  0x22   : > { %p3299_p3 = pnand %p4522_p0, %p2758_p2 }
  0x24   : > { %p3083_p5 = pneg %p3299_p3 }
  0x26   : > { %p3084_p6 = pnand %p3083_p5, %p3082_p4 }
  0x28   : > { %p3085_p7 = pneg %p3084_p6 }
  0x2a   : > { %p3090_p9 = pnand %p3088_p8, %p3085_p7 }
  0x2c   : > { %3093 = shalt.err (!%p3090_p9)
}
  0x2d   : > { %s3094_s20 = scalar_lea.vmem %s158_s11, 2560  ;;  %p3102_p0 = scmp.lt.s32.totalorder %s158_s11, %s158_s11 }
  0x2e   : > { %p3095_p12 = scmp.ne.s32.totalorder %s158_s11, %s3094_s20  ;;  %p3103_p11 = scmp.lt.s32.totalorder %s3094_s20, %s3094_s20 }
  0x30   : > { %p3097_p13 = pnand %p3095_p12, %p3083_p5  ;;  %p3104_p10 = por %p3103_p11, %p3102_p0 }
  0x32   : > { %p3098_p2 = pneg %p3097_p13 }
  0x34   : > { %p3105_p1 = pnand %p3104_p10, %p3098_p2 }
  0x36   : > { %3108 = shalt.err (!%p3105_p1)
}
  0x37   : > { %s3181_s21 = smov 64   ;;  %s3182_s22 = smov 4  }
  0x38   : > { %2761 = dma.hbm_to_vmem [thread:$0]  (!%p3299_p3), %s4518_s2, 2560, %s158_s11, [#allocation5], %s3181_s21, %s3181_s21, %s3182_s22  }
  0x39   : > { %p4595_p4 = scmp.ne.s32.totalorder %s4593_s9, 0 }
  0x3b   : > { %187 = sbr.rel (%p4595_p4) target bundleno = 3320 (0xcf8), region = 36 }
  0x42   : > { %p4596_p6 = scmp.eq.s32.totalorder %s3263_s26, 0 }
  0x44   : > { %3156 = dma.done.wait (%p4596_p6), [#allocation5], 2560   ;;  %p4597_p5 = pmov %p4596_p6 }
  0x45   : > { %p213_p10 = scmp.lt.s32.totalorder %s3263_s26, 1  ;;  %vm234_vm0 = vcmask 261120   ;;  %v2943_v14 = vld [vmem:[#allocation4] sm:$0xff]   ;;  %v4525_v15 = vmov 0.0   ;;  %vm3184_vm1 = vmmov 0   ;;  %v2944_v16 = vld [vmem:[#allocation4 + $0x8] sm:$0xff]   ;;  %v222_v34 = vlaneseq }
  0x46   : > { %3158 = vsyncadd (%p4597_p5), [#allocation5], 4294964736  ;;  %2642 = vmatprep.subr.bf16.mxu0 %v4525_v15  ;;  %2646 = vmatprep.mubr.msk.bf16.mxu0 %vm3184_vm1, %v4525_v15  ;;  %v2538_v25 = vld [vmem:[%s4520_s4 + $0x18] ss:$0 sm:$0xff]  ;;  %v2539_v29 = vld [vmem:[%s4520_s4 + $0x19] ss:$0 sm:$0xff] }
  0x47   : > { %s214_s30 = scalar_select %p213_p10, %s3263_s26, 1  ;;  %2643 = vmatpush3.bf16.msra.mxu0 %v2943_v14  ;;  %2657 = vmatprep.subr.bf16.mxu1 %v4525_v15  ;;  %v3353_v35 = vshrl.u32 %v222_v34, 7  ;;  %v4598_v40 = vmov 0  ;;  %v3362_v41 = vand.u32 127, %v222_v34  ;;  %v4601_v43 = vmov 0  ;;  %v2945_v53 = vld [vmem:[#allocation4 + $0x10] sm:$0xff]  }
  0x48   : > { %2644 = vmatprep.subr.bf16.mxu0 %v4525_v15  ;;  %2673 = vmatprep.mubr.msk.bf16.mxu1 %vm3184_vm1, %v4525_v15  ;;  %s221_s17 = sld [smem:[#allocation3 + %s3263_s26]]  ;;  %vm349_vm5 = vcmask 130048   ;;  %v2946_v54 = vld [vmem:[#allocation4 + $0x18] sm:$0xff]   ;;  %v2947_v56 = vld [vmem:[#allocation4 + $0x20] sm:$0xff]   ;;  %s3185_s19 = smov 64   ;;  %v2948_v58 = vld [vmem:[#allocation4 + $0x28] sm:$0xff]  }
  0x49   : > { %s2594_s10 = sshll.u32 %s214_s30, 4  ;;  %v224_v36 = vadd.s32 8, %v3353_v35  ;;  %2658 = vmatpush3.bf16.msra.mxu1 %v2945_v53  ;;  %v2949_v59 = vld [vmem:[#allocation4 + $0x30] sm:$0xff]   ;;  %v2950_v60 = vld [vmem:[#allocation4 + $0x38] sm:$0xff]   ;;  %v2951_v61 = vld [vmem:[#allocation4 + $0x40] sm:$0xff]   ;;  %vm439_vm7 = vcmask 523264  }
  0x4a   : > { %s3330_s14 = scalar_lea.vmem %s4517_s1, %s2594_s10  ;;  %2659 = vmatprep.subr.bf16.mxu1 %v4525_v15  ;;  %v2952_v62 = vld [vmem:[#allocation4 + $0x48] sm:$0xff]   ;;  %v2953_v63 = vld [vmem:[#allocation4 + $0x50] sm:$0xff]   ;;  %vm456_vm8 = vcmask 1042432   ;;  %vm486_vm9 = vcmask 1046528   ;;  %vm506_vm10 = vcmask 1045504   ;;  %vm526_vm11 = vcmask 1044480  }
  0x4b   : > { %v219_v0 = vld [vmem:[%s3330_s14] sm:$0xff]  ;;  %v220_v1 = vld [vmem:[%s3330_s14 + $0x8] sm:$0xff]  ;;  %2645 = vmatpush3.bf16.msra.mxu0 %v2944_v16  ;;  %s3186_s29 = smov 110   ;;  %s3187_s30 = smov 126   ;;  %vm942_vm13 = vcmp.lt.s32.totalorder %v3362_v41, 64  ;;  %vm1995_vm15 = vcmask 1040384  }
  0x4c   : > { %v235_v2 = vsel %vm234_vm0, %v219_v0, 0.0  ;;  %v238_v3 = vsel %vm234_vm0, %v220_v1, 0.0  ;;  %s3188_s10 = smov 92   ;;  %s3189_s13 = smov 76  }
  0x4d   : > { %236 = vadd.xlane.f32.xlu0 %v235_v2  ;;  %2660 = vmatpush3.bf16.msra.mxu1 %v2946_v54  ;;  %v2956_v2 = vld [vmem:[#allocation4 + $0x68] sm:$0xff]   ;;  %s210_s16 = sand.u32 1, %s3169_s24   ;;  %s2595_s21 = sshll.u32 %s3263_s26, 8 }
  0x4e   : > { %s2543_s18 = sadd.s32 4294967295, %s221_s17  ;;  %v225_v38 = vstv %s221_s17  ;;  %2661 = vmatprep.subr.bf16.mxu1 %v4525_v15  ;;  %s2533_s17 = sshll.u32 %s210_s16, 4 }
  0x4f   : > { %v338_v37 = vstv %s2543_s18  ;;  %vm3358_vm2 = vcmp.lt.s32.totalorder %v3353_v35, %v225_v38  ;;  %vm3364_vm3 = vcmp.lt.s32.totalorder %v224_v36, %v225_v38  ;;  %s212_s22 = scalar_lea.vmem [#allocation7], %s2533_s17  ;;  %s4475_s26 = scalar_lea.sflag [#allocation6], %s210_s16 }
  0x50   : > { %v339_v39 = vsub.s32 %v338_v37, %v3353_v35  ;;  %v4599_v40 = vsel %vm3358_vm2, 4294967295, %v4598_v40  ;;  %v340_v42 = vsub.s32 %v338_v37, %v224_v36  ;;  %v4602_v43 = vsel %vm3364_vm3, 4294967295, %v4601_v43  ;;  %s2453_s27 = sshll.u32 %s212_s22, 4  ;;  %p4687_p0 = scmp.ne.s32.totalorder %s4591_s7, 0  ;;  %s4470_s27 = int_to_ptr.vmem [resolvable:$true] %s2453_s27 }
  0x51   : > { %239 = vadd.xlane.f32.xlu0 %v238_v3  ;;  %4600 = vst [vmem:[#allocation11_spill] sm:$0xff] %v4599_v40  ;;  %4603 = vst [vmem:[#allocation12_spill] sm:$0xff] %v4602_v43  ;;  %2662 = vmatpush3.bf16.msra.mxu1 %v2947_v56  ;;  %v2957_v3 = vld [vmem:[#allocation4 + $0x70] sm:$0xff]  }
  0x52   : > { %v341_v44 = vsel %vm3358_vm2, %v339_v39, %v3353_v35  ;;  %v342_v45 = vsel %vm3364_vm3, %v340_v42, %v224_v36  ;;  %2663 = vmatprep.subr.bf16.mxu1 %v4525_v15 }
  0x53   : > { %vm343_vm4 = vcmp.eq.s32.totalorder %v3362_v41, %v341_v44  ;;  %vm344_vm6 = vcmp.eq.s32.totalorder %v3362_v41, %v342_v45 }
  0x54   : > { %v3375_v46 = vsel %vm343_vm4, 1.0, %v4525_v15  ;;  %v3387_v52 = vsel %vm344_vm6, 1.0, %v4525_v15  ;;  %vm1997_vm4 = vcmask 1041408   ;;  %vm2000_vm6 = vcmask 1043456  }
  0x55   : > { %4605 = vst [vmem:[#allocation14_spill] sm:$0xff] %v3387_v52  ;;  %2664 = vmatpush3.bf16.msra.mxu1 %v2948_v58 }
  0x56   : > { %2665 = vmatprep.subr.bf16.mxu1 %v4525_v15 }
  0x59   : > { %2666 = vmatpush3.bf16.msra.mxu1 %v2949_v59 }
  0x5a   : > { %2667 = vmatprep.subr.bf16.mxu1 %v4525_v15 }
  0x5d   : > { %2668 = vmatpush3.bf16.msra.mxu1 %v2950_v60 }
  0x5e   : > { %2669 = vmatprep.subr.bf16.mxu1 %v4525_v15 }
  0x61   : > { %2670 = vmatpush3.bf16.msra.mxu1 %v2951_v61 }
  0x62   : > { %2671 = vmatprep.subr.bf16.mxu1 %v4525_v15 }
  0x65   : > { %2672 = vmatpush3.bf16.msra.mxu1 %v2952_v62 }
  0x66   : > { %2716 = vmatprep.subr.bf16.mxu1 %v4525_v15 }
  0xda   : > { %v237_v4 = vpop.xlane.xlu0 %236 }
  0xdb   : > { %v242_v5 = vmul.f32 0.03125, %v237_v4  ;;  %v2958_v4 = vld [vmem:[#allocation4 + $0x78] sm:$0xff]  }
  0xdd   : > { %v244_v6 = vsub.f32 %v219_v0, %v242_v5  ;;  %v2954_v0 = vld [vmem:[#allocation4 + $0x58] sm:$0xff]   ;;  %v2959_v5 = vld [vmem:[#allocation4 + $0x80] sm:$0xff]  }
  0xde   : > { %v240_v7 = vpop.xlane.xlu0 %239 }
  0xdf   : > { %v243_v8 = vmul.f32 0.03125, %v240_v7  ;;  %v246_v9 = vmul.f32 %v244_v6, %v244_v6  ;;  %v452_v7 = vld [vmem:[%s4520_s4] sm:$0xf] }
  0xe1   : > { %v245_v10 = vsub.f32 %v220_v1, %v243_v8  ;;  %v248_v11 = vsel %vm234_vm0, %v246_v9, 0.0  ;;  %v2955_v1 = vld [vmem:[#allocation4 + $0x60] sm:$0xff]   ;;  %v3424_v8 = vsub.s32 2, %v3353_v35  ;;  %v3427_v9 = vsub.s32 3, %v3353_v35 }
  0xe2   : > { %249 = vadd.xlane.f32.xlu1 %v248_v11 }
  0xe3   : > { %v247_v12 = vmul.f32 %v245_v10, %v245_v10  ;;  %v519_v14 = vrot.slane %v452_v7, %v3427_v9 }
  0xe5   : > { %v251_v13 = vsel %vm234_vm0, %v247_v12, 0.0 }
  0xe6   : > { %252 = vadd.xlane.f32.xlu1 %v251_v13  ;;  %v499_v13 = vrot.slane %v452_v7, %v3424_v8 }
 0x16f   : > { %v250_v17 = vpop.xlane.xlu1 %249 }
 0x170   : > { %v254_v18 = vmul.f32 0.03125, %v250_v17 }
 0x172   : > { %v256_v19 = vadd.f32 1e-05, %v254_v18 }
 0x173   : > { %v253_v20 = vpop.xlane.xlu1 %252 }
 0x174   : > { %2975 = vrsqrt.f32 %v256_v19  ;;  %v255_v21 = vmul.f32 0.03125, %v253_v20 }
 0x176   : > { %v257_v22 = vadd.f32 1e-05, %v255_v21 }
 0x178   : > { %2977 = vrsqrt.f32 %v257_v22 }
 0x17e   : > { %v2976_v23 = vpop.eup %2975 }
 0x17f   : > { %v260_v24 = vmul.f32 %v2976_v23, %v244_v6  ;;  %v3418_v6 = vsub.s32 1, %v3353_v35  ;;  %v2548_v23 = vld [vmem:[%s4520_s4 + $0x4] ss:$0 sm:$0xff] }
 0x181   : > { %v266_v28 = vmul.f32 %v2538_v25, %v260_v24  ;;  %v479_v11 = vrot.slane %v452_v7, %v3418_v6 }
 0x182   : > { %v2978_v26 = vpop.eup %2977 }
 0x183   : > { %v261_v27 = vmul.f32 %v2978_v26, %v245_v10  ;;  %v272_v31 = vadd.f32 %v2539_v29, %v266_v28  ;;  %v3430_v10 = vsub.s32 0, %v3353_v35 }
 0x185   : > { %v267_v30 = vmul.f32 %v2538_v25, %v261_v27  ;;  %v471_v19 = vrot.slane %v452_v7, %v3430_v10 }
 0x187   : > { %v273_v32 = vadd.f32 %v2539_v29, %v267_v30 }
 0x189   : > { %v274_v33 = vpack.c.bf16 %v273_v32, %v272_v31 }
 0x18b   : > { %2647 = vmatmul.mubr.msk.bf16.vlgmr.msra.gmra.mrb[0].mxu0 %vm234_vm0, %v274_v33 }
 0x18c   : > { %2654 = vmatprep.mubr.msk.f32.mxu0 %vm349_vm5, %v3375_v46 }
 0x25e   : > { %v3380_v47 = vpop.f32.mrb[0].mxu0 }
 0x25f   : > { %4604 = vst [vmem:[#allocation13_spill] sm:$0xff] %v3380_v47  ;;  %v2648_v48 = vpop.f32.mrb[1].mxu0 }
 0x260   : > { %v3382_v49 = vpop.f32.mrb[2].mxu0 }
 0x261   : > { %v2744_v50 = vpack.c.bf16 %v3382_v49, %v3380_v47  ;;  %v2649_v51 = vpop.f32.mrb[3].mxu0 }
 0x263   : > { %2745 = vmatprep.subr.bf16.mxu0 %v2744_v50 }
 0x264   : > { %2747 = vmatpush3.bf16.msra.mxu0 %v2744_v50 }
 0x265   : > { %2677 = vmatprep.subr.bf16.mxu0 %v4525_v15 }
 0x267   : > { %2655 = vmatmul.mubr.msk.f32.vlgmr.msra.gmra.mrb[4].mxu0 %vm349_vm5, %v3387_v52 }
 0x268   : > { %2693 = vmatprep.mubr.msk.bf16.mxu0 %vm3184_vm1, %v4525_v15  ;;  %2678 = vmatpush3.bf16.msra.mxu0 %v2953_v63 }
 0x269   : > { %2679 = vmatprep.subr.bf16.mxu0 %v4525_v15 }
 0x26c   : > { %2680 = vmatpush3.bf16.msra.mxu0 %v2954_v0 }
 0x26d   : > { %2681 = vmatprep.subr.bf16.mxu0 %v4525_v15 }
 0x270   : > { %2682 = vmatpush3.bf16.msra.mxu0 %v2955_v1 }
 0x271   : > { %2683 = vmatprep.subr.bf16.mxu0 %v4525_v15 }
 0x274   : > { %2684 = vmatpush3.bf16.msra.mxu0 %v2956_v2 }
 0x275   : > { %2685 = vmatprep.subr.bf16.mxu0 %v4525_v15 }
 0x278   : > { %2686 = vmatpush3.bf16.msra.mxu0 %v2957_v3 }
 0x279   : > { %2687 = vmatprep.subr.bf16.mxu0 %v4525_v15 }
 0x27c   : > { %2688 = vmatpush3.bf16.msra.mxu0 %v2958_v4 }
 0x27d   : > { %2689 = vmatprep.subr.bf16.mxu0 %v4525_v15 }
 0x280   : > { %2690 = vmatpush3.bf16.msra.mxu0 %v2959_v5 }
 0x281   : > { %2691 = vmatprep.subr.bf16.mxu0 %v4525_v15 }
 0x33a   : > { %v3395_v55 = vpop.f32.mrb[4].mxu0 }
 0x33b   : > { %4606 = vst [vmem:[#allocation15_spill] sm:$0xff] %v3395_v55  ;;  %435 = vrot.lane.b32.xlu1 %v3395_v55, %s3185_s19  ;;  %v3399_v57 = vpop.f32.mrb[5].mxu0 }
 0x33c   : > { %4607 = vst [vmem:[#allocation16_spill] sm:$0xff] %v3399_v57  ;;  %433 = vrot.lane.b32.xlu0 %v3399_v57, %s3185_s19 }
 0x3ad   : > { %v436_v12 = vpop.permute.xlu1 %435 }
 0x3ae   : > { %v441_v16 = vsel %vm439_vm7, %v3382_v49, %v436_v12  ;;  %v434_v17 = vpop.permute.xlu0 %433 }
 0x3af   : > { %v458_v18 = vrot.slane %v441_v16, 5  ;;  %v440_v20 = vsel %vm439_vm7, %v3380_v47, %v434_v17 }
 0x3b0   : > { %v457_v21 = vrot.slane %v440_v20, 5 }
 0x3b1   : > { %v482_v22 = vmul.f32 %v479_v11, %v458_v18  ;;  %v502_v27 = vmul.f32 %v499_v13, %v458_v18  ;;  %v522_v28 = vmul.f32 %v519_v14, %v458_v18 }
 0x3b2   : > { %v459_v24 = vsel %vm456_vm8, %v457_v21, %v458_v18  ;;  %v463_v25 = vsel %vm456_vm8, 0.0, %v457_v21  ;;  %v2960_v21 = vld [vmem:[#allocation4 + $0x88] sm:$0xff]  }
 0x3b3   : > { %v490_v26 = vrot.slane %v482_v22, 1  ;;  %v472_v29 = vmul.f32 %v471_v19, %v463_v25  ;;  %v473_v30 = vmul.f32 %v471_v19, %v459_v24  ;;  %v480_v31 = vmul.f32 %v479_v11, %v463_v25  ;;  %2692 = vmatpush3.bf16.msra.mxu0 %v2960_v21 }
 0x3b4   : > { %v481_v32 = vmul.f32 %v479_v11, %v459_v24  ;;  %v500_v33 = vmul.f32 %v499_v13, %v463_v25  ;;  %v501_v36 = vmul.f32 %v499_v13, %v459_v24  ;;  %v520_v37 = vmul.f32 %v519_v14, %v463_v25 }
 0x3b5   : > { %v474_v34 = vadd.f32 %v2548_v23, %v472_v29  ;;  %v521_v38 = vmul.f32 %v519_v14, %v459_v24  ;;  %v475_v39 = vadd.f32 %v2548_v23, %v473_v30  ;;  %v487_v42 = vrot.slane %v480_v31, 1 }
 0x3b6   : > { %v488_v44 = vrot.slane %v481_v32, 1  ;;  %v507_v45 = vrot.slane %v500_v33, 2  ;;  %v510_v48 = vrot.slane %v502_v27, 2  ;;  %v508_v50 = vrot.slane %v501_v36, 2 }
 0x3b7   : > { %v527_v51 = vrot.slane %v520_v37, 3  ;;  %v528_v53 = vrot.slane %v521_v38, 3  ;;  %v530_v54 = vrot.slane %v522_v28, 3  ;;  %v4539_v36 = vmov 2  }
 0x3b8   : > { %v489_v56 = vsel %vm486_vm9, %v487_v42, %v488_v44  ;;  %v491_v58 = vsel %vm486_vm9, %v488_v44, %v490_v26  ;;  %v509_v61 = vsel %vm506_vm10, %v507_v45, %v508_v50  ;;  %v511_v62 = vsel %vm506_vm10, %v508_v50, %v510_v48 }
 0x3b9   : > { %v494_v59 = vadd.f32 %v489_v56, %v474_v34  ;;  %v495_v60 = vadd.f32 %v491_v58, %v475_v39  ;;  %v529_v63 = vsel %vm526_vm11, %v527_v51, %v528_v53  ;;  %v531_v0 = vsel %vm526_vm11, %v528_v53, %v530_v54 }
 0x3ba   : > { %v4547_v34 = vmov 0   ;;  %v4557_v45 = vmov 4   ;;  %v4529_v50 = vmov 6   ;;  %v4550_v51 = vmov 1  }
 0x3bb   : > { %v514_v1 = vadd.f32 %v509_v61, %v494_v59  ;;  %v515_v2 = vadd.f32 %v511_v62, %v495_v60  ;;  %v4527_v53 = vmov 7   ;;  %v4543_v54 = vmov 9  }
 0x3bc   : > { %v4535_v56 = vmov 3   ;;  %v4548_v58 = vmov 11   ;;  %v4537_v60 = vmov 13   ;;  %v4533_v62 = vmov 5  }
 0x3bd   : > { %v534_v3 = vadd.f32 %v529_v63, %v514_v1  ;;  %v535_v4 = vadd.f32 %v531_v0, %v515_v2  ;;  %v4555_v63 = vmov 8   ;;  %v2557_v0 = vld [vmem:[%s4520_s4 + $0x5] ss:$0 sm:$0xff]  ;;  %v4552_v2 = vmov 15  }
 0x3bf   : > { %v536_v5 = vmul.f32 0.5, %v534_v3  ;;  %v537_v7 = vmul.f32 0.5, %v535_v4 }
 0x3c1   : > { %2979 = vtanh.f32 %v536_v5  ;;  %v4541_v5 = vmov 12  }
 0x3c2   : > { %2981 = vtanh.f32 %v537_v7 }
 0x3cb   : > { %v2980_v11 = vpop.eup %2979 }
 0x3cc   : > { %v2982_v12 = vpop.eup %2981  ;;  %v540_v13 = vadd.f32 1.0, %v2980_v11  ;;  %v4531_v11 = vmov 10  }
 0x3cd   : > { %v541_v14 = vadd.f32 1.0, %v2982_v12  ;;  %v4545_v12 = vmov 14  }
 0x3ce   : > { %v542_v16 = vmul.f32 0.5, %v540_v13 }
 0x3cf   : > { %v543_v17 = vmul.f32 0.5, %v541_v14 }
 0x3d0   : > { %v3451_v18 = vmul.f32 %v542_v16, %v534_v3 }
 0x3d1   : > { %v3453_v19 = vmul.f32 %v543_v17, %v535_v4 }
 0x3d2   : > { %4608 = vst [vmem:[#allocation17_spill] sm:$0xff] %v3451_v18 }
 0x3d3   : > { %4609 = vst [vmem:[#allocation18_spill] sm:$0xff] %v3453_v19  ;;  %v546_v20 = vpack.c.bf16 %v3453_v19, %v3451_v18 }
 0x3d5   : > { %2674 = vmatmul.mubr.bf16.vlgmr.msra.gmra.mrb[0].mxu1 %v546_v20 }
 0x3d6   : > { %2720 = vmatprep.mubr.msk.bf16.mxu1 %vm3184_vm1, %v4525_v15 }
 0x4a8   : > { %v645_v22 = vpop.f32.mrb[0].mxu1 }
 0x4a9   : > { %825 = vrot.lane.b32.xlu0 %v645_v22, %s3186_s29  ;;  %787 = vrot.lane.b32.xlu1 %v645_v22, %s3187_s30  ;;  %v2675_v23 = vpop.f32.mrb[1].mxu1 }
 0x4aa   : > { %v648_v24 = vpop.f32.mrb[2].mxu1 }
 0x4ab   : > { %v2676_v25 = vpop.f32.mrb[3].mxu1  ;;  %v652_v26 = vpack.c.bf16 %v648_v24, %v645_v22 }
 0x4ad   : > { %863 = vrot.lane.b32.xlu1 %v645_v22, %s3188_s10  ;;  %789 = vrot.lane.b32.xlu0 %v648_v24, %s3187_s30  ;;  %s4468_s30 = scalar_lea.hbm %s4521_s5, %s2595_s21 }
 0x4ae   : > { %2694 = vmatmul.mubr.bf16.vlgmr.msra.gmra.mrb[8].mxu0 %v652_v26 }
 0x4af   : > { %2701 = vmatprep.mubr.msk.f32.mxu0 %vm349_vm5, %v3375_v46 }
 0x4b1   : > { %901 = vrot.lane.b32.xlu1 %v645_v22, %s3189_s13  ;;  %903 = vrot.lane.b32.xlu0 %v648_v24, %s3189_s13  ;;  %s3206_s13 = smov [#allocation7]  }
 0x4b5   : > { %865 = vrot.lane.b32.xlu1 %v648_v24, %s3188_s10  ;;  %s3109_s10 = scalar_lea.vmem %s4470_s27, 256 }
 0x4b6   : > { %p3110_p11 = scmp.ne.s32.totalorder %s4470_s27, %s3109_s10 }
 0x4b8   : > { %p3111_p1 = pnand %p3110_p11, %p4687_p0 }
 0x4b9   : > { %827 = vrot.lane.b32.xlu1 %v648_v24, %s3186_s29 }
 0x4ba   : > { %p3112_p3 = pneg %p3111_p1 }
 0x51b   : > { %v826_v27 = vpop.permute.xlu0 %825  ;;  %v788_v28 = vpop.permute.xlu1 %787 }
 0x51c   : > { %793 = vxpose.xlu0.b32.start [1/2] (short) (narrow) %v788_v28, 16 }
 0x51f   : > { %v864_v29 = vpop.permute.xlu1 %863  ;;  %v790_v30 = vpop.permute.xlu0 %789 }
 0x520   : > { %869 = vxpose.xlu1.b32.start [1/2] (short) (narrow) %v864_v29, 16  ;;  %794 = vxpose.xlu0.b32.end [2/2] (short) (narrow) %v790_v30, 16  ;;  %v3577_v29 = vld [vmem:[%s4520_s4 + $0x8] sm:$0xff] }
 0x523   : > { %v902_v31 = vpop.permute.xlu1 %901  ;;  %v904_v46 = vpop.permute.xlu0 %903 }
 0x524   : > { %831 = vxpose.xlu0.b32.start [1/2] (short) (narrow) %v826_v27, 16 }
 0x527   : > { %v866_v32 = vpop.permute.xlu1 %865 }
 0x528   : > { %870 = vxpose.xlu1.b32.end [2/2] (short) (narrow) %v866_v32, 16 }
 0x52b   : > { %v828_v33 = vpop.permute.xlu1 %827 }
 0x52c   : > { %907 = vxpose.xlu1.b32.start [1/2] (short) (narrow) %v902_v31, 16  ;;  %832 = vxpose.xlu0.b32.end [2/2] (short) (narrow) %v828_v33, 16 }
 0x530   : > { %908 = vxpose.xlu1.b32.end [2/2] (short) (narrow) %v904_v46, 16 }
 0x54e   : > { %2830 = vset.pattern.permute.xlu1 %v4547_v34 }
 0x555   : > { %2832 = vset.pattern.permute.xlu0 %v4539_v36 }
 0x581   : > { %v756_v37 = vpop.f32.mrb[8].mxu0 }
 0x582   : > { %v2695_v38 = vpop.f32.mrb[9].mxu0  ;;  %v757_v1 = vadd.f32 %v2557_v0, %v756_v37 }
 0x583   : > { %v3463_v39 = vpop.f32.mrb[10].mxu0 }
 0x584   : > { %v2696_v42 = vpop.f32.mrb[11].mxu0  ;;  %v765_v3 = vand.u32 2147483647, %v757_v1  ;;  %v763_v21 = vmax.f32 %v757_v1, 0.0  ;;  %v3557_v24 = vadd.f32 %v2557_v0, %v3463_v39  ;;  %vm781_vm12 = vcmp.gt.f32.partialorder %v757_v1, 20.0 }
 0x586   : > { %v767_v4 = vsub.f32 0.0, %v765_v3  ;;  %v766_v26 = vand.u32 2147483647, %v3557_v24  ;;  %vm782_vm14 = vcmp.gt.f32.partialorder %v3557_v24, 20.0 }
 0x588   : > { %v769_v7 = vmul.f32 1.442695, %v767_v4  ;;  %v768_v28 = vsub.f32 0.0, %v766_v26 }
 0x58a   : > { %2983 = vpow2.f32 %v769_v7  ;;  %v771_v31 = vmul.f32 1.442695, %v768_v28 }
 0x594   : > { %v2984_v13 = vpop.eup %2983 }
 0x595   : > { %v773_v14 = vadd.f32 1.0, %v2984_v13 }
 0x597   : > { %2985 = vlog2.f32 %v773_v14 }
 0x598   : > { %2987 = vpow2.f32 %v771_v31 }
 0x59c   : > { %v3465_v44 = vpop.trf.xlu0 }
 0x59d   : > { %1096 = vperm.xlu0 %2832, %v3465_v44   ;;  %959 = vperm.xlu1 %2830, %v3465_v44  }
 0x5a0   : > { %v3490_v59 = vpop.trf.xlu0 }
 0x5a1   : > { %2835 = vset.pattern.permute.xlu0 %v4557_v45  ;;  %v2986_v17 = vpop.eup %2985 }
 0x5a2   : > { %1226 = vperm.xlu0 %2835, %v3465_v44   ;;  %v776_v20 = vmul.f32 0.6931472, %v2986_v17 }
 0x5a4   : > { %v3471_v48 = vpop.trf.xlu1  ;;  %v779_v23 = vadd.f32 %v776_v20, %v763_v21 }
 0x5a5   : > { %969 = vperm.xlu1 %2830, %v3471_v48  }
 0x5a6   : > { %2838 = vset.pattern.permute.xlu0 %v4529_v50  ;;  %v3563_v25 = vsel %vm781_vm12, %v757_v1, %v779_v23  ;;  %v2988_v1 = vpop.eup %2987 }
 0x5a7   : > { %1356 = vperm.xlu0 %2838, %v3465_v44   ;;  %v3571_v27 = vrot.slane %v3563_v25, %v3430_v10  ;;  %v3586_v32 = vrot.slane %v3563_v25, %v3418_v6  ;;  %v3611_v3 = vmul.f32 %v3563_v25, %v3451_v18  ;;  %v3620_v13 = vrot.slane %v3563_v25, %v3427_v9 }
 0x5a8   : > { %v3497_v61 = vpop.trf.xlu0  ;;  %v3539_v16 = vpop.trf.xlu1  ;;  %v774_v17 = vadd.f32 1.0, %v2988_v1 }
 0x5a9   : > { %2831 = vset.pattern.permute.xlu1 %v4550_v51  ;;  %v951_v30 = vmul.f32 %v3571_v27, %v3577_v29  ;;  %v1024_v37 = vmul.f32 %v3586_v32, %v3577_v29  ;;  %4611 = vst [vmem:[#allocation20_spill] sm:$0xff] %v3620_v13  ;;  %v3628_v21 = vrot.slane %v3611_v3, %v3430_v10 }
 0x5aa   : > { %1031 = vperm.xlu1 %2831, %v3465_v44   ;;  %v1154_v28 = vmul.f32 %v3620_v13, %v3577_v29  ;;  %v3669_v15 = vrot.slane %v3611_v3, %v3418_v6 }
 0x5ab   : > { %1364 = vperm.xlu0 %2838, %v3471_v48   ;;  %v953_v33 = vmul.f32 1.442695, %v951_v30  ;;  %v1026_v39 = vmul.f32 1.442695, %v1024_v37  ;;  %v3637_v37 = vsub.s32 4, %v3353_v35 }
 0x5ac   : > { %v3554_v22 = vpop.trf.xlu1  ;;  %v3590_v46 = vpop.trf.xlu0  ;;  %4614 = vst [vmem:[#allocation23_spill] sm:$0xff] %v3669_v15 }
 0x5ad   : > { %2989 = vpow2.f32 %v953_v33 }
 0x5ae   : > { %1039 = vperm.xlu1 %2831, %v3471_v48   ;;  %2991 = vpow2.f32 %v1026_v39 }
 0x5af   : > { %2839 = vset.pattern.permute.xlu0 %v4527_v53  ;;  %2993 = vlog2.f32 %v774_v17 }
 0x5b0   : > { %1421 = vperm.xlu0 %2839, %v3465_v44   ;;  %v3596_v38 = vpop.trf.xlu1 }
 0x5b2   : > { %2833 = vset.pattern.permute.xlu1 %v4539_v36 }
 0x5b3   : > { %1104 = vperm.xlu1 %2833, %v3471_v48  }
 0x5b4   : > { %2842 = vset.pattern.permute.xlu0 %v4543_v54 }
 0x5b5   : > { %1551 = vperm.xlu0 %2842, %v3465_v44  }
 0x5b7   : > { %2834 = vset.pattern.permute.xlu1 %v4535_v56  ;;  %v2990_v14 = vpop.eup %2989 }
 0x5b8   : > { %1161 = vperm.xlu1 %2834, %v3465_v44   ;;  %v979_v30 = vmul.f32 0.0, %v2990_v14  ;;  %v2992_v1 = vpop.eup %2991  ;;  %v1156_v14 = vmul.f32 1.442695, %v1154_v28 }
 0x5b9   : > { %2845 = vset.pattern.permute.xlu0 %v4548_v58 }
 0x5ba   : > { %1681 = vperm.xlu0 %2845, %v3465_v44  }
 0x5bc   : > { %1169 = vperm.xlu1 %2834, %v3471_v48  }
 0x5be   : > { %2848 = vset.pattern.permute.xlu0 %v4537_v60 }
 0x5bf   : > { %1811 = vperm.xlu0 %2848, %v3465_v44  }
 0x5c0   : > { %2836 = vset.pattern.permute.xlu1 %v4557_v45 }
 0x5c1   : > { %1234 = vperm.xlu1 %2836, %v3471_v48  }
 0x5c3   : > { %2851 = vset.pattern.permute.xlu0 %v4547_v34 }
 0x5c4   : > { %991 = vperm.xlu0 %2851, %v3497_v61  }
 0x5c5   : > { %2837 = vset.pattern.permute.xlu1 %v4533_v62 }
 0x5c6   : > { %1291 = vperm.xlu1 %2837, %v3465_v44  }
 0x5c8   : > { %2854 = vset.pattern.permute.xlu0 %v4555_v63 }
 0x5c9   : > { %1514 = vperm.xlu0 %2854, %v3497_v61  }
 0x5ca   : > { %1299 = vperm.xlu1 %2837, %v3471_v48  }
 0x5cd   : > { %2857 = vset.pattern.permute.xlu0 %v4539_v36 }
 0x5ce   : > { %2840 = vset.pattern.permute.xlu1 %v4527_v53  ;;  %1124 = vperm.xlu0 %2857, %v3497_v61  }
 0x5cf   : > { %1429 = vperm.xlu1 %2840, %v3471_v48  }
 0x5d2   : > { %2860 = vset.pattern.permute.xlu0 %v4535_v56 }
 0x5d3   : > { %2841 = vset.pattern.permute.xlu1 %v4555_v63  ;;  %1189 = vperm.xlu0 %2860, %v3497_v61  }
 0x5d4   : > { %1486 = vperm.xlu1 %2841, %v3465_v44  }
 0x5d7   : > { %2863 = vset.pattern.permute.xlu0 %v4552_v2 }
 0x5d8   : > { %1494 = vperm.xlu1 %2841, %v3471_v48   ;;  %1941 = vperm.xlu0 %2863, %v3465_v44  }
 0x5dc   : > { %2843 = vset.pattern.permute.xlu1 %v4543_v54  ;;  %2866 = vset.pattern.permute.xlu0 %v4541_v5 }
 0x5dd   : > { %1559 = vperm.xlu1 %2843, %v3471_v48   ;;  %1774 = vperm.xlu0 %2866, %v3497_v61  }
 0x5e1   : > { %2844 = vset.pattern.permute.xlu1 %v4531_v11  ;;  %2869 = vset.pattern.permute.xlu0 %v4537_v60 }
 0x5e2   : > { %1616 = vperm.xlu1 %2844, %v3465_v44   ;;  %1839 = vperm.xlu0 %2869, %v3497_v61  }
 0x5e6   : > { %1624 = vperm.xlu1 %2844, %v3471_v48   ;;  %2872 = vset.pattern.permute.xlu0 %v4545_v12 }
 0x5e7   : > { %1904 = vperm.xlu0 %2872, %v3497_v61  }
 0x5ea   : > { %2846 = vset.pattern.permute.xlu1 %v4548_v58 }
 0x5eb   : > { %1689 = vperm.xlu1 %2846, %v3471_v48   ;;  %2875 = vset.pattern.permute.xlu0 %v4552_v2 }
 0x5ec   : > { %1969 = vperm.xlu0 %2875, %v3497_v61  }
 0x5ef   : > { %2847 = vset.pattern.permute.xlu1 %v4541_v5 }
 0x5f0   : > { %1746 = vperm.xlu1 %2847, %v3465_v44   ;;  %2876 = vset.pattern.permute.xlu0 %v4547_v34 }
 0x5f1   : > { %964 = vperm.xlu0 %2876, %v3490_v59  }
 0x5f4   : > { %1754 = vperm.xlu1 %2847, %v3471_v48  }
 0x5f5   : > { %974 = vperm.xlu0 %2876, %v3539_v16  }
 0x5f8   : > { %2849 = vset.pattern.permute.xlu1 %v4537_v60 }
 0x5f9   : > { %1819 = vperm.xlu1 %2849, %v3471_v48   ;;  %2877 = vset.pattern.permute.xlu0 %v4550_v51 }
 0x5fa   : > { %1035 = vperm.xlu0 %2877, %v3490_v59  }
 0x5fd   : > { %2850 = vset.pattern.permute.xlu1 %v4545_v12 }
 0x5fe   : > { %1876 = vperm.xlu1 %2850, %v3465_v44   ;;  %2880 = vset.pattern.permute.xlu0 %v4539_v36  ;;  %v3605_v44 = vrot.slane %v3563_v25, %v3424_v8 }
 0x5ff   : > { %1108 = vperm.xlu0 %2880, %v3539_v16  }
 0x600   : > { %4610 = vst [vmem:[#allocation19_spill] sm:$0xff] %v3605_v44  ;;  %v1089_v4 = vmul.f32 %v3605_v44, %v3577_v29  ;;  %v4648_v44 = vmov 7  }
 0x602   : > { %1884 = vperm.xlu1 %2850, %v3471_v48   ;;  %v1091_v23 = vmul.f32 1.442695, %v1089_v4 }
 0x603   : > { %2881 = vset.pattern.permute.xlu0 %v4535_v56 }
 0x604   : > { %1165 = vperm.xlu0 %2881, %v3490_v59   ;;  %2995 = vpow2.f32 %v1091_v23  ;;  %v3660_v23 = vsub.s32 5, %v3353_v35 }
 0x605   : > { %2997 = vpow2.f32 %v1156_v14 }
 0x606   : > { %2852 = vset.pattern.permute.xlu1 %v4547_v34  ;;  %v3680_v50 = vrot.slane %v3563_v25, %v3660_v23 }
 0x607   : > { %1001 = vperm.xlu1 %2852, %v3554_v22  }
 0x608   : > { %2884 = vset.pattern.permute.xlu0 %v4557_v45  ;;  %4615 = vst [vmem:[#allocation24_spill] sm:$0xff] %v3680_v50 }
 0x609   : > { %1238 = vperm.xlu0 %2884, %v3539_v16  }
 0x60b   : > { %2853 = vset.pattern.permute.xlu1 %v4550_v51 }
 0x60c   : > { %1059 = vperm.xlu1 %2853, %v3497_v61  }
 0x60d   : > { %2885 = vset.pattern.permute.xlu0 %v4533_v62 }
 0x60e   : > { %1295 = vperm.xlu0 %2885, %v3490_v59  }
 0x610   : > { %1067 = vperm.xlu1 %2853, %v3554_v22  }
 0x612   : > { %2889 = vset.pattern.permute.xlu0 %v4527_v53 }
 0x613   : > { %1433 = vperm.xlu0 %2889, %v3539_v16  }
 0x614   : > { %2855 = vset.pattern.permute.xlu1 %v4555_v63 }
 0x615   : > { %1522 = vperm.xlu1 %2855, %v3554_v22  }
 0x617   : > { %2890 = vset.pattern.permute.xlu0 %v4555_v63 }
 0x618   : > { %1490 = vperm.xlu0 %2890, %v3490_v59  }
 0x619   : > { %2856 = vset.pattern.permute.xlu1 %v4543_v54 }
 0x61a   : > { %1579 = vperm.xlu1 %2856, %v3497_v61  }
 0x61c   : > { %2893 = vset.pattern.permute.xlu0 %v4543_v54  ;;  %v3601_v42 = vpop.permute.xlu0 %1096  ;;  %v960_v0 = vpop.permute.xlu1 %959 }
 0x61d   : > { %1563 = vperm.xlu0 %2893, %v3539_v16  }
 0x61e   : > { %1587 = vperm.xlu1 %2856, %v3554_v22  }
 0x621   : > { %2894 = vset.pattern.permute.xlu0 %v4531_v11  ;;  %v3616_v7 = vpop.permute.xlu0 %1226 }
 0x622   : > { %2858 = vset.pattern.permute.xlu1 %v4539_v36  ;;  %1620 = vperm.xlu0 %2894, %v3490_v59  }
 0x623   : > { %1132 = vperm.xlu1 %2858, %v3554_v22  }
 0x624   : > { %v970_v20 = vpop.permute.xlu1 %969 }
 0x625   : > { %v977_v26 = vsel %vm942_vm13, %v960_v0, %v970_v20  ;;  %v3645_v0 = vsub.s32 6, %v3353_v35 }
 0x626   : > { %v985_v31 = vmul.f32 %v3628_v21, %v977_v26  ;;  %2897 = vset.pattern.permute.xlu0 %v4548_v58  ;;  %v1357_v33 = vpop.permute.xlu0 %1356 }
 0x627   : > { %2859 = vset.pattern.permute.xlu1 %v4531_v11  ;;  %1693 = vperm.xlu0 %2897, %v3539_v16   ;;  %v3649_v26 = vrot.slane %v3611_v3, %v3645_v0  ;;  %v2994_v11 = vpop.eup %2993 }
 0x628   : > { %v3641_v39 = vadd.f32 %v985_v31, %v979_v30  ;;  %1644 = vperm.xlu1 %2859, %v3497_v61   ;;  %v3654_v30 = vrot.slane %v3563_v25, %v3637_v37 }
 0x629   : > { %v1032_v4 = vpop.permute.xlu1 %1031  ;;  %4612 = vst [vmem:[#allocation21_spill] sm:$0xff] %v3649_v26 }
 0x62a   : > { %v1365_v20 = vpop.permute.xlu0 %1364  ;;  %v1048_v17 = vmul.f32 %v2992_v1, %v3641_v39  ;;  %4613 = vst [vmem:[#allocation22_spill] sm:$0xff] %v3654_v30 }
 0x62b   : > { %v1371_v31 = vsel %vm942_vm13, %v1357_v33, %v1365_v20  ;;  %2898 = vset.pattern.permute.xlu0 %v4541_v5  ;;  %v1219_v20 = vmul.f32 %v3654_v30, %v3577_v29  ;;  %v778_v5 = vmul.f32 0.6931472, %v2994_v11  ;;  %v3711_v11 = vrot.slane %v3563_v25, %v3645_v0 }
 0x62c   : > { %v3663_v28 = vmul.f32 %v3649_v26, %v1371_v31  ;;  %1652 = vperm.xlu1 %2859, %v3554_v22   ;;  %1750 = vperm.xlu0 %2898, %v3490_v59   ;;  %v4643_v30 = vmov 4  }
 0x62d   : > { %v1040_v1 = vpop.permute.xlu1 %1039  ;;  %v1221_v62 = vmul.f32 1.442695, %v1219_v20  ;;  %v764_v20 = vmax.f32 %v3557_v24, 0.0  ;;  %4617 = vst [vmem:[#allocation26_spill] sm:$0xff] %v3711_v11 }
 0x62e   : > { %v1046_v33 = vsel %vm942_vm13, %v1032_v4, %v1040_v1  ;;  %v2996_v4 = vpop.eup %2995 }
 0x62f   : > { %v1054_v53 = vmul.f32 %v3669_v15, %v1046_v33  ;;  %v3676_v31 = vpop.permute.xlu0 %1421  ;;  %v3690_v33 = vrot.slane %v3611_v3, %v3424_v8  ;;  %2999 = vpow2.f32 %v1221_v62 }
 0x630   : > { %2861 = vset.pattern.permute.xlu1 %v4535_v56  ;;  %2901 = vset.pattern.permute.xlu0 %v4537_v60 }
 0x631   : > { %v3684_v14 = vadd.f32 %v1054_v53, %v1048_v17  ;;  %1197 = vperm.xlu1 %2861, %v3554_v22   ;;  %1823 = vperm.xlu0 %2901, %v3539_v16   ;;  %4616 = vst [vmem:[#allocation25_spill] sm:$0xff] %v3690_v33  ;;  %v1284_v53 = vmul.f32 %v3680_v50, %v3577_v29 }
 0x632   : > { %v1105_v1 = vpop.permute.xlu1 %1104 }
 0x633   : > { %v1111_v56 = vsel %vm942_vm13, %v3601_v42, %v1105_v1  ;;  %v1113_v60 = vmul.f32 %v2996_v4, %v3684_v14  ;;  %v2998_v42 = vpop.eup %2997  ;;  %v1286_v1 = vmul.f32 1.442695, %v1284_v53  ;;  %v3722_v53 = vrot.slane %v3611_v3, %v3427_v9 }
 0x634   : > { %v1119_v17 = vmul.f32 %v3690_v33, %v1111_v56  ;;  %v3699_v36 = vpop.permute.xlu0 %1551 }
 0x635   : > { %2862 = vset.pattern.permute.xlu1 %v4548_v58  ;;  %2902 = vset.pattern.permute.xlu0 %v4545_v12  ;;  %v3714_v12 = vsub.s32 7, %v3353_v35  ;;  %4618 = vst [vmem:[#allocation27_spill] sm:$0xff] %v3722_v53  ;;  %3001 = vpow2.f32 %v1286_v1 }
 0x636   : > { %v3703_v54 = vadd.f32 %v1119_v17, %v1113_v60  ;;  %1709 = vperm.xlu1 %2862, %v3497_v61   ;;  %1880 = vperm.xlu0 %2902, %v3490_v59   ;;  %v780_v60 = vadd.f32 %v778_v5, %v764_v20  ;;  %v1349_v5 = vmul.f32 %v3711_v11, %v3577_v29 }
 0x637   : > { %v1162_v4 = vpop.permute.xlu1 %1161  ;;  %v3802_v57 = vrot.slane %v3611_v3, %v3714_v12 }
 0x638   : > { %v1178_v56 = vmul.f32 %v2998_v42, %v3703_v54  ;;  %v3732_v42 = vrot.slane %v3563_v25, %v3714_v12  ;;  %v3735_v20 = vsel %vm782_vm14, %v3557_v24, %v780_v60  ;;  %v3747_v25 = vrot.slane %v3611_v3, %v3637_v37 }
 0x639   : > { %v3716_v17 = vpop.permute.xlu0 %1681  ;;  %v1351_v24 = vmul.f32 1.442695, %v1349_v5  ;;  %4627 = vst [vmem:[#allocation34_spill] sm:$0xff] %v3802_v57  ;;  %v3888_v50 = vrot.slane %v3735_v20, %v3660_v23 }
 0x63a   : > { %1717 = vperm.xlu1 %2862, %v3554_v22   ;;  %2905 = vset.pattern.permute.xlu0 %v4547_v34  ;;  %4619 = vst [vmem:[#allocation28_spill] sm:$0xff] %v3732_v42  ;;  %4620 = vst [vmem:[#allocation29_spill] sm:$0xff] %v3747_v25  ;;  %v1414_v60 = vmul.f32 %v3732_v42, %v3577_v29  ;;  %v4638_v42 = vmov 11  }
 0x63b   : > { %v1170_v62 = vpop.permute.xlu1 %1169  ;;  %1006 = vperm.xlu0 %2905, %v3596_v38   ;;  %3003 = vpow2.f32 %v1351_v24  ;;  %4641 = vst [vmem:[#allocation40_spill] sm:$0xff] %v3888_v50 }
 0x63c   : > { %v1176_v35 = vsel %vm942_vm13, %v1162_v4, %v1170_v62  ;;  %v3000_v4 = vpop.eup %2999 }
 0x63d   : > { %v1184_v34 = vmul.f32 %v3722_v53, %v1176_v35 }
 0x63e   : > { %2864 = vset.pattern.permute.xlu1 %v4552_v2  ;;  %v3741_v58 = vpop.permute.xlu0 %1811  ;;  %v1416_v2 = vmul.f32 1.442695, %v1414_v60 }
 0x63f   : > { %v3739_v1 = vadd.f32 %v1184_v34, %v1178_v56  ;;  %1949 = vperm.xlu1 %2864, %v3471_v48   ;;  %2906 = vset.pattern.permute.xlu0 %v4550_v51  ;;  %v3754_v34 = vrot.slane %v3735_v20, %v3430_v10 }
 0x640   : > { %v1235_v62 = vpop.permute.xlu1 %1234  ;;  %1063 = vperm.xlu0 %2906, %v3590_v46   ;;  %3005 = vpow2.f32 %v1416_v2  ;;  %v4626_v2 = vmov 12  }
 0x641   : > { %4621 = vst [vmem:[#allocation30_spill] sm:$0xff] %v3754_v34  ;;  %v1241_v48 = vsel %vm942_vm13, %v3616_v7, %v1235_v62  ;;  %v1243_v56 = vmul.f32 %v3000_v4, %v3739_v1  ;;  %v1479_v43 = vmul.f32 %v3754_v34, %v3577_v29  ;;  %v3002_v7 = vpop.eup %3001  ;;  %v4634_v34 = vmov 3  }
 0x642   : > { %v1249_v35 = vmul.f32 %v3747_v25, %v1241_v48  ;;  %v3774_v48 = vrot.slane %v3735_v20, %v3418_v6 }
 0x643   : > { %2865 = vset.pattern.permute.xlu1 %v4557_v45  ;;  %v3762_v51 = vpop.permute.xlu0 %991  ;;  %v1481_v24 = vmul.f32 1.442695, %v1479_v43  ;;  %v3792_v43 = vrot.slane %v3735_v20, %v3424_v8 }
 0x644   : > { %v3764_v5 = vadd.f32 %v1249_v35, %v1243_v56  ;;  %1254 = vperm.xlu1 %2865, %v3497_v61   ;;  %2909 = vset.pattern.permute.xlu0 %v4555_v63  ;;  %4622 = vst [vmem:[#allocation31_spill] sm:$0xff] %v3774_v48  ;;  %v3781_v35 = vrot.slane %v3611_v3, %v3660_v23  ;;  %v4624_v63 = vmov 9   ;;  %v4629_v3 = vmov 5  }
 0x645   : > { %v1292_v62 = vpop.permute.xlu1 %1291  ;;  %1526 = vperm.xlu0 %2909, %v3596_v38   ;;  %v1544_v45 = vmul.f32 %v3774_v48, %v3577_v29  ;;  %4625 = vst [vmem:[#allocation33_spill] sm:$0xff] %v3792_v43  ;;  %3007 = vpow2.f32 %v1481_v24 }
 0x646   : > { %v1308_v4 = vmul.f32 %v3002_v7, %v3764_v5  ;;  %4623 = vst [vmem:[#allocation32_spill] sm:$0xff] %v3781_v35 }
 0x647   : > { %v1546_v55 = vmul.f32 1.442695, %v1544_v45 }
 0x648   : > { %1262 = vperm.xlu1 %2865, %v3554_v22   ;;  %v3777_v56 = vpop.permute.xlu0 %1514 }
 0x649   : > { %v1300_v60 = vpop.permute.xlu1 %1299  ;;  %2910 = vset.pattern.permute.xlu0 %v4624_v63  ;;  %3009 = vpow2.f32 %v1546_v55 }
 0x64a   : > { %v1306_v7 = vsel %vm942_vm13, %v1292_v62, %v1300_v60  ;;  %1583 = vperm.xlu0 %2910, %v3590_v46   ;;  %v3004_v62 = vpop.eup %3003 }
 0x64b   : > { %v1314_v40 = vmul.f32 %v3781_v35, %v1306_v7  ;;  %v4628_v7 = vmov 2   ;;  %v3006_v48 = vpop.eup %3005 }
 0x64c   : > { %2867 = vset.pattern.permute.xlu1 %v4626_v2 }
 0x64d   : > { %v3795_v52 = vadd.f32 %v1314_v40, %v1308_v4  ;;  %1782 = vperm.xlu1 %2867, %v3554_v22   ;;  %v3798_v18 = vpop.permute.xlu0 %1124  ;;  %v1609_v4 = vmul.f32 %v3792_v43, %v3577_v29  ;;  %v4630_v43 = vmov 10  }
 0x64e   : > { %v1430_v60 = vpop.permute.xlu1 %1429  ;;  %2913 = vset.pattern.permute.xlu0 %v4628_v7 }
 0x64f   : > { %v1373_v47 = vmul.f32 %v3004_v62, %v3795_v52  ;;  %v1436_v40 = vsel %vm942_vm13, %v3676_v31, %v1430_v60  ;;  %1136 = vperm.xlu0 %2913, %v3596_v38   ;;  %v3822_v31 = vmul.f32 %v3735_v20, %v3453_v19 }
 0x650   : > { %v1444_v24 = vmul.f32 %v3802_v57, %v1436_v40  ;;  %v1611_v40 = vmul.f32 1.442695, %v1609_v4  ;;  %v3008_v57 = vpop.eup %3007 }
 0x651   : > { %v3814_v26 = vadd.f32 %v3663_v28, %v1373_v47  ;;  %2868 = vset.pattern.permute.xlu1 %v4629_v3  ;;  %v3829_v47 = vrot.slane %v3735_v20, %v3427_v9  ;;  %v3836_v19 = vrot.slane %v3822_v31, %v3430_v10  ;;  %v3850_v10 = vrot.slane %v3735_v20, %v3637_v37 }
 0x652   : > { %1319 = vperm.xlu1 %2868, %v3497_v61   ;;  %v3818_v45 = vpop.permute.xlu0 %1189  ;;  %3011 = vpow2.f32 %v1611_v40  ;;  %v3858_v25 = vrot.slane %v3822_v31, %v3418_v6  ;;  %v3874_v6 = vld [vmem:[%s4520_s4 + $0x10] sm:$0xff] }
 0x653   : > { %v1438_v62 = vmul.f32 %v3006_v48, %v3814_v26  ;;  %v1487_v60 = vpop.permute.xlu1 %1486  ;;  %2914 = vset.pattern.permute.xlu0 %v4630_v43  ;;  %4631 = vst [vmem:[#allocation35_spill] sm:$0xff] %v3829_v47  ;;  %4633 = vst [vmem:[#allocation37_spill] sm:$0xff] %v3836_v19  ;;  %v3010_v40 = vpop.eup %3009 }
 0x654   : > { %1648 = vperm.xlu0 %2914, %v3590_v46   ;;  %4635 = vst [vmem:[#allocation38_spill] sm:$0xff] %v3850_v10  ;;  %4637 = vst [vmem:[#allocation39_spill] sm:$0xff] %v3858_v25 }
 0x655   : > { %v3831_v28 = vadd.f32 %v1444_v24, %v1438_v62  ;;  %v1674_v24 = vmul.f32 %v3829_v47, %v3577_v29 }
 0x656   : > { %1327 = vperm.xlu1 %2868, %v3554_v22  }
 0x657   : > { %4632 = vst [vmem:[#allocation36_spill] sm:$0xff] %v3831_v28  ;;  %v1495_v55 = vpop.permute.xlu1 %1494  ;;  %v1503_v48 = vmul.f32 %v3008_v57, %v3831_v28  ;;  %v3841_v35 = vpop.permute.xlu0 %1941  ;;  %v4636_v57 = vmov 13   ;;  %v3906_v28 = vrot.slane %v3735_v20, %v3645_v0 }
 0x658   : > { %v1501_v4 = vsel %vm942_vm13, %v1487_v60, %v1495_v55  ;;  %2917 = vset.pattern.permute.xlu0 %v4634_v34 }
 0x659   : > { %v1509_v62 = vmul.f32 %v3836_v19, %v1501_v4  ;;  %1201 = vperm.xlu0 %2917, %v3596_v38   ;;  %v1676_v4 = vmul.f32 1.442695, %v1674_v24  ;;  %v4639_v24 = vmov 6   ;;  %4644 = vst [vmem:[#allocation42_spill] sm:$0xff] %v3906_v28 }
 0x65a   : > { %2870 = vset.pattern.permute.xlu1 %v4636_v57 }
 0x65b   : > { %1847 = vperm.xlu1 %2870, %v3554_v22   ;;  %v3854_v60 = vadd.f32 %v1509_v62, %v1503_v48  ;;  %v1739_v48 = vmul.f32 %v3850_v10, %v3577_v29  ;;  %3013 = vpow2.f32 %v1676_v4  ;;  %v4640_v10 = vmov 15  }
 0x65c   : > { %v1560_v55 = vpop.permute.xlu1 %1559  ;;  %v3860_v47 = vpop.permute.xlu0 %1774  ;;  %v3894_v4 = vrot.slane %v3822_v31, %v3424_v8  ;;  %v1025_v8 = vmul.f32 %v3586_v32, %v3874_v6 }
 0x65d   : > { %v1566_v19 = vsel %vm942_vm13, %v3699_v36, %v1560_v55  ;;  %2918 = vset.pattern.permute.xlu0 %v4638_v42  ;;  %v1568_v53 = vmul.f32 %v3010_v40, %v3854_v60  ;;  %v3012_v40 = vpop.eup %3011 }
 0x65e   : > { %v1574_v62 = vmul.f32 %v3858_v25, %v1566_v19  ;;  %1713 = vperm.xlu0 %2918, %v3590_v46   ;;  %v952_v19 = vmul.f32 %v3571_v27, %v3874_v6  ;;  %v1741_v25 = vmul.f32 1.442695, %v1739_v48  ;;  %4642 = vst [vmem:[#allocation41_spill] sm:$0xff] %v3894_v4 }
 0x65f   : > { %2871 = vset.pattern.permute.xlu1 %v4639_v24 }
 0x660   : > { %1384 = vperm.xlu1 %2871, %v3497_v61   ;;  %v3878_v36 = vadd.f32 %v1574_v62, %v1568_v53  ;;  %v955_v62 = vmul.f32 1.442695, %v952_v19  ;;  %3015 = vpow2.f32 %v1741_v25  ;;  %v4645_v25 = vmov 14  }
 0x661   : > { %v1617_v55 = vpop.permute.xlu1 %1616  ;;  %v3880_v11 = vpop.permute.xlu0 %1839 }
 0x662   : > { %2921 = vset.pattern.permute.xlu0 %v4640_v10  ;;  %v1633_v33 = vmul.f32 %v3012_v40, %v3878_v36  ;;  %v1804_v40 = vmul.f32 %v3888_v50, %v3577_v29  ;;  %3017 = vpow2.f32 %v955_v62  ;;  %v1869_v62 = vmul.f32 %v3906_v28, %v3577_v29 }
 0x663   : > { %1953 = vperm.xlu0 %2921, %v3539_v16   ;;  %v4649_v28 = vmov 1  }
 0x664   : > { %1392 = vperm.xlu1 %2871, %v3554_v22  }
 0x665   : > { %v1625_v53 = vpop.permute.xlu1 %1624  ;;  %v3014_v19 = vpop.eup %3013 }
 0x666   : > { %v1631_v27 = vsel %vm942_vm13, %v1617_v55, %v1625_v53  ;;  %v3898_v48 = vpop.permute.xlu0 %1904 }
 0x667   : > { %v1639_v15 = vmul.f32 %v3894_v4, %v1631_v27  ;;  %2922 = vset.pattern.permute.xlu0 %v4643_v30  ;;  %v3917_v27 = vrot.slane %v3822_v31, %v3427_v9  ;;  %v1806_v4 = vmul.f32 1.442695, %v1804_v40 }
 0x668   : > { %2873 = vset.pattern.permute.xlu1 %v4645_v25  ;;  %1258 = vperm.xlu0 %2922, %v3590_v46  }
 0x669   : > { %1912 = vperm.xlu1 %2873, %v3554_v22   ;;  %v3913_v55 = vadd.f32 %v1639_v15, %v1633_v33  ;;  %4646 = vst [vmem:[#allocation43_spill] sm:$0xff] %v3917_v27  ;;  %v1028_v15 = vmul.f32 1.442695, %v1025_v8  ;;  %3019 = vpow2.f32 %v1806_v4  ;;  %v3944_v4 = vrot.slane %v3822_v31, %v3637_v37 }
 0x66a   : > { %v1690_v53 = vpop.permute.xlu1 %1689 }
 0x66b   : > { %v1696_v32 = vsel %vm942_vm13, %v3716_v17, %v1690_v53  ;;  %v3922_v50 = vpop.permute.xlu0 %1969  ;;  %v1698_v13 = vmul.f32 %v3014_v19, %v3913_v55  ;;  %v3016_v17 = vpop.eup %3015  ;;  %v1871_v19 = vmul.f32 1.442695, %v1869_v62  ;;  %3021 = vpow2.f32 %v1028_v15 }
 0x66c   : > { %4647 = vst [vmem:[#allocation44_spill] sm:$0xff] %v3922_v50  ;;  %v1704_v33 = vmul.f32 %v3917_v27, %v1696_v32  ;;  %2925 = vset.pattern.permute.xlu0 %v4626_v2  ;;  %v3937_v32 = vrot.slane %v3735_v20, %v3714_v12 }
 0x66d   : > { %2874 = vset.pattern.permute.xlu1 %v4648_v44  ;;  %1786 = vperm.xlu0 %2925, %v3596_v38   ;;  %3023 = vpow2.f32 %v1871_v19 }
 0x66e   : > { %1449 = vperm.xlu1 %2874, %v3497_v61   ;;  %v3932_v9 = vadd.f32 %v1704_v33, %v1698_v13  ;;  %v3018_v61 = vpop.eup %3017  ;;  %v1934_v20 = vmul.f32 %v3937_v32, %v3577_v29 }
 0x66f   : > { %v1747_v40 = vpop.permute.xlu1 %1746  ;;  %v980_v50 = vmul.f32 0.0, %v3018_v61 }
 0x670   : > { %v965_v53 = vpop.permute.xlu0 %964  ;;  %v1763_v8 = vmul.f32 %v3016_v17, %v3932_v9  ;;  %v1936_v61 = vmul.f32 1.442695, %v1934_v20 }
 0x671   : > { %2926 = vset.pattern.permute.xlu0 %v4629_v3 }
 0x672   : > { %1457 = vperm.xlu1 %2874, %v3554_v22   ;;  %1323 = vperm.xlu0 %2926, %v3590_v46   ;;  %3025 = vpow2.f32 %v1936_v61 }
 0x673   : > { %v1755_v13 = vpop.permute.xlu1 %1754 }
 0x674   : > { %v1761_v62 = vsel %vm942_vm13, %v1747_v40, %v1755_v13  ;;  %v975_v15 = vpop.permute.xlu0 %974  ;;  %v3020_v40 = vpop.eup %3019 }
 0x675   : > { %v1769_v33 = vmul.f32 %v3944_v4, %v1761_v62  ;;  %v978_v17 = vsel %vm942_vm13, %v965_v53, %v975_v15  ;;  %v3964_v53 = vrot.slane %v3822_v31, %v3660_v23 }
 0x676   : > { %v986_v27 = vmul.f32 %v3628_v21, %v978_v17  ;;  %2878 = vset.pattern.permute.xlu1 %v4649_v28  ;;  %2929 = vset.pattern.permute.xlu0 %v4636_v57  ;;  %v3022_v21 = vpop.eup %3021 }
 0x677   : > { %1043 = vperm.xlu1 %2878, %v3539_v16   ;;  %1851 = vperm.xlu0 %2929, %v3596_v38   ;;  %v3958_v37 = vadd.f32 %v1769_v33, %v1763_v8  ;;  %v3024_v23 = vpop.eup %3023  ;;  %v3985_v33 = vrot.slane %v3822_v31, %v3645_v0 }
 0x678   : > { %v3960_v29 = vadd.f32 %v986_v27, %v980_v50  ;;  %v1820_v19 = vpop.permute.xlu1 %1819 }
 0x679   : > { %v1826_v13 = vsel %vm942_vm13, %v3741_v58, %v1820_v19  ;;  %v1828_v62 = vmul.f32 %v3020_v40, %v3958_v37 }
 0x67a   : > { %v1834_v15 = vmul.f32 %v3964_v53, %v1826_v13  ;;  %v3972_v8 = vmul.f32 %v3022_v21, %v3960_v29 }
 0x67b   : > { %2879 = vset.pattern.permute.xlu1 %v4628_v7  ;;  %2930 = vset.pattern.permute.xlu0 %v4639_v24 }
 0x67c   : > { %1100 = vperm.xlu1 %2879, %v3490_v59   ;;  %1388 = vperm.xlu0 %2930, %v3590_v46   ;;  %v3978_v50 = vadd.f32 %v1834_v15, %v1828_v62  ;;  %v3026_v61 = vpop.eup %3025 }
 0x67d   : > { %v1877_v58 = vpop.permute.xlu1 %1876 }
 0x67e   : > { %v1893_v27 = vmul.f32 %v3024_v23, %v3978_v50 }
 0x680   : > { %2882 = vset.pattern.permute.xlu1 %v4634_v34  ;;  %2933 = vset.pattern.permute.xlu0 %v4645_v25 }
 0x681   : > { %v1885_v20 = vpop.permute.xlu1 %1884  ;;  %1173 = vperm.xlu1 %2882, %v3539_v16   ;;  %1916 = vperm.xlu0 %2933, %v3596_v38  }
 0x682   : > { %v1891_v17 = vsel %vm942_vm13, %v1877_v58, %v1885_v20 }
 0x683   : > { %v1899_v40 = vmul.f32 %v3985_v33, %v1891_v17  ;;  %v4650_v17 = vmov 8  }
 0x685   : > { %2883 = vset.pattern.permute.xlu1 %v4643_v30  ;;  %2934 = vset.pattern.permute.xlu0 %v4648_v44  ;;  %v3994_v19 = vadd.f32 %v1899_v40, %v1893_v27 }
 0x686   : > { %v1002_v21 = vpop.permute.xlu1 %1001  ;;  %1230 = vperm.xlu1 %2883, %v3490_v59   ;;  %1453 = vperm.xlu0 %2934, %v3590_v46  }
 0x687   : > { %v1009_v0 = vsel %vm942_vm13, %v3762_v51, %v1002_v21  ;;  %v1958_v13 = vmul.f32 %v3026_v61, %v3994_v19 }
 0x688   : > { %v4003_v62 = vmul.f32 %v1009_v0, %v3641_v39 }
 0x68a   : > { %2886 = vset.pattern.permute.xlu1 %v4629_v3  ;;  %2937 = vset.pattern.permute.xlu0 %v4640_v10 }
 0x68b   : > { %1303 = vperm.xlu1 %2886, %v3539_v16   ;;  %v1060_v15 = vpop.permute.xlu1 %1059  ;;  %1981 = vperm.xlu0 %2937, %v3596_v38  }
 0x68f   : > { %2887 = vset.pattern.permute.xlu1 %v4639_v24  ;;  %v1068_v23 = vpop.permute.xlu1 %1067  ;;  %446 = vrot.lane.b32.xlu0 %v3382_v49, %s3185_s19 }
 0x690   : > { %v1074_v51 = vsel %vm942_vm13, %v1060_v15, %v1068_v23  ;;  %1360 = vperm.xlu1 %2887, %v3490_v59  }
 0x691   : > { %v4016_v39 = vmul.f32 %v1074_v51, %v3684_v14 }
 0x694   : > { %1368 = vperm.xlu1 %2887, %v3539_v16   ;;  %v1523_v58 = vpop.permute.xlu1 %1522 }
 0x695   : > { %v1529_v27 = vsel %vm942_vm13, %v3777_v56, %v1523_v58 }
 0x696   : > { %v4023_v20 = vmul.f32 %v1529_v27, %v3854_v60 }
 0x698   : > { %2888 = vset.pattern.permute.xlu1 %v4648_v44 }
 0x699   : > { %1425 = vperm.xlu1 %2888, %v3490_v59   ;;  %v1580_v49 = vpop.permute.xlu1 %1579 }
 0x69d   : > { %2891 = vset.pattern.permute.xlu1 %v4650_v17  ;;  %v1588_v40 = vpop.permute.xlu1 %1587 }
 0x69e   : > { %v1594_v14 = vsel %vm942_vm13, %v1580_v49, %v1588_v40  ;;  %1498 = vperm.xlu1 %2891, %v3539_v16  }
 0x69f   : > { %v4032_v61 = vmul.f32 %v1594_v14, %v3878_v36 }
 0x6a2   : > { %2892 = vset.pattern.permute.xlu1 %v4624_v63  ;;  %v1133_v56 = vpop.permute.xlu1 %1132 }
 0x6a3   : > { %v1139_v60 = vsel %vm942_vm13, %v3798_v18, %v1133_v56  ;;  %1555 = vperm.xlu1 %2892, %v3490_v59   ;;  %v4651_v56 = vmov 0  }
 0x6a4   : > { %v4040_v21 = vmul.f32 %v1139_v60, %v3703_v54 }
 0x6a7   : > { %2895 = vset.pattern.permute.xlu1 %v4630_v43  ;;  %v1645_v0 = vpop.permute.xlu1 %1644 }
 0x6a8   : > { %1628 = vperm.xlu1 %2895, %v3539_v16  }
 0x6ab   : > { %v1653_v15 = vpop.permute.xlu1 %1652 }
 0x6ac   : > { %v1659_v36 = vsel %vm942_vm13, %v1645_v0, %v1653_v15  ;;  %2896 = vset.pattern.permute.xlu1 %v4638_v42 }
 0x6ad   : > { %v4048_v23 = vmul.f32 %v1659_v36, %v3913_v55  ;;  %1685 = vperm.xlu1 %2896, %v3490_v59   ;;  %v1036_v36 = vpop.permute.xlu0 %1035 }
 0x6b0   : > { %v1198_v18 = vpop.permute.xlu1 %1197 }
 0x6b1   : > { %v1204_v54 = vsel %vm942_vm13, %v3818_v45, %v1198_v18  ;;  %2899 = vset.pattern.permute.xlu1 %v4626_v2  ;;  %v4070_v45 = vrot.slane %v3822_v31, %v3714_v12 }
 0x6b2   : > { %v4056_v51 = vmul.f32 %v1204_v54, %v3739_v1  ;;  %1758 = vperm.xlu1 %2899, %v3539_v16  }
 0x6b5   : > { %v1710_v58 = vpop.permute.xlu1 %1709 }
 0x6b6   : > { %2900 = vset.pattern.permute.xlu1 %v4636_v57 }
 0x6b7   : > { %1815 = vperm.xlu1 %2900, %v3490_v59  }
 0x6b9   : > { %v1718_v55 = vpop.permute.xlu1 %1717 }
 0x6ba   : > { %v1724_v27 = vsel %vm942_vm13, %v1710_v58, %v1718_v55 }
 0x6bb   : > { %v4064_v49 = vmul.f32 %v1724_v27, %v3932_v9  ;;  %2903 = vset.pattern.permute.xlu1 %v4645_v25 }
 0x6bc   : > { %1888 = vperm.xlu1 %2903, %v3539_v16  }
 0x6be   : > { %v1950_v1 = vpop.permute.xlu1 %1949 }
 0x6bf   : > { %v1956_v40 = vsel %vm942_vm13, %v3841_v35, %v1950_v1  ;;  %v4653_v1 = vld [vmem:[#allocation20_spill] sm:$0xff] }
 0x6c0   : > { %v1964_v14 = vmul.f32 %v4070_v45, %v1956_v40  ;;  %2904 = vset.pattern.permute.xlu1 %v4651_v56  ;;  %v1155_v40 = vmul.f32 %v4653_v1, %v3874_v6  ;;  %v4654_v56 = vld [vmem:[#allocation36_spill] sm:$0xff] }
 0x6c1   : > { %996 = vperm.xlu1 %2904, %v3590_v46  }
 0x6c2   : > { %v4078_v9 = vadd.f32 %v1964_v14, %v1958_v13 }
 0x6c3   : > { %v1255_v60 = vpop.permute.xlu1 %1254 }
 0x6c5   : > { %2907 = vset.pattern.permute.xlu1 %v4649_v28 }
 0x6c6   : > { %1071 = vperm.xlu1 %2907, %v3596_v38  }
 0x6c7   : > { %v1263_v16 = vpop.permute.xlu1 %1262 }
 0x6c8   : > { %v1269_v12 = vsel %vm942_vm13, %v1255_v60, %v1263_v16 }
 0x6c9   : > { %v4085_v31 = vmul.f32 %v1269_v12, %v3764_v5 }
 0x6ca   : > { %2908 = vset.pattern.permute.xlu1 %v4650_v17 }
 0x6cb   : > { %1518 = vperm.xlu1 %2908, %v3590_v46  }
 0x6cc   : > { %v1783_v35 = vpop.permute.xlu1 %1782 }
 0x6cd   : > { %v1789_v13 = vsel %vm942_vm13, %v3860_v47, %v1783_v35 }
 0x6ce   : > { %v4093_v28 = vmul.f32 %v1789_v13, %v3958_v37 }
 0x6cf   : > { %2911 = vset.pattern.permute.xlu1 %v4624_v63 }
 0x6d0   : > { %1591 = vperm.xlu1 %2911, %v3596_v38  }
 0x6d1   : > { %v1320_v0 = vpop.permute.xlu1 %1319 }
 0x6d4   : > { %2912 = vset.pattern.permute.xlu1 %v4628_v7 }
 0x6d5   : > { %v1328_v5 = vpop.permute.xlu1 %1327  ;;  %1128 = vperm.xlu1 %2912, %v3590_v46  }
 0x6d6   : > { %v1334_v17 = vsel %vm942_vm13, %v1320_v0, %v1328_v5  ;;  %v4656_v5 = vld [vmem:[#allocation23_spill] sm:$0xff] }
 0x6d7   : > { %v4102_v15 = vmul.f32 %v1334_v17, %v3795_v52  ;;  %v4657_v17 = vld [vmem:[#allocation24_spill] sm:$0xff] }
 0x6d9   : > { %2915 = vset.pattern.permute.xlu1 %v4630_v43 }
 0x6da   : > { %v1848_v47 = vpop.permute.xlu1 %1847  ;;  %1656 = vperm.xlu1 %2915, %v3596_v38  }
 0x6db   : > { %v1854_v63 = vsel %vm942_vm13, %v3880_v11, %v1848_v47  ;;  %v1109_v11 = vpop.permute.xlu0 %1108  ;;  %v1285_v47 = vmul.f32 %v4657_v17, %v3874_v6 }
 0x6dc   : > { %v4110_v7 = vmul.f32 %v1854_v63, %v3978_v50 }
 0x6de   : > { %2916 = vset.pattern.permute.xlu1 %v4634_v34 }
 0x6df   : > { %v1385_v37 = vpop.permute.xlu1 %1384  ;;  %1193 = vperm.xlu1 %2916, %v3590_v46   ;;  %v1166_v55 = vpop.permute.xlu0 %1165 }
 0x6e3   : > { %v1393_v52 = vpop.permute.xlu1 %1392  ;;  %2919 = vset.pattern.permute.xlu1 %v4638_v42  ;;  %v4652_v42 = vld [vmem:[#allocation19_spill] sm:$0xff] }
 0x6e4   : > { %v1399_v43 = vsel %vm942_vm13, %v1385_v37, %v1393_v52  ;;  %1721 = vperm.xlu1 %2919, %v3596_v38   ;;  %v1090_v54 = vmul.f32 %v4652_v42, %v3874_v6  ;;  %v4659_v42 = vld [vmem:[#allocation26_spill] sm:$0xff] }
 0x6e5   : > { %v4119_v18 = vmul.f32 %v1399_v43, %v3814_v26  ;;  %v1288_v43 = vmul.f32 1.442695, %v1285_v47 }
 0x6e6   : > { %v1093_v26 = vmul.f32 1.442695, %v1090_v54  ;;  %v1350_v54 = vmul.f32 %v4659_v42, %v3874_v6 }
 0x6e8   : > { %v1913_v50 = vpop.permute.xlu1 %1912  ;;  %2920 = vset.pattern.permute.xlu1 %v4640_v10  ;;  %3027 = vpow2.f32 %v1093_v26 }
 0x6e9   : > { %v1919_v34 = vsel %vm942_vm13, %v3898_v48, %v1913_v50  ;;  %1945 = vperm.xlu1 %2920, %v3490_v59   ;;  %v1239_v48 = vpop.permute.xlu0 %1238  ;;  %v4658_v50 = vld [vmem:[#allocation25_spill] sm:$0xff] }
 0x6ea   : > { %v4129_v58 = vmul.f32 %v1919_v34, %v3994_v19  ;;  %v1158_v19 = vmul.f32 1.442695, %v1155_v40 }
 0x6ec   : > { %3029 = vpow2.f32 %v1158_v19 }
 0x6ed   : > { %v1450_v27 = vpop.permute.xlu1 %1449  ;;  %2923 = vset.pattern.permute.xlu1 %v4643_v30  ;;  %v4655_v30 = vld [vmem:[#allocation22_spill] sm:$0xff]  ;;  %v1296_v0 = vpop.permute.xlu0 %1295 }
 0x6ee   : > { %1266 = vperm.xlu1 %2923, %v3596_v38   ;;  %v1220_v16 = vmul.f32 %v4655_v30, %v3874_v6 }
 0x6f0   : > { %v1223_v13 = vmul.f32 1.442695, %v1220_v16 }
 0x6f1   : > { %v1458_v14 = vpop.permute.xlu1 %1457 }
 0x6f2   : > { %v1464_v59 = vsel %vm942_vm13, %v1450_v27, %v1458_v14  ;;  %2924 = vset.pattern.permute.xlu1 %v4626_v2  ;;  %v3028_v37 = vpop.eup %3027  ;;  %3031 = vpow2.f32 %v1223_v13  ;;  %v4660_v14 = vld [vmem:[#allocation27_spill] sm:$0xff]  ;;  %v4662_v13 = vld [vmem:[#allocation29_spill] sm:$0xff] }
 0x6f3   : > { %v4139_v60 = vmul.f32 %v1464_v59, %v4654_v56  ;;  %1778 = vperm.xlu1 %2924, %v3590_v46   ;;  %3033 = vpow2.f32 %v1288_v43  ;;  %v4664_v43 = vld [vmem:[#allocation32_spill] sm:$0xff] }
 0x6f6   : > { %v1044_v12 = vpop.permute.xlu1 %1043  ;;  %v3030_v26 = vpop.eup %3029 }
 0x6f7   : > { %v1047_v35 = vsel %vm942_vm13, %v1036_v36, %v1044_v12  ;;  %2927 = vset.pattern.permute.xlu1 %v4629_v3 }
 0x6f8   : > { %v1055_v2 = vmul.f32 %v4656_v5, %v1047_v35  ;;  %1331 = vperm.xlu1 %2927, %v3596_v38  }
 0x6fa   : > { %v4152_v63 = vadd.f32 %v1055_v2, %v3972_v8  ;;  %v1434_v8 = vpop.permute.xlu0 %1433 }
 0x6fb   : > { %v1101_v52 = vpop.permute.xlu1 %1100 }
 0x6fc   : > { %v1112_v36 = vsel %vm942_vm13, %v1101_v52, %v1109_v11  ;;  %v1114_v3 = vmul.f32 %v3028_v37, %v4152_v63  ;;  %2928 = vset.pattern.permute.xlu1 %v4636_v57  ;;  %v1353_v57 = vmul.f32 1.442695, %v1350_v54  ;;  %v3032_v30 = vpop.eup %3031 }
 0x6fd   : > { %v1120_v34 = vmul.f32 %v4658_v50, %v1112_v36  ;;  %1843 = vperm.xlu1 %2928, %v3590_v46   ;;  %v3034_v17 = vpop.eup %3033 }
 0x6fe   : > { %v1491_v19 = vpop.permute.xlu0 %1490  ;;  %3035 = vpow2.f32 %v1353_v57 }
 0x6ff   : > { %v4162_v27 = vadd.f32 %v1120_v34, %v1114_v3 }
 0x700   : > { %v1174_v1 = vpop.permute.xlu1 %1173 }
 0x701   : > { %v1177_v11 = vsel %vm942_vm13, %v1166_v55, %v1174_v1  ;;  %v1179_v40 = vmul.f32 %v3030_v26, %v4162_v27  ;;  %2931 = vset.pattern.permute.xlu1 %v4639_v24  ;;  %v4661_v24 = vld [vmem:[#allocation28_spill] sm:$0xff] }
 0x702   : > { %v1185_v59 = vmul.f32 %v4660_v14, %v1177_v11  ;;  %1396 = vperm.xlu1 %2931, %v3596_v38   ;;  %v1415_v35 = vmul.f32 %v4661_v24, %v3874_v6  ;;  %v1564_v47 = vpop.permute.xlu0 %1563  ;;  %v4666_v14 = vld [vmem:[#allocation21_spill] sm:$0xff] }
 0x704   : > { %v4170_v56 = vadd.f32 %v1185_v59, %v1179_v40  ;;  %v1418_v52 = vmul.f32 1.442695, %v1415_v35 }
 0x705   : > { %v1231_v16 = vpop.permute.xlu1 %1230 }
 0x706   : > { %v1242_v12 = vsel %vm942_vm13, %v1231_v16, %v1239_v48  ;;  %v1244_v55 = vmul.f32 %v3032_v30, %v4170_v56  ;;  %2932 = vset.pattern.permute.xlu1 %v4645_v25  ;;  %v4663_v25 = vld [vmem:[#allocation30_spill] sm:$0xff]  ;;  %3037 = vpow2.f32 %v1418_v52  ;;  %v1621_v1 = vpop.permute.xlu0 %1620  ;;  %v4667_v30 = vld [vmem:[#allocation33_spill] sm:$0xff] }
 0x707   : > { %v1250_v5 = vmul.f32 %v4662_v13, %v1242_v12  ;;  %1908 = vperm.xlu1 %2932, %v3590_v46   ;;  %v1480_v3 = vmul.f32 %v4663_v25, %v3874_v6  ;;  %v4668_v13 = vld [vmem:[#allocation13_spill] sm:$0xff] }
 0x708   : > { %v3036_v42 = vpop.eup %3035 }
 0x709   : > { %v4180_v2 = vadd.f32 %v1250_v5, %v1244_v55  ;;  %v1483_v26 = vmul.f32 1.442695, %v1480_v3 }
 0x70a   : > { %v1304_v37 = vpop.permute.xlu1 %1303  ;;  %v1694_v16 = vpop.permute.xlu0 %1693 }
 0x70b   : > { %v1307_v48 = vsel %vm942_vm13, %v1296_v0, %v1304_v37  ;;  %v1309_v36 = vmul.f32 %v3034_v17, %v4180_v2  ;;  %2935 = vset.pattern.permute.xlu1 %v4648_v44  ;;  %v4665_v44 = vld [vmem:[#allocation31_spill] sm:$0xff]  ;;  %3039 = vpow2.f32 %v1483_v26  ;;  %v4669_v17 = vld [vmem:[#allocation34_spill] sm:$0xff] }
 0x70c   : > { %v1315_v50 = vmul.f32 %v4664_v43, %v1307_v48  ;;  %1461 = vperm.xlu1 %2935, %v3596_v38   ;;  %v1545_v11 = vmul.f32 %v4665_v44, %v3874_v6  ;;  %v4670_v37 = vld [vmem:[#allocation35_spill] sm:$0xff]  ;;  %v4672_v26 = vld [vmem:[#allocation38_spill] sm:$0xff] }
 0x70d   : > { %v1675_v52 = vmul.f32 %v4670_v37, %v3874_v6 }
 0x70e   : > { %v4190_v34 = vadd.f32 %v1315_v50, %v1309_v36  ;;  %v1548_v57 = vmul.f32 1.442695, %v1545_v11  ;;  %v1751_v48 = vpop.permute.xlu0 %1750 }
 0x70f   : > { %v1361_v54 = vpop.permute.xlu1 %1360  ;;  %v1678_v50 = vmul.f32 1.442695, %v1675_v52  ;;  %v4676_v52 = vld [vmem:[#allocation42_spill] sm:$0xff] }
 0x710   : > { %2936 = vset.pattern.permute.xlu1 %v4640_v10  ;;  %v1374_v0 = vmul.f32 %v3036_v42, %v4190_v34  ;;  %v1610_v10 = vmul.f32 %v4667_v30, %v3874_v6  ;;  %v3038_v55 = vpop.eup %3037  ;;  %3041 = vpow2.f32 %v1548_v57  ;;  %v4671_v42 = vld [vmem:[#allocation37_spill] sm:$0xff] }
 0x711   : > { %1973 = vperm.xlu1 %2936, %v3590_v46  }
 0x712   : > { %v1613_v5 = vmul.f32 1.442695, %v1610_v10  ;;  %v4674_v10 = vld [vmem:[#allocation40_spill] sm:$0xff] }
 0x713   : > { %v1369_v40 = vpop.permute.xlu1 %1368 }
 0x714   : > { %v1372_v38 = vsel %vm942_vm13, %v1361_v54, %v1369_v40  ;;  %3043 = vpow2.f32 %v1613_v5  ;;  %v1824_v40 = vpop.permute.xlu0 %1823 }
 0x715   : > { %v1380_v59 = vmul.f32 %v4666_v14, %v1372_v38  ;;  %1977 = vperm.xlu1 %2936, %v3554_v22   ;;  %v3040_v25 = vpop.eup %3039  ;;  %3045 = vpow2.f32 %v1678_v50 }
 0x717   : > { %v4203_v12 = vadd.f32 %v1380_v59, %v1374_v0  ;;  %v1740_v0 = vmul.f32 %v4672_v26, %v3874_v6  ;;  %v4673_v59 = vld [vmem:[#allocation39_spill] sm:$0xff] }
 0x718   : > { %v1426_v24 = vpop.permute.xlu1 %1425  ;;  %v4677_v26 = vld [vmem:[#allocation43_spill] sm:$0xff] }
 0x719   : > { %v1437_v46 = vsel %vm942_vm13, %v1426_v24, %v1434_v8  ;;  %v1439_v35 = vmul.f32 %v3038_v55, %v4203_v12  ;;  %444 = vrot.lane.b32.xlu1 %v4668_v13, %s3185_s19  ;;  %v1805_v55 = vmul.f32 %v4674_v10, %v3874_v6  ;;  %v1881_v13 = vpop.permute.xlu0 %1880 }
 0x71a   : > { %v1445_v22 = vmul.f32 %v4669_v17, %v1437_v46  ;;  %v3042_v11 = vpop.eup %3041 }
 0x71c   : > { %v4213_v36 = vadd.f32 %v1445_v22, %v1439_v35  ;;  %v4675_v22 = vld [vmem:[#allocation41_spill] sm:$0xff] }
 0x71d   : > { %v1499_v3 = vpop.permute.xlu1 %1498 }
 0x71e   : > { %v1502_v8 = vsel %vm942_vm13, %v1491_v19, %v1499_v3  ;;  %v1504_v43 = vmul.f32 %v3040_v25, %v4213_v36  ;;  %v1743_v19 = vmul.f32 1.442695, %v1740_v0  ;;  %v3044_v46 = vpop.eup %3043  ;;  %v1870_v25 = vmul.f32 %v4676_v52, %v3874_v6 }
 0x71f   : > { %v1510_v54 = vmul.f32 %v4671_v42, %v1502_v8  ;;  %v3046_v8 = vpop.eup %3045 }
 0x720   : > { %3047 = vpow2.f32 %v1743_v19 }
 0x721   : > { %v4221_v44 = vadd.f32 %v1510_v54, %v1504_v43  ;;  %v1007_v43 = vpop.permute.xlu0 %1006 }
 0x722   : > { %v1556_v38 = vpop.permute.xlu1 %1555 }
 0x723   : > { %v1567_v57 = vsel %vm942_vm13, %v1556_v38, %v1564_v47  ;;  %v1569_v14 = vmul.f32 %v3042_v11, %v4221_v44  ;;  %v1808_v47 = vmul.f32 1.442695, %v1805_v55  ;;  %v1935_v11 = vmul.f32 %v3937_v32, %v3874_v6 }
 0x724   : > { %v1575_v30 = vmul.f32 %v4673_v59, %v1567_v57 }
 0x725   : > { %3049 = vpow2.f32 %v1808_v47  ;;  %v1064_v19 = vpop.permute.xlu0 %1063 }
 0x726   : > { %v4229_v24 = vadd.f32 %v1575_v30, %v1569_v14 }
 0x727   : > { %v1629_v35 = vpop.permute.xlu1 %1628 }
 0x728   : > { %v1632_v5 = vsel %vm942_vm13, %v1621_v1, %v1629_v35  ;;  %v1634_v17 = vmul.f32 %v3044_v46, %v4229_v24  ;;  %v1873_v1 = vmul.f32 1.442695, %v1870_v25 }
 0x729   : > { %v1640_v37 = vmul.f32 %v4675_v22, %v1632_v5  ;;  %v1527_v5 = vpop.permute.xlu0 %1526 }
 0x72a   : > { %v3048_v57 = vpop.eup %3047  ;;  %3051 = vpow2.f32 %v1873_v1 }
 0x72b   : > { %v4237_v3 = vadd.f32 %v1640_v37, %v1634_v17 }
 0x72c   : > { %v1686_v50 = vpop.permute.xlu1 %1685 }
 0x72d   : > { %v1697_v42 = vsel %vm942_vm13, %v1686_v50, %v1694_v16  ;;  %v1699_v54 = vmul.f32 %v3046_v8, %v4237_v3  ;;  %v1938_v16 = vmul.f32 1.442695, %v1935_v11  ;;  %v1584_v25 = vpop.permute.xlu0 %1583 }
 0x72e   : > { %v1705_v0 = vmul.f32 %v4677_v26, %v1697_v42 }
 0x72f   : > { %v3050_v46 = vpop.eup %3049  ;;  %3053 = vpow2.f32 %v1938_v16 }
 0x730   : > { %v4245_v38 = vadd.f32 %v1705_v0, %v1699_v54 }
 0x731   : > { %v1759_v14 = vpop.permute.xlu1 %1758  ;;  %v1137_v1 = vpop.permute.xlu0 %1136 }
 0x732   : > { %v1762_v59 = vsel %vm942_vm13, %v1751_v48, %v1759_v14  ;;  %v1764_v30 = vmul.f32 %v3048_v57, %v4245_v38 }
 0x733   : > { %v1770_v10 = vmul.f32 %v3944_v4, %v1762_v59 }
 0x734   : > { %v3052_v48 = vpop.eup %3051 }
 0x735   : > { %v4251_v55 = vadd.f32 %v1770_v10, %v1764_v30  ;;  %v1649_v59 = vpop.permute.xlu0 %1648 }
 0x736   : > { %v1816_v35 = vpop.permute.xlu1 %1815 }
 0x737   : > { %v1827_v6 = vsel %vm942_vm13, %v1816_v35, %v1824_v40  ;;  %v1829_v32 = vmul.f32 %v3050_v46, %v4251_v55 }
 0x738   : > { %v1835_v17 = vmul.f32 %v3964_v53, %v1827_v6 }
 0x739   : > { %v3054_v40 = vpop.eup %3053 }
 0x73a   : > { %v4257_v47 = vadd.f32 %v1835_v17, %v1829_v32  ;;  %v1202_v32 = vpop.permute.xlu0 %1201 }
 0x73b   : > { %v1889_v22 = vpop.permute.xlu1 %1888 }
 0x73c   : > { %v1892_v4 = vsel %vm942_vm13, %v1881_v13, %v1889_v22  ;;  %v1894_v37 = vmul.f32 %v3052_v48, %v4257_v47 }
 0x73d   : > { %v1900_v52 = vmul.f32 %v3985_v33, %v1892_v4 }
 0x73f   : > { %v4263_v8 = vadd.f32 %v1900_v52, %v1894_v37 }
 0x740   : > { %v997_v50 = vpop.permute.xlu1 %996 }
 0x741   : > { %v1010_v42 = vsel %vm942_vm13, %v997_v50, %v1007_v43  ;;  %v4268_v53 = vmul.f32 %v3054_v40, %v4263_v8 }
 0x742   : > { %v1012_v54 = vmul.f32 %v1010_v42, %v3960_v29 }
 0x744   : > { %v1013_v13 = vadd.f32 %v1012_v54, %v4003_v62 }
 0x745   : > { %v1072_v26 = vpop.permute.xlu1 %1071 }
 0x746   : > { %v1014_v0 = vrot.slane %v1013_v13, 4  ;;  %v1075_v33 = vsel %vm942_vm13, %v1064_v19, %v1072_v26 }
 0x747   : > { %v1077_v11 = vmul.f32 %v1075_v33, %v4152_v63 }
 0x748   : > { %v1015_v57 = vadd.f32 %v1014_v0, %v1013_v13 }
 0x749   : > { %v1078_v14 = vadd.f32 %v1077_v11, %v4016_v39 }
 0x74a   : > { %v1016_v43 = vrot.slane %v1015_v57, 2  ;;  %v1519_v30 = vpop.permute.xlu1 %1518 }
 0x74b   : > { %v1079_v16 = vrot.slane %v1078_v14, 4  ;;  %v1530_v29 = vsel %vm942_vm13, %v1519_v30, %v1527_v5 }
 0x74c   : > { %v1532_v10 = vmul.f32 %v1530_v29, %v4221_v44  ;;  %v1017_v62 = vadd.f32 %v1016_v43, %v1015_v57  ;;  %v1714_v44 = vpop.permute.xlu0 %1713 }
 0x74d   : > { %v1080_v46 = vadd.f32 %v1079_v16, %v1078_v14 }
 0x74e   : > { %v1533_v35 = vadd.f32 %v1532_v10, %v4023_v20  ;;  %v1018_v17 = vrot.slane %v1017_v62, 1 }
 0x74f   : > { %v1081_v6 = vrot.slane %v1080_v46, 2  ;;  %v1592_v19 = vpop.permute.xlu1 %1591 }
 0x750   : > { %v1534_v63 = vrot.slane %v1533_v35, 4  ;;  %v1595_v39 = vsel %vm942_vm13, %v1584_v25, %v1592_v19  ;;  %v1019_v20 = vadd.f32 %v1018_v17, %v1017_v62  ;;  %v1954_v11 = vpop.permute.xlu0 %1953 }
 0x751   : > { %v1082_v48 = vadd.f32 %v1081_v6, %v1080_v46  ;;  %v1597_v22 = vmul.f32 %v1595_v39, %v4229_v24 }
 0x752   : > { %v1535_v4 = vadd.f32 %v1534_v63, %v1533_v35 }
 0x753   : > { %v1083_v37 = vrot.slane %v1082_v48, 1  ;;  %v1598_v5 = vadd.f32 %v1597_v22, %v4032_v61 }
 0x754   : > { %v1536_v52 = vrot.slane %v1535_v4, 2  ;;  %v1129_v40 = vpop.permute.xlu1 %1128  ;;  %v1259_v10 = vpop.permute.xlu0 %1258 }
 0x755   : > { %v1084_v50 = vadd.f32 %v1083_v37, %v1082_v48  ;;  %v1599_v42 = vrot.slane %v1598_v5, 4  ;;  %v1140_v54 = vsel %vm942_vm13, %v1129_v40, %v1137_v1 }
 0x756   : > { %v1142_v25 = vmul.f32 %v1140_v54, %v4162_v27  ;;  %v1537_v26 = vadd.f32 %v1536_v52, %v1535_v4 }
 0x757   : > { %v1996_v13 = vsel %vm1995_vm15, %v1019_v20, %v1084_v50  ;;  %v1600_v24 = vadd.f32 %v1599_v42, %v1598_v5 }
 0x758   : > { %v1143_v0 = vadd.f32 %v1142_v25, %v4040_v21  ;;  %v1538_v43 = vrot.slane %v1537_v26, 1  ;;  %v1787_v4 = vpop.permute.xlu0 %1786 }
 0x759   : > { %v1601_v33 = vrot.slane %v1600_v24, 2  ;;  %v1657_v61 = vpop.permute.xlu1 %1656 }
 0x75a   : > { %v1144_v57 = vrot.slane %v1143_v0, 4  ;;  %v1660_v14 = vsel %vm942_vm13, %v1649_v59, %v1657_v61  ;;  %v1539_v35 = vadd.f32 %v1538_v43, %v1537_v26 }
 0x75b   : > { %v1602_v30 = vadd.f32 %v1601_v33, %v1600_v24  ;;  %v1662_v16 = vmul.f32 %v1660_v14, %v4237_v3 }
 0x75c   : > { %v1145_v1 = vadd.f32 %v1144_v57, %v1143_v0  ;;  %v1324_v54 = vpop.permute.xlu0 %1323 }
 0x75d   : > { %v1603_v29 = vrot.slane %v1602_v30, 1  ;;  %v1663_v27 = vadd.f32 %v1662_v16, %v4048_v23 }
 0x75e   : > { %v1146_v62 = vrot.slane %v1145_v1, 2  ;;  %v1194_v46 = vpop.permute.xlu1 %1193 }
 0x75f   : > { %v1604_v21 = vadd.f32 %v1603_v29, %v1602_v30  ;;  %v1664_v6 = vrot.slane %v1663_v27, 4  ;;  %v1205_v19 = vsel %vm942_vm13, %v1194_v46, %v1202_v32 }
 0x760   : > { %v1147_v63 = vadd.f32 %v1146_v62, %v1145_v1  ;;  %v1207_v59 = vmul.f32 %v1205_v19, %v4170_v56  ;;  %v1852_v43 = vpop.permute.xlu0 %1851 }
 0x761   : > { %v2005_v39 = vsel %vm1995_vm15, %v1539_v35, %v1604_v21  ;;  %v1665_v17 = vadd.f32 %v1664_v6, %v1663_v27 }
 0x762   : > { %v1148_v3 = vrot.slane %v1147_v63, 1  ;;  %v1208_v48 = vadd.f32 %v1207_v59, %v4056_v51 }
 0x763   : > { %v1666_v23 = vrot.slane %v1665_v17, 2  ;;  %v1722_v22 = vpop.permute.xlu1 %1721 }
 0x764   : > { %v1149_v37 = vadd.f32 %v1148_v3, %v1147_v63  ;;  %v1209_v5 = vrot.slane %v1208_v48, 4  ;;  %v1725_v52 = vsel %vm942_vm13, %v1714_v44, %v1722_v22  ;;  %v1389_v62 = vpop.permute.xlu0 %1388 }
 0x765   : > { %v1667_v40 = vadd.f32 %v1666_v23, %v1665_v17  ;;  %v1727_v32 = vmul.f32 %v1725_v52, %v4245_v38 }
 0x766   : > { %v1998_v56 = vsel %vm1997_vm4, %v1996_v13, %v1149_v37  ;;  %v1210_v20 = vadd.f32 %v1209_v5, %v1208_v48 }
 0x767   : > { %v1668_v50 = vrot.slane %v1667_v40, 1  ;;  %v1728_v42 = vadd.f32 %v1727_v32, %v4064_v49 }
 0x768   : > { %v1211_v51 = vrot.slane %v1210_v20, 2  ;;  %v1946_v25 = vpop.permute.xlu1 %1945 }
 0x769   : > { %v1669_v26 = vadd.f32 %v1668_v50, %v1667_v40  ;;  %v1729_v24 = vrot.slane %v1728_v42, 4  ;;  %v1957_v0 = vsel %vm942_vm13, %v1946_v25, %v1954_v11 }
 0x76a   : > { %v1212_v33 = vadd.f32 %v1211_v51, %v1210_v20  ;;  %v1965_v44 = vmul.f32 %v4070_v45, %v1957_v0 }
 0x76b   : > { %v2006_v61 = vsel %vm1997_vm4, %v2005_v39, %v1669_v26  ;;  %v1730_v38 = vadd.f32 %v1729_v24, %v1728_v42  ;;  %v1917_v39 = vpop.permute.xlu0 %1916 }
 0x76c   : > { %v1213_v57 = vrot.slane %v1212_v33, 1  ;;  %v4308_v13 = vadd.f32 %v1965_v44, %v4268_v53 }
 0x76d   : > { %v1731_v14 = vrot.slane %v1730_v38, 2  ;;  %v1267_v49 = vpop.permute.xlu1 %1266 }
 0x76e   : > { %v1214_v30 = vadd.f32 %v1213_v57, %v1212_v33  ;;  %v1270_v16 = vsel %vm942_vm13, %v1259_v10, %v1267_v49 }
 0x76f   : > { %v1732_v1 = vadd.f32 %v1731_v14, %v1730_v38  ;;  %v1272_v11 = vmul.f32 %v1270_v16, %v4180_v2 }
 0x770   : > { %v1999_v29 = vsel %vm456_vm8, %v1998_v56, %v1214_v30 }
 0x771   : > { %v1733_v45 = vrot.slane %v1732_v1, 1  ;;  %v1273_v27 = vadd.f32 %v1272_v11, %v4085_v31 }
 0x772   : > { %v1779_v46 = vpop.permute.xlu1 %1778 }
 0x773   : > { %v1734_v35 = vadd.f32 %v1733_v45, %v1732_v1  ;;  %v1274_v53 = vrot.slane %v1273_v27, 4  ;;  %v1790_v21 = vsel %vm942_vm13, %v1779_v46, %v1787_v4 }
 0x774   : > { %v1792_v6 = vmul.f32 %v1790_v21, %v4251_v55  ;;  %v1454_v55 = vpop.permute.xlu0 %1453 }
 0x775   : > { %v2007_v19 = vsel %vm456_vm8, %v2006_v61, %v1734_v35  ;;  %v1275_v10 = vadd.f32 %v1274_v53, %v1273_v27  ;;  %v4678_v27 = vld [vmem:[#allocation15_spill] sm:$0xff] }
 0x776   : > { %v1793_v63 = vadd.f32 %v1792_v6, %v4093_v28 }
 0x777   : > { %v1276_v2 = vrot.slane %v1275_v10, 2  ;;  %v1332_v59 = vpop.permute.xlu1 %1331 }
 0x778   : > { %v1794_v17 = vrot.slane %v1793_v63, 4  ;;  %v1335_v31 = vsel %vm942_vm13, %v1324_v54, %v1332_v59  ;;  %v1982_v51 = vpop.permute.xlu0 %1981 }
 0x779   : > { %v1277_v3 = vadd.f32 %v1276_v2, %v1275_v10  ;;  %v1337_v48 = vmul.f32 %v1335_v31, %v4190_v34 }
 0x77a   : > { %v1795_v23 = vadd.f32 %v1794_v17, %v1793_v63 }
 0x77b   : > { %v1278_v22 = vrot.slane %v1277_v3, 1  ;;  %v1338_v4 = vadd.f32 %v1337_v48, %v4102_v15 }
 0x77c   : > { %v1796_v37 = vrot.slane %v1795_v23, 2  ;;  %v1844_v5 = vpop.permute.xlu1 %1843  ;;  %v447_v30 = vpop.permute.xlu0 %446 }
 0x77d   : > { %v1279_v52 = vadd.f32 %v1278_v22, %v1277_v3  ;;  %v1339_v28 = vrot.slane %v1338_v4, 4  ;;  %v1855_v40 = vsel %vm942_vm13, %v1844_v5, %v1852_v43  ;;  %v4679_v5 = vld [vmem:[#allocation44_spill] sm:$0xff] }
 0x77e   : > { %v1797_v32 = vadd.f32 %v1796_v37, %v1795_v23  ;;  %v1857_v56 = vmul.f32 %v1855_v40, %v4257_v47 }
 0x77f   : > { %v1340_v20 = vadd.f32 %v1339_v28, %v1338_v4  ;;  %v2001_v50 = vsel %vm2000_vm6, %v1999_v29, %v1279_v52 }
 0x780   : > { %v1798_v34 = vrot.slane %v1797_v32, 1  ;;  %v1858_v42 = vadd.f32 %v1857_v56, %v4110_v7 }
 0x781   : > { %v1341_v54 = vrot.slane %v1340_v20, 2  ;;  %v1397_v15 = vpop.permute.xlu1 %1396 }
 0x782   : > { %v1799_v25 = vadd.f32 %v1798_v34, %v1797_v32  ;;  %v1859_v26 = vrot.slane %v1858_v42, 4  ;;  %v1400_v24 = vsel %vm942_vm13, %v1389_v62, %v1397_v15 }
 0x783   : > { %v1342_v0 = vadd.f32 %v1341_v54, %v1340_v20  ;;  %v1402_v33 = vmul.f32 %v1400_v24, %v4203_v12 }
 0x784   : > { %v2008_v44 = vsel %vm2000_vm6, %v2007_v19, %v1799_v25  ;;  %v1860_v47 = vadd.f32 %v1859_v26, %v1858_v42 }
 0x785   : > { %v1343_v61 = vrot.slane %v1342_v0, 1  ;;  %v1403_v38 = vadd.f32 %v1402_v33, %v4119_v18  ;;  %v451_v18 = vsel %vm439_vm7, %v447_v30, %v4678_v27  ;;  %v2566_v33 = vld [vmem:[%s4520_s4 + $0x6] ss:$0 sm:$0xff]  ;;  %v4682_v30 = vld [vmem:[#allocation17_spill] sm:$0xff] }
 0x786   : > { %v1861_v57 = vrot.slane %v1860_v47, 2  ;;  %v1909_v14 = vpop.permute.xlu1 %1908 }
 0x787   : > { %v1344_v7 = vadd.f32 %v1343_v61, %v1342_v0  ;;  %v1404_v49 = vrot.slane %v1403_v38, 4  ;;  %v1920_v43 = vsel %vm942_vm13, %v1909_v14, %v1917_v39  ;;  %v4681_v61 = vld [vmem:[#allocation18_spill] sm:$0xff] }
 0x788   : > { %v1862_v16 = vadd.f32 %v1861_v57, %v1860_v47  ;;  %v1922_v1 = vmul.f32 %v1920_v43, %v4263_v8  ;;  %v2021_v8 = vmul.f32 0.5, %v451_v18 }
 0x789   : > { %v1405_v11 = vadd.f32 %v1404_v49, %v1403_v38  ;;  %v2002_v12 = vsel %vm526_vm11, %v2001_v50, %v1344_v7  ;;  %v2017_v38 = vmul.f32 %v2566_v33, %v4681_v61 }
 0x78a   : > { %v1863_v29 = vrot.slane %v1862_v16, 1  ;;  %v1923_v45 = vadd.f32 %v1922_v1, %v4129_v58  ;;  %3055 = vtanh.f32 %v2021_v8  ;;  %v2963_v8 = vld [vmem:[%s4519_s3 + $0x10] sm:$0xff]  }
 0x78b   : > { %v1406_v62 = vrot.slane %v1405_v11, 2  ;;  %v1462_v46 = vpop.permute.xlu1 %1461 }
 0x78c   : > { %v1864_v35 = vadd.f32 %v1863_v29, %v1862_v16  ;;  %v1924_v53 = vrot.slane %v1923_v45, 4  ;;  %v1465_v21 = vsel %vm942_vm13, %v1454_v55, %v1462_v46  ;;  %v2016_v16 = vmul.f32 %v2566_v33, %v4682_v30 }
 0x78d   : > { %v1407_v6 = vadd.f32 %v1406_v62, %v1405_v11  ;;  %v1467_v19 = vmul.f32 %v1465_v21, %v4213_v36  ;;  %v4683_v21 = vmov 0.0  }
 0x78e   : > { %v2009_v10 = vsel %vm526_vm11, %v2008_v44, %v1864_v35  ;;  %v1925_v63 = vadd.f32 %v1924_v53, %v1923_v45 }
 0x78f   : > { %v1408_v2 = vrot.slane %v1407_v6, 1  ;;  %v1468_v58 = vadd.f32 %v1467_v19, %v4139_v60  ;;  %v2962_v19 = vld [vmem:[%s4519_s3 + $0x8] sm:$0xff]  }
 0x790   : > { %v1926_v59 = vrot.slane %v1925_v63, 2  ;;  %v1974_v39 = vpop.permute.xlu1 %1973 }
 0x791   : > { %v1409_v17 = vadd.f32 %v1408_v2, %v1407_v6  ;;  %v1469_v31 = vrot.slane %v1468_v58, 4  ;;  %v1985_v3 = vsel %vm942_vm13, %v1974_v39, %v1982_v51  ;;  %v4684_v6 = vld [vmem:[#allocation14_spill] sm:$0xff] }
 0x792   : > { %v1927_v48 = vadd.f32 %v1926_v59, %v1925_v63  ;;  %v1987_v23 = vmul.f32 %v1985_v3, %v4308_v13  ;;  %v4680_v13 = vld [vmem:[#allocation16_spill] sm:$0xff] }
 0x793   : > { %v1470_v22 = vadd.f32 %v1469_v31, %v1468_v58  ;;  %v2003_v36 = vsel %vm506_vm10, %v2002_v12, %v1409_v17  ;;  %v4389_v31 = vsel %vm3358_vm2, 1.0, %v4683_v21 }
 0x794   : > { %v1928_v4 = vrot.slane %v1927_v48, 1  ;;  %v1978_v55 = vpop.permute.xlu1 %1977  ;;  %v3056_v51 = vpop.eup %3055 }
 0x795   : > { %v1471_v37 = vrot.slane %v1470_v22, 2  ;;  %v1984_v60 = vsel %vm942_vm13, %v4679_v5, %v1978_v55  ;;  %v2025_v24 = vadd.f32 1.0, %v3056_v51 }
 0x796   : > { %v1929_v52 = vadd.f32 %v1928_v4, %v1927_v48  ;;  %v1986_v28 = vmul.f32 %v1984_v60, %v4078_v9  ;;  %v4394_v48 = vsel %vm3364_vm3, 1.0, %v4683_v21 }
 0x797   : > { %v1472_v40 = vadd.f32 %v1471_v37, %v1470_v22  ;;  %v2027_v44 = vmul.f32 0.5, %v2025_v24 }
 0x798   : > { %v1988_v32 = vadd.f32 %v1987_v23, %v1986_v28  ;;  %v445_v56 = vpop.permute.xlu1 %444  ;;  %v2010_v20 = vsel %vm506_vm10, %v2009_v10, %v1929_v52  ;;  %v2964_v10 = vld [vmem:[%s4519_s3 + $0x18] sm:$0xff]   ;;  %v3067_v23 = vld [vmem:[%s3330_s14] sm:$0xff] }
 0x799   : > { %v1473_v50 = vrot.slane %v1472_v40, 1  ;;  %v450_v34 = vsel %vm439_vm7, %v445_v56, %v4680_v13  ;;  %v2029_v7 = vmul.f32 %v2027_v44, %v451_v18  ;;  %v2961_v18 = vld [vmem:[%s4519_s3] sm:$0xff]   ;;  %v2194_v22 = vmul.f32 %v3067_v23, %v4389_v31 }
 0x79a   : > { %v1989_v42 = vrot.slane %v1988_v32, 4  ;;  %v2020_v54 = vmul.f32 0.5, %v450_v34 }
 0x79b   : > { %v1474_v15 = vadd.f32 %v1473_v50, %v1472_v40 }
 0x79c   : > { %v1990_v25 = vadd.f32 %v1989_v42, %v1988_v32  ;;  %3057 = vtanh.f32 %v2020_v54 }
 0x79d   : > { %v2004_v41 = vsel %vm486_vm9, %v2003_v36, %v1474_v15  ;;  %v3068_v36 = vld [vmem:[%s3330_s14 + $0x8] sm:$0xff]  ;;  %s3113_s14 = sshll.u32 %s3206_s13, 4  ;;  %s3114_s14 = int_to_ptr.vmem [resolvable:$false] %s3113_s14 }
 0x79e   : > { %v1991_v26 = vrot.slane %v1990_v25, 2  ;;  %v2018_v12 = vadd.f32 %v2016_v16, %v2004_v41  ;;  %v2195_v4 = vmul.f32 %v3068_v36, %v4394_v48  ;;  %v2965_v41 = vld [vmem:[#allocation4 + $0x90] sm:$0xff]   ;;  %s3115_s12 = scalar_lea.vmem %s3114_s14, 512  ;;  %p3116_p7 = scmp.lt.s32.totalorder %s4470_s27, %s3114_s14 }
 0x79f   : > { %2717 = vmatpush3.bf16.msra.mxu1 %v2965_v41  ;;  %p3117_p8 = scmp.lt.s32.totalorder %s3115_s12, %s3109_s10 }
 0x7a0   : > { %v1992_v9 = vadd.f32 %v1991_v26, %v1990_v25  ;;  %v2966_v26 = vld [vmem:[#allocation4 + $0x98] sm:$0xff]   ;;  %2718 = vmatprep.subr.bf16.mxu1 %v4683_v21 }
 0x7a1   : > { %p3118_p9 = por %p3117_p8, %p3116_p7 }
 0x7a2   : > { %v1993_v0 = vrot.slane %v1992_v9, 1 }
 0x7a3   : > { %2719 = vmatpush3.bf16.msra.mxu1 %v2966_v26  ;;  %p3119_p12 = pnand %p3118_p9, %p3112_p3 }
 0x7a4   : > { %v1994_v47 = vadd.f32 %v1993_v0, %v1992_v9  ;;  %2724 = vmatprep.subr.bf16.mxu1 %v4683_v21 }
 0x7a6   : > { %v3058_v57 = vpop.eup %3057  ;;  %v2011_v14 = vsel %vm486_vm9, %v2010_v20, %v1994_v47 }
 0x7a7   : > { %v2019_v49 = vadd.f32 %v2017_v38, %v2011_v14  ;;  %v2024_v43 = vadd.f32 1.0, %v3058_v57  ;;  %v2574_v57 = vld [vmem:[%s4520_s4 + $0x1a] ss:$0 sm:$0xff] }
 0x7a9   : > { %v2026_v1 = vmul.f32 0.5, %v2024_v43  ;;  %v2031_v11 = vmul.f32 %v2029_v7, %v2019_v49  ;;  %v2575_v43 = vld [vmem:[%s4520_s4 + $0x1b] ss:$0 sm:$0xff] }
 0x7ab   : > { %v2028_v29 = vmul.f32 %v2026_v1, %v450_v34 }
 0x7ad   : > { %v2030_v45 = vmul.f32 %v2028_v29, %v2018_v12  ;;  %v2967_v12 = vld [vmem:[%s4519_s3 + $0x20] sm:$0xff]   ;;  %v2968_v29 = vld [vmem:[%s4519_s3 + $0x28] sm:$0xff]  }
 0x7af   : > { %v2938_v27 = vpack.i.bf16 %v2031_v11, %v2030_v45 }
 0x7b1   : > { %2939 = vrot.lane.b32.xlu1 %v2938_v27, %s3185_s19  ;;  %v2970_v27 = vld [vmem:[%s4519_s3 + $0x38] sm:$0xff]  }
 0x823   : > { %v2940_v62 = vpop.permute.xlu1 %2939 }
 0x824   : > { %v2942_v46 = vunpack.i.h.bf16 %v2940_v62  ;;  %v2941_v35 = vunpack.i.l.bf16 %v2940_v62  ;;  %v2971_v62 = vld [vmem:[%s4519_s3 + $0x40] sm:$0xff]  }
 0x826   : > { %v2748_v53 = vpack.c.bf16 %v2942_v46, %v2941_v35  ;;  %v2972_v46 = vld [vmem:[%s4519_s3 + $0x48] sm:$0xff]   ;;  %v2973_v35 = vld [vmem:[%s4519_s3 + $0x50] sm:$0xff]  }
 0x828   : > { %2749 = vmatprep.subr.bf16.mxu0 %v2748_v53 }
 0x829   : > { %2751 = vmatpush3.bf16.msra.mxu0 %v2748_v53  ;;  %v2974_v53 = vld [vmem:[%s4519_s3 + $0x58] sm:$0xff]  }
 0x82a   : > { %2704 = vmatprep.subr.bf16.mxu0 %v4683_v21 }
 0x82c   : > { %2702 = vmatmul.mubr.msk.f32.vlgmr.msra.gmra.mrb[6].mxu0 %vm349_vm5, %v4684_v6 }
 0x82d   : > { %2705 = vmatpush3.bf16.msra.mxu0 %v2961_v18  ;;  %2712 = vmatprep.mubr.msk.bf16.mxu0 %vm3184_vm1, %v4683_v21  ;;  %v2576_v18 = vld [vmem:[%s4520_s4 + $0x7] ss:$0 sm:$0xff] }
 0x82e   : > { %2706 = vmatprep.subr.bf16.mxu0 %v4683_v21 }
 0x831   : > { %2707 = vmatpush3.bf16.msra.mxu0 %v2962_v19 }
 0x832   : > { %2708 = vmatprep.subr.bf16.mxu0 %v4683_v21 }
 0x835   : > { %2709 = vmatpush3.bf16.msra.mxu0 %v2963_v8 }
 0x836   : > { %2710 = vmatprep.subr.bf16.mxu0 %v4683_v21 }
 0x839   : > { %2711 = vmatpush3.bf16.msra.mxu0 %v2964_v10 }
 0x8ff   : > { %v2703_v63 = vpop.f32.mrb[6].mxu0 }
 0x900   : > { %v2116_v2 = vadd.f32 %v2703_v63, %v2031_v11  ;;  %v2106_v58 = vpop.f32.mrb[7].mxu0 }
 0x901   : > { %v2115_v59 = vadd.f32 %v2106_v58, %v2030_v45  ;;  %v2969_v45 = vld [vmem:[%s4519_s3 + $0x30] sm:$0xff]  }
 0x903   : > { %v2117_v39 = vpack.c.bf16 %v2116_v2, %v2115_v59 }
 0x905   : > { %2713 = vmatmul.mubr.msk.bf16.vlgmr.msra.gmra.mrb[12].mxu0 %vm439_vm7, %v2117_v39 }
 0x9d8   : > { %v2187_v55 = vpop.f32.mrb[12].mxu0 }
 0x9d9   : > { %v4400_v37 = vadd.f32 %v2194_v22, %v2187_v55  ;;  %v2714_v5 = vpop.f32.mrb[13].mxu0 }
 0x9da   : > { %v2190_v60 = vpop.f32.mrb[14].mxu0 }
 0x9db   : > { %v4402_v52 = vadd.f32 %v2195_v4, %v2190_v60  ;;  %v2715_v28 = vpop.f32.mrb[15].mxu0  ;;  %v2200_v40 = vsel %vm234_vm0, %v4400_v37, 0.0 }
 0x9dc   : > { %2201 = vadd.xlane.f32.xlu0 %v2200_v40 }
 0x9dd   : > { %v2203_v32 = vsel %vm234_vm0, %v4402_v52, 0.0 }
 0x9de   : > { %2204 = vadd.xlane.f32.xlu1 %v2203_v32 }
 0xa69   : > { %v2202_v56 = vpop.xlane.xlu0 %2201 }
 0xa6a   : > { %v2206_v20 = vmul.f32 0.03125, %v2202_v56 }
 0xa6b   : > { %v2205_v50 = vpop.xlane.xlu1 %2204 }
 0xa6c   : > { %v2208_v13 = vsub.f32 %v4400_v37, %v2206_v20  ;;  %v2207_v34 = vmul.f32 0.03125, %v2205_v50 }
 0xa6e   : > { %v2209_v42 = vsub.f32 %v4402_v52, %v2207_v34  ;;  %v2210_v54 = vmul.f32 %v2208_v13, %v2208_v13 }
 0xa70   : > { %v2212_v15 = vsel %vm234_vm0, %v2210_v54, 0.0  ;;  %v2211_v51 = vmul.f32 %v2209_v42, %v2209_v42 }
 0xa71   : > { %2213 = vadd.xlane.f32.xlu0 %v2212_v15 }
 0xa72   : > { %v2215_v25 = vsel %vm234_vm0, %v2211_v51, 0.0 }
 0xa75   : > { %2216 = vadd.xlane.f32.xlu0 %v2215_v25 }
 0xafe   : > { %v2214_v24 = vpop.xlane.xlu0 %2213 }
 0xaff   : > { %v2218_v9 = vmul.f32 0.03125, %v2214_v24 }
 0xb01   : > { %v2220_v0 = vadd.f32 1e-05, %v2218_v9 }
 0xb02   : > { %v2217_v33 = vpop.xlane.xlu0 %2216 }
 0xb03   : > { %3059 = vrsqrt.f32 %v2220_v0  ;;  %v2219_v44 = vmul.f32 0.03125, %v2217_v33 }
 0xb05   : > { %v2221_v47 = vadd.f32 1e-05, %v2219_v44 }
 0xb07   : > { %3061 = vrsqrt.f32 %v2221_v47 }
 0xb0d   : > { %v3060_v61 = vpop.eup %3059 }
 0xb0e   : > { %v2224_v38 = vmul.f32 %v3060_v61, %v2208_v13  ;;  %v2580_v13 = vld [vmem:[%s4520_s4 + $0x1c] ss:$0 sm:$0xff] }
 0xb10   : > { %v2230_v7 = vmul.f32 %v2574_v57, %v2224_v38 }
 0xb11   : > { %v3062_v14 = vpop.eup %3061 }
 0xb12   : > { %v2225_v49 = vmul.f32 %v3062_v14, %v2209_v42  ;;  %v2236_v16 = vadd.f32 %v2575_v43, %v2230_v7 }
 0xb14   : > { %v2231_v30 = vmul.f32 %v2574_v57, %v2225_v49 }
 0xb16   : > { %v2237_v1 = vadd.f32 %v2575_v43, %v2231_v30 }
 0xb18   : > { %v2238_v11 = vpack.c.bf16 %v2237_v1, %v2236_v16 }
 0xb1a   : > { %2721 = vmatmul.mubr.msk.bf16.vlgmr.msra.gmra.mrb[4].mxu1 %vm234_vm0, %v2238_v11 }
 0xb1b   : > { %2740 = vmatprep.mubr.msk.bf16.mxu1 %vm3184_vm1, %v4683_v21  ;;  %2725 = vmatpush3.bf16.msra.mxu1 %v2967_v12 }
 0xb1c   : > { %2726 = vmatprep.subr.bf16.mxu1 %v4683_v21 }
 0xb1f   : > { %2727 = vmatpush3.bf16.msra.mxu1 %v2968_v29 }
 0xb20   : > { %2728 = vmatprep.subr.bf16.mxu1 %v4683_v21 }
 0xb23   : > { %2729 = vmatpush3.bf16.msra.mxu1 %v2969_v45 }
 0xb24   : > { %2730 = vmatprep.subr.bf16.mxu1 %v4683_v21 }
 0xb27   : > { %2731 = vmatpush3.bf16.msra.mxu1 %v2970_v27 }
 0xb28   : > { %2732 = vmatprep.subr.bf16.mxu1 %v4683_v21 }
 0xb2b   : > { %2733 = vmatpush3.bf16.msra.mxu1 %v2971_v62 }
 0xb2c   : > { %2734 = vmatprep.subr.bf16.mxu1 %v4683_v21 }
 0xb2f   : > { %2735 = vmatpush3.bf16.msra.mxu1 %v2972_v46 }
 0xb30   : > { %2736 = vmatprep.subr.bf16.mxu1 %v4683_v21 }
 0xb33   : > { %2737 = vmatpush3.bf16.msra.mxu1 %v2973_v35 }
 0xb34   : > { %2738 = vmatprep.subr.bf16.mxu1 %v4683_v21 }
 0xb37   : > { %2739 = vmatpush3.bf16.msra.mxu1 %v2974_v53 }
 0xbed   : > { %v2297_v6 = vpop.f32.mrb[4].mxu1 }
 0xbee   : > { %v2298_v19 = vadd.f32 %v2576_v18, %v2297_v6  ;;  %v2722_v8 = vpop.f32.mrb[5].mxu1 }
 0xbef   : > { %v2300_v10 = vpop.f32.mrb[6].mxu1 }
 0xbf0   : > { %v2306_v63 = vmul.f32 0.044715, %v2298_v19  ;;  %v2301_v2 = vadd.f32 %v2576_v18, %v2300_v10  ;;  %v2723_v58 = vpop.f32.mrb[7].mxu1  ;;  %v2304_v28 = vmul.f32 0.5, %v2298_v19 }
 0xbf2   : > { %v2308_v59 = vmul.f32 %v2306_v63, %v2298_v19  ;;  %v2307_v39 = vmul.f32 0.044715, %v2301_v2  ;;  %v2305_v40 = vmul.f32 0.5, %v2301_v2 }
 0xbf4   : > { %v2310_v17 = vmul.f32 %v2308_v59, %v2298_v19  ;;  %v2309_v3 = vmul.f32 %v2307_v39, %v2301_v2 }
 0xbf6   : > { %v2312_v23 = vadd.f32 %v2310_v17, %v2298_v19  ;;  %v2311_v22 = vmul.f32 %v2309_v3, %v2301_v2 }
 0xbf8   : > { %v2314_v21 = vmul.f32 0.7978846, %v2312_v23  ;;  %v2313_v36 = vadd.f32 %v2311_v22, %v2301_v2 }
 0xbfa   : > { %3063 = vtanh.f32 %v2314_v21  ;;  %v2315_v4 = vmul.f32 0.7978846, %v2313_v36 }
 0xbfc   : > { %3065 = vtanh.f32 %v2315_v4 }
 0xc04   : > { %v3064_v55 = vpop.eup %3063 }
 0xc05   : > { %v2318_v5 = vadd.f32 1.0, %v3064_v55 }
 0xc06   : > { %v3066_v60 = vpop.eup %3065 }
 0xc07   : > { %v2319_v32 = vadd.f32 1.0, %v3066_v60  ;;  %v2320_v56 = vmul.f32 %v2318_v5, %v2304_v28 }
 0xc09   : > { %v2321_v20 = vmul.f32 %v2319_v32, %v2305_v40 }
 0xc0b   : > { %v2322_v50 = vpack.c.bf16 %v2321_v20, %v2320_v56 }
 0xc0d   : > { %2741 = vmatmul.mubr.bf16.vlgmr.msra.gmra.mrb[8].mxu1 %v2322_v50 }
 0xce0   : > { %v2426_v34 = vpop.f32.mrb[8].mxu1 }
 0xce1   : > { %v2427_v42 = vadd.f32 %v2580_v13, %v2426_v34  ;;  %v2742_v54 = vpop.f32.mrb[9].mxu1 }
 0xce2   : > { %v2429_v15 = vpop.f32.mrb[10].mxu1 }
 0xce3   : > { %v2433_v51 = vmul.f32 %v4389_v31, %v2427_v42  ;;  %v2430_v25 = vadd.f32 %v2580_v13, %v2429_v15  ;;  %v2743_v41 = vpop.f32.mrb[11].mxu1 }
 0xce5   : > { %v2435_v26 = vadd.f32 %v2433_v51, %v4400_v37  ;;  %v2434_v24 = vmul.f32 %v4394_v48, %v2430_v25 }
 0xce7   : > { %2437 = vst.msk [vmem:[%s212_s22] sm:$0xff] %vm234_vm0, %v2435_v26  ;;  %v2436_v31 = vadd.f32 %v2434_v24, %v4402_v52 }
 0xce9   : > { %2438 = vst.msk [vmem:[%s212_s22 + $0x8] sm:$0xff] %vm234_vm0, %v2436_v31 }
 0xcea   : > { %3122 = shalt.err (!%p3119_p12)
}
 0xceb   : > { %s3123_s9 = scalar_lea.hbm %s4468_s30, 256  ;;  %s3127_s16 = scalar_lea.hbm %s4521_s5, 512 }
 0xcec   : > { %p3124_p13 = scmp.ne.s32.totalorder %s4468_s30, %s3123_s9  ;;  %p3128_p6 = scmp.lt.u32.totalorder %s4468_s30, %s4521_s5 }
 0xced   : > { %p3129_p5 = scmp.lt.u32.totalorder %s3127_s16, %s3123_s9  ;;  %p3131_p11 = scmp.lt.u32.totalorder %s3123_s9, %s4468_s30 }
 0xcee   : > { %p3125_p2 = pnand %p3124_p13, %p4687_p0 }
 0xcef   : > { %p3130_p10 = por %p3129_p5, %p3128_p6 }
 0xcf0   : > { %p3126_p4 = pneg %p3125_p2 }
 0xcf1   : > { %p3132_p1 = por %p3131_p11, %p3130_p10 }
 0xcf3   : > { %p3133_p3 = pnand %p3132_p1, %p3126_p4 }
 0xcf5   : > { %3136 = shalt.err (!%p3133_p3)
}
 0xcf6   : > { %s3207_s20 = smov 128   ;;  %s3208_s21 = smov 8  }
 0xcf7   : > { %2756 = dma.vmem_to_hbm [thread:$0]  (%p4687_p0), %s4470_s27, 256, %s4468_s30, %s4475_s26, %s3207_s20, %s3207_s20, %s3208_s21  }
 0xcf8 PF: > { %p2768_p7 = scmp.ge.s32.totalorder %s3177_s25, 2  ;;  %s2468_s22 = sand.u32 1, %s3165_s23  }
 0xcf9   : > { %p4688_p8 = scmp.ne.s32.totalorder %s4592_s8, 0  ;;  %s2469_s29 = scalar_lea.sflag [#allocation6], %s2468_s22 }
 0xcfb   : > { %p2763_p9 = pnand %p2768_p7, %p4688_p8 }
 0xcfd   : > { %3160 = dma.done.wait (!%p2763_p9), %s2469_s29, 256  }
 0xcfe   : > { %3162 = vsyncadd (!%p2763_p9), %s2469_s29, 4294967040  ;;  %p22_p12 = scmp.ge.s32.totalorder %s3267_s28, 4   ;;  %s4689_s23 = smov %s3169_s24 }
 0xcff   : > { %s4690_s24 = smov %s3173_s0  ;;  %s4691_s0 = smov %s3278_s6 }
 0xd00   : > { %s4692_s25 = smov %s3267_s28  ;;  %24 = sbr.rel (!%p22_p12) target bundleno = 19 (0x13), region = 76 }
 0xd07   :  { %2474 = vsyncpa [#allocation5], 1 }
 0xd08   :  { %2476 = vsyncpa [#allocation5 + $0x1], 1 }
 0xd09   :  { %2477 = vsyncpa [#allocation6], 1 }
 0xd0a   :  { %2479 = vsyncpa [#allocation6 + $0x1], 1 }

</bundles_post_ra>
